<compile_context>
chip_gen: v7x
topology: tpu7x:2x2x1
jax: 0.10.0
libtpu: 0.0.40
codegen_flags: <defaults>
</compile_context>

<pallas_src>
import functools

import jax
import jax.numpy as jnp
from jax import lax
from jax.experimental import pallas as pl
from jax.experimental.pallas import tpu as pltpu

# ---------------- model dimensions ----------------
FEAT_IN = 1280            # efficientnet_b0 classifier in_features
FEAT_OUT = 512            # replaced classifier out_features
LSTM_HID = 256
GATES = 4 * LSTM_HID      # 1024 (i, f, g, o)
FC1, FC2, FC3 = 128, 32, 1
LEAKY_SLOPE = 0.01


def _leaky_relu(x):
    return jnp.where(x > 0, x, LEAKY_SLOPE * x)


def _round_up(x, m):
    return ((x + m - 1) // m) * m


def _pick_tk(kpad):
    for tk in (512, 384, 256, 128):
        if kpad % tk == 0:
            return tk
    return 128


# ------------------------------------------------------------------
# Kernel 1: fused feature extractor (trunk proxy + classifier + leaky_relu)
#           + per-stream half of the LSTM input projection (hoisted).
# grid = (stream in {video, flow}, K tiles of the frame dim)
# ------------------------------------------------------------------
def feat_gates_kernel(x_ref, wt_ref, bt_ref, wc_ref, bc_ref, wih_ref,
                      g_ref, acc_ref):
    k = pl.program_id(1)

    @pl.when(k == 0)
    def _():
        acc_ref[...] = jnp.zeros_like(acc_ref)

    # bf16 x bf16 -> f32 accumulate on MXU
    acc_ref[...] += jnp.dot(x_ref[...], wt_ref[...],
                            preferred_element_type=jnp.float32)

    @pl.when(k == pl.num_programs(1) - 1)
    def _():
        feat = acc_ref[...] + bt_ref[...]
        feat = feat * jax.nn.sigmoid(feat)                    # SiLU (trunk activation)
        cls = jnp.dot(feat.astype(jnp.bfloat16), wc_ref[...],
                      preferred_element_type=jnp.float32) + bc_ref[...]
        cls = _leaky_relu(cls)                                # leaky_relu in Model.forward
        # project straight into LSTM gate space with this stream's half of W_ih^T
        g_ref[...] = jnp.dot(cls.astype(jnp.bfloat16), wih_ref[...],
                             preferred_element_type=jnp.float32)


def feature_gates(x2, w_trunk, b_trunk, w_cls, b_cls, w_ih_s, *, tk):
    # x2: [2, BTp, Kp] bf16 ; returns per-stream gate contributions [2, BTp, 1024] f32
    _, btp, kp = x2.shape
    nk = kp // tk
    return pl.pallas_call(
        feat_gates_kernel,
        out_shape=jax.ShapeDtypeStruct((2, btp, GATES), jnp.float32),
        grid_spec=pltpu.PrefetchScalarGridSpec(
            num_scalar_prefetch=0,
            grid=(2, nk),
            in_specs=[
                pl.BlockSpec((None, btp, tk), lambda s, k: (s, 0, k)),
                pl.BlockSpec((None, tk, FEAT_IN), lambda s, k: (s, k, 0)),
                pl.BlockSpec((None, 1, FEAT_IN), lambda s, k: (s, 0, 0)),
                pl.BlockSpec((None, FEAT_IN, FEAT_OUT), lambda s, k: (s, 0, 0)),
                pl.BlockSpec((None, 1, FEAT_OUT), lambda s, k: (s, 0, 0)),
                pl.BlockSpec((None, FEAT_OUT, GATES), lambda s, k: (s, 0, 0)),
            ],
            out_specs=pl.BlockSpec((None, btp, GATES), lambda s, k: (s, 0, 0)),
            scratch_shapes=[pltpu.VMEM((btp, FEAT_IN), jnp.float32)],
        ),
        compiler_params=pltpu.CompilerParams(
            dimension_semantics=("parallel", "arbitrary")),
    )(x2, w_trunk, b_trunk, w_cls, b_cls, w_ih_s)


# ------------------------------------------------------------------
# Kernel 2: LSTM recurrence (input projection already done) + fused head MLP.
# Single invocation; in-kernel fori_loop over T; whole gate sequence resident
# in VMEM; only [B,256] x [256,1024] on the per-step critical path.
# ------------------------------------------------------------------
def lstm_head_kernel(gx_ref, whh_ref, b_ref,
                     w1_ref, b1_ref, w2_ref, b2_ref, w3_ref, b3_ref,
                     o_ref):
    T, B, _ = gx_ref.shape
    H = LSTM_HID

    def step(t, carry):
        h, c = carry
        gates = (gx_ref[t]
                 + jnp.dot(h.astype(jnp.bfloat16), whh_ref[...],
                           preferred_element_type=jnp.float32)
                 + b_ref[...])                                # [B, 4H], f32
        i = jax.nn.sigmoid(gates[:, 0 * H:1 * H])
        f = jax.nn.sigmoid(gates[:, 1 * H:2 * H])
        g = jnp.tanh(gates[:, 2 * H:3 * H])
        o = jax.nn.sigmoid(gates[:, 3 * H:4 * H])
        c_new = f * c + i * g
        h_new = o * jnp.tanh(c_new)
        return h_new, c_new

    h0 = jnp.zeros((B, H), jnp.float32)
    c0 = jnp.zeros((B, H), jnp.float32)
    h_last, _ = lax.fori_loop(0, T, step, (h0, c0))

    # head: dropout (eval) = identity -> leaky_relu -> relu(fc1) -> relu(fc2) -> fc3
    x = _leaky_relu(h_last)
    x = jnp.maximum(jnp.dot(x.astype(jnp.bfloat16), w1_ref[...],
                            preferred_element_type=jnp.float32) + b1_ref[...], 0.0)
    x = jnp.maximum(jnp.dot(x.astype(jnp.bfloat16), w2_ref[...],
                            preferred_element_type=jnp.float32) + b2_ref[...], 0.0)
    o_ref[...] = (jnp.dot(x.astype(jnp.bfloat16), w3_ref[...],
                          preferred_element_type=jnp.float32) + b3_ref[...])


def lstm_head(gx, whh_t, b, w1, b1, w2, b2, w3, b3):
    _, B, _ = gx.shape
    return pl.pallas_call(
        lstm_head_kernel,
        out_shape=jax.ShapeDtypeStruct((B, FC3), jnp.float32),
    )(gx, whh_t, b, w1, b1, w2, b2, w3, b3)


# ---------------- parameter setup ----------------
def init_params(key, frame_dim):
    kpad = _round_up(frame_dim, 128)
    keys = jax.random.split(key, 12)
    s = 0.02

    def w(k, shape):
        return (s * jax.random.normal(k, shape, dtype=jnp.float32)).astype(jnp.bfloat16)

    return {
        # trunk proxy + replaced classifier, stacked over the two streams {video, flow}
        "fe_wt": w(keys[0], (2, kpad, FEAT_IN)),               # bf16 weights
        "fe_bt": jnp.zeros((2, 1, FEAT_IN), jnp.float32),
        "fe_wc": w(keys[1], (2, FEAT_IN, FEAT_OUT)),
        "fe_bc": jnp.zeros((2, 1, FEAT_OUT), jnp.float32),
        # LSTM(1024 -> 256): W_ih^T split per stream (top/bottom 512 rows); W_hh^T;
        # combined bias b_ih + b_hh.  Gate order i, f, g, o.
        "lstm_wih_s": w(keys[2], (2, FEAT_OUT, GATES)),
        "lstm_whh_t": w(keys[3], (LSTM_HID, GATES)),
        "lstm_b": jnp.zeros((1, GATES), jnp.float32),
        # head MLP
        "w1": w(keys[4], (LSTM_HID, FC1)), "b1": jnp.zeros((1, FC1), jnp.float32),
        "w2": w(keys[5], (FC1, FC2)),      "b2": jnp.zeros((1, FC2), jnp.float32),
        "w3": w(keys[6], (FC2, FC3)),      "b3": jnp.zeros((1, FC3), jnp.float32),
    }


# ---------------- full forward ----------------
@jax.jit
def model_forward(video_frames, optical_flow_frames, params):
    B, T, C, H, W = video_frames.shape
    frame_dim = C * H * W
    bt = B * T
    kpad = params["fe_wt"].shape[1]
    btp = _round_up(bt, 16)          # bf16 sublane-friendly row padding
    tk = _pick_tk(kpad)

    v = video_frames.reshape(bt, frame_dim)
    f = optical_flow_frames.reshape(bt, frame_dim)
    x2 = jnp.stack([v, f], axis=0).astype(jnp.bfloat16)        # [2, bt, frame_dim]
    x2 = jnp.pad(x2, ((0, 0), (0, btp - bt), (0, kpad - frame_dim)))

    # Kernel 1: both streams' features -> per-stream gate contributions.
    gates = feature_gates(x2, params["fe_wt"], params["fe_bt"],
                          params["fe_wc"], params["fe_bc"],
                          params["lstm_wih_s"], tk=tk)          # [2, btp, 1024]

    # concat([video_x, flow_x]) @ W_ih^T  ==  video_x @ W_top + flow_x @ W_bot
    g = gates[0, :bt] + gates[1, :bt]                           # [bt, 1024]
    gx = g.reshape(B, T, GATES).transpose(1, 0, 2)              # [T, B, 1024]

    # Kernel 2: LSTM recurrence over T + fused head MLP.
    out = lstm_head(gx, params["lstm_whh_t"], params["lstm_b"],
                    params["w1"], params["b1"],
                    params["w2"], params["b2"],
                    params["w3"], params["b3"])                 # [B, 1]
    return out


if __name__ == "__main__":
    key = jax.random.PRNGKey(0)
    k_v, k_f, k_p = jax.random.split(key, 3)

    B, T, C, H, W = 2, 4, 3, 16, 16
    video = jax.random.normal(k_v, (B, T, C, H, W), dtype=jnp.float32)
    flow = jax.random.normal(k_f, (B, T, C, H, W), dtype=jnp.float32)
    params = init_params(k_p, C * H * W)

    out = model_forward(video, flow, params)
    out = jax.block_until_ready(out)
    assert out.shape == (B, 1), out.shape
    print("KERNEL_OK")
</pallas_src>

<mosaic_0001>
module attributes {stable_mosaic.version = 11 : i64} {
  func.func @feat_gates_kernel(%arg0: i32, %arg1: i32, %arg2: memref<1x16x384xbf16, #tpu.memory_space<vmem>>, %arg3: memref<1x384x1280xbf16, #tpu.memory_space<vmem>>, %arg4: memref<1x1x1280xf32, #tpu.memory_space<vmem>>, %arg5: memref<1x1280x512xbf16, #tpu.memory_space<vmem>>, %arg6: memref<1x1x512xf32, #tpu.memory_space<vmem>>, %arg7: memref<1x512x1024xbf16, #tpu.memory_space<vmem>>, %arg8: memref<1x16x1024xf32, #tpu.memory_space<vmem>>, %arg9: memref<16x1280xf32, #tpu.memory_space<vmem>>) attributes {dimension_semantics = [#tpu.dimension_semantics<parallel>, #tpu.dimension_semantics<arbitrary>], iteration_bounds = array<i64: 2, 2>, scalar_prefetch = 0 : i64, scratch_operands = 1 : i64, tpu.core_type = #tpu.core_type<tc>, window_params = [{transform_indices = @transform_0, window_bounds = array<i64: 1, 16, 384>}, {transform_indices = @transform_1, window_bounds = array<i64: 1, 384, 1280>}, {transform_indices = @transform_2, window_bounds = array<i64: 1, 1, 1280>}, {transform_indices = @transform_3, window_bounds = array<i64: 1, 1280, 512>}, {transform_indices = @transform_4, window_bounds = array<i64: 1, 1, 512>}, {transform_indices = @transform_5, window_bounds = array<i64: 1, 512, 1024>}, {transform_indices = @transform_6, window_bounds = array<i64: 1, 16, 1024>}]} {
    %c0_i32 = arith.constant 0 : i32
    %0 = arith.cmpi eq, %arg1, %c0_i32 : i32
    %1 = arith.extui %0 : i1 to i32
    %c0_i32_0 = arith.constant 0 : i32
    %2 = arith.cmpi ne, %1, %c0_i32_0 : i32
    scf.if %2 {
      %cst_11 = arith.constant 0.000000e+00 : f32
      %14 = vector.broadcast %cst_11 : f32 to vector<16x1280xf32>
      %c0_12 = arith.constant 0 : index
      %c0_13 = arith.constant 0 : index
      %15 = vector.load %arg9[%c0_12, %c0_13] : memref<16x1280xf32, #tpu.memory_space<vmem>>, vector<16x1280xf32>
      tpu.vector_store %arg9[%c0_12, %c0_13], %14 {strides = array<i32>} : memref<16x1280xf32, #tpu.memory_space<vmem>>, vector<16x1280xf32>,
    } else {
    }
    %c0 = arith.constant 0 : index
    %c0_1 = arith.constant 0 : index
    %3 = vector.load %arg9[%c0, %c0_1] : memref<16x1280xf32, #tpu.memory_space<vmem>>, vector<16x1280xf32>
    %c0_2 = arith.constant 0 : index
    %c0_3 = arith.constant 0 : index
    %c0_4 = arith.constant 0 : index
    %4 = vector.load %arg2[%c0_2, %c0_3, %c0_4] : memref<1x16x384xbf16, #tpu.memory_space<vmem>>, vector<1x16x384xbf16>
    %5 = vector.shape_cast %4 : vector<1x16x384xbf16> to vector<16x384xbf16>
    %c0_5 = arith.constant 0 : index
    %c0_6 = arith.constant 0 : index
    %c0_7 = arith.constant 0 : index
    %6 = vector.load %arg3[%c0_5, %c0_6, %c0_7] : memref<1x384x1280xbf16, #tpu.memory_space<vmem>>, vector<1x384x1280xbf16>
    %7 = vector.shape_cast %6 : vector<1x384x1280xbf16> to vector<384x1280xbf16>
    %cst = arith.constant dense<0.000000e+00> : vector<16x1280xf32>
    %8 = tpu.matmul %5, %7, %cst {dimension_numbers = #tpu.dot_dimension_numbers<[1], [0], [0], [1], [0, 0, 1, 1], [], []>} : vector<16x384xbf16>, vector<384x1280xbf16>, vector<16x1280xf32> -> vector<16x1280xf32>
    %9 = arith.addf %3, %8 : vector<16x1280xf32>
    %c0_8 = arith.constant 0 : index
    %c0_9 = arith.constant 0 : index
    %10 = vector.load %arg9[%c0_8, %c0_9] : memref<16x1280xf32, #tpu.memory_space<vmem>>, vector<16x1280xf32>
    tpu.vector_store %arg9[%c0_8, %c0_9], %9 {strides = array<i32>} : memref<16x1280xf32, #tpu.memory_space<vmem>>, vector<16x1280xf32>,
    %c1_i32 = arith.constant 1 : i32
    %11 = arith.cmpi eq, %arg1, %c1_i32 : i32
    %12 = arith.extui %11 : i1 to i32
    %c0_i32_10 = arith.constant 0 : i32
    %13 = arith.cmpi ne, %12, %c0_i32_10 : i32
    scf.if %13 {
      %c0_11 = arith.constant 0 : index
      %c0_12 = arith.constant 0 : index
      %14 = vector.load %arg9[%c0_11, %c0_12] : memref<16x1280xf32, #tpu.memory_space<vmem>>, vector<16x1280xf32>
      %c0_13 = arith.constant 0 : index
      %c0_14 = arith.constant 0 : index
      %c0_15 = arith.constant 0 : index
      %15 = vector.load %arg4[%c0_13, %c0_14, %c0_15] : memref<1x1x1280xf32, #tpu.memory_space<vmem>>, vector<1x1x1280xf32>
      %16 = vector.shape_cast %15 : vector<1x1x1280xf32> to vector<1x1280xf32>
      %17 = vector.broadcast %16 : vector<1x1280xf32> to vector<16x1280xf32>
      %18 = arith.addf %14, %17 : vector<16x1280xf32>
      %19 = arith.negf %18 : vector<16x1280xf32>
      %20 = math.exp %19 : vector<16x1280xf32>
      %cst_16 = arith.constant 1.000000e+00 : f32
      %21 = vector.broadcast %cst_16 : f32 to vector<16x1280xf32>
      %22 = arith.addf %21, %20 : vector<16x1280xf32>
      %23 = arith.divf %21, %22 : vector<16x1280xf32>
      %24 = arith.mulf %18, %23 : vector<16x1280xf32>
      %25 = arith.truncf %24 : vector<16x1280xf32> to vector<16x1280xbf16>
      %c0_17 = arith.constant 0 : index
      %c0_18 = arith.constant 0 : index
      %c0_19 = arith.constant 0 : index
      %26 = vector.load %arg5[%c0_17, %c0_18, %c0_19] : memref<1x1280x512xbf16, #tpu.memory_space<vmem>>, vector<1x1280x512xbf16>
      %27 = vector.shape_cast %26 : vector<1x1280x512xbf16> to vector<1280x512xbf16>
      %cst_20 = arith.constant dense<0.000000e+00> : vector<16x512xf32>
      %28 = tpu.matmul %25, %27, %cst_20 {dimension_numbers = #tpu.dot_dimension_numbers<[1], [0], [0], [1], [0, 0, 1, 1], [], []>} : vector<16x1280xbf16>, vector<1280x512xbf16>, vector<16x512xf32> -> vector<16x512xf32>
      %c0_21 = arith.constant 0 : index
      %c0_22 = arith.constant 0 : index
      %c0_23 = arith.constant 0 : index
      %29 = vector.load %arg6[%c0_21, %c0_22, %c0_23] : memref<1x1x512xf32, #tpu.memory_space<vmem>>, vector<1x1x512xf32>
      %30 = vector.shape_cast %29 : vector<1x1x512xf32> to vector<1x512xf32>
      %31 = vector.broadcast %30 : vector<1x512xf32> to vector<16x512xf32>
      %32 = arith.addf %28, %31 : vector<16x512xf32>
      %cst_24 = arith.constant 0.000000e+00 : f32
      %33 = vector.broadcast %cst_24 : f32 to vector<16x512xf32>
      %34 = arith.cmpf ogt, %32, %33 : vector<16x512xf32>
      %cst_25 = arith.constant 0.00999999977 : f32
      %35 = vector.broadcast %cst_25 : f32 to vector<16x512xf32>
      %36 = arith.mulf %35, %32 : vector<16x512xf32>
      %37 = arith.select %34, %32, %36 : vector<16x512xi1>, vector<16x512xf32>
      %38 = arith.truncf %37 : vector<16x512xf32> to vector<16x512xbf16>
      %c0_26 = arith.constant 0 : index
      %c0_27 = arith.constant 0 : index
      %c0_28 = arith.constant 0 : index
      %39 = vector.load %arg7[%c0_26, %c0_27, %c0_28] : memref<1x512x1024xbf16, #tpu.memory_space<vmem>>, vector<1x512x1024xbf16>
      %40 = vector.shape_cast %39 : vector<1x512x1024xbf16> to vector<512x1024xbf16>
      %cst_29 = arith.constant dense<0.000000e+00> : vector<16x1024xf32>
      %41 = tpu.matmul %38, %40, %cst_29 {dimension_numbers = #tpu.dot_dimension_numbers<[1], [0], [0], [1], [0, 0, 1, 1], [], []>} : vector<16x512xbf16>, vector<512x1024xbf16>, vector<16x1024xf32> -> vector<16x1024xf32>
      %c0_30 = arith.constant 0 : index
      %c0_31 = arith.constant 0 : index
      %c0_32 = arith.constant 0 : index
      %42 = vector.load %arg8[%c0_30, %c0_31, %c0_32] : memref<1x16x1024xf32, #tpu.memory_space<vmem>>, vector<1x16x1024xf32>
      %43 = vector.shape_cast %42 : vector<1x16x1024xf32> to vector<16x1024xf32>
      %44 = vector.shape_cast %41 : vector<16x1024xf32> to vector<1x16x1024xf32>
      tpu.vector_store %arg8[%c0_30, %c0_31, %c0_32], %44 {strides = array<i32>} : memref<1x16x1024xf32, #tpu.memory_space<vmem>>, vector<1x16x1024xf32>,
    } else {
    }
    return
  }
  func.func @transform_0(%arg0: i32, %arg1: i32) -> (i32, i32, i32) {
    %c0_i32 = arith.constant 0 : i32
    %c0_i32_0 = arith.constant 0 : i32
    return %arg0, %c0_i32, %arg1 : i32, i32, i32
  }
  func.func @transform_1(%arg0: i32, %arg1: i32) -> (i32, i32, i32) {
    %c0_i32 = arith.constant 0 : i32
    %c0_i32_0 = arith.constant 0 : i32
    return %arg0, %arg1, %c0_i32 : i32, i32, i32
  }
  func.func @transform_2(%arg0: i32, %arg1: i32) -> (i32, i32, i32) {
    %c0_i32 = arith.constant 0 : i32
    %c0_i32_0 = arith.constant 0 : i32
    %c0_i32_1 = arith.constant 0 : i32
    return %arg0, %c0_i32, %c0_i32_0 : i32, i32, i32
  }
  func.func @transform_3(%arg0: i32, %arg1: i32) -> (i32, i32, i32) {
    %c0_i32 = arith.constant 0 : i32
    %c0_i32_0 = arith.constant 0 : i32
    %c0_i32_1 = arith.constant 0 : i32
    return %arg0, %c0_i32, %c0_i32_0 : i32, i32, i32
  }
  func.func @transform_4(%arg0: i32, %arg1: i32) -> (i32, i32, i32) {
    %c0_i32 = arith.constant 0 : i32
    %c0_i32_0 = arith.constant 0 : i32
    %c0_i32_1 = arith.constant 0 : i32
    return %arg0, %c0_i32, %c0_i32_0 : i32, i32, i32
  }
  func.func @transform_5(%arg0: i32, %arg1: i32) -> (i32, i32, i32) {
    %c0_i32 = arith.constant 0 : i32
    %c0_i32_0 = arith.constant 0 : i32
    %c0_i32_1 = arith.constant 0 : i32
    return %arg0, %c0_i32, %c0_i32_0 : i32, i32, i32
  }
  func.func @transform_6(%arg0: i32, %arg1: i32) -> (i32, i32, i32) {
    %c0_i32 = arith.constant 0 : i32
    %c0_i32_0 = arith.constant 0 : i32
    %c0_i32_1 = arith.constant 0 : i32
    return %arg0, %c0_i32, %c0_i32_0 : i32, i32, i32
  }
}

module attributes {stable_mosaic.version = 11 : i64} {
  func.func @lstm_head_kernel(%arg0: memref<4x2x1024xf32, #tpu.memory_space<vmem>>, %arg1: memref<256x1024xbf16, #tpu.memory_space<vmem>>, %arg2: memref<1x1024xf32, #tpu.memory_space<vmem>>, %arg3: memref<256x128xbf16, #tpu.memory_space<vmem>>, %arg4: memref<1x128xf32, #tpu.memory_space<vmem>>, %arg5: memref<128x32xbf16, #tpu.memory_space<vmem>>, %arg6: memref<1x32xf32, #tpu.memory_space<vmem>>, %arg7: memref<32x1xbf16, #tpu.memory_space<vmem>>, %arg8: memref<1x1xf32, #tpu.memory_space<vmem>>, %arg9: memref<2x1xf32, #tpu.memory_space<vmem>>) attributes {dimension_semantics = [], scalar_prefetch = 0 : i64, scratch_operands = 0 : i64, tpu.core_type = #tpu.core_type<tc>} {
    %cst = arith.constant 0.000000e+00 : f32
    %0 = vector.broadcast %cst : f32 to vector<2x256xf32>
    %cst_0 = arith.constant 0.000000e+00 : f32
    %1 = vector.broadcast %cst_0 : f32 to vector<2x256xf32>
    %c0_i32 = arith.constant 0 : i32
    %c4_i32 = arith.constant 4 : i32
    %2 = arith.addi %c0_i32, %c4_i32 : i32
    %c1_i32 = arith.constant 1 : i32
    %3:2 = scf.for %arg10 = %c0_i32 to %2 step %c1_i32 iter_args(%arg11 = %0, %arg12 = %1) -> (vector<2x256xf32>, vector<2x256xf32>)  : i32 {
      %32 = arith.index_cast %arg10 : i32 to index
      %c0_22 = arith.constant 0 : index
      %c0_23 = arith.constant 0 : index
      %33 = vector.load %arg0[%32, %c0_22, %c0_23] : memref<4x2x1024xf32, #tpu.memory_space<vmem>>, vector<1x2x1024xf32>
      %34 = vector.shape_cast %33 : vector<1x2x1024xf32> to vector<2x1024xf32>
      %35 = arith.truncf %arg11 : vector<2x256xf32> to vector<2x256xbf16>
      %c0_24 = arith.constant 0 : index
      %c0_25 = arith.constant 0 : index
      %36 = vector.load %arg1[%c0_24, %c0_25] : memref<256x1024xbf16, #tpu.memory_space<vmem>>, vector<256x1024xbf16>
      %cst_26 = arith.constant dense<0.000000e+00> : vector<2x1024xf32>
      %37 = tpu.matmul %35, %36, %cst_26 {dimension_numbers = #tpu.dot_dimension_numbers<[1], [0], [0], [1], [0, 0, 1, 1], [], []>} : vector<2x256xbf16>, vector<256x1024xbf16>, vector<2x1024xf32> -> vector<2x1024xf32>
      %38 = arith.addf %34, %37 : vector<2x1024xf32>
      %c0_27 = arith.constant 0 : index
      %c0_28 = arith.constant 0 : index
      %39 = vector.load %arg2[%c0_27, %c0_28] : memref<1x1024xf32, #tpu.memory_space<vmem>>, vector<1x1024xf32>
      %40 = vector.broadcast %39 : vector<1x1024xf32> to vector<2x1024xf32>
      %41 = arith.addf %38, %40 : vector<2x1024xf32>
      %42 = vector.extract_strided_slice %41 {offsets = [0, 0], sizes = [2, 256], strides = [1, 1]} : vector<2x1024xf32> to vector<2x256xf32>
      %43 = arith.negf %42 : vector<2x256xf32>
      %44 = math.exp %43 : vector<2x256xf32>
      %cst_29 = arith.constant 1.000000e+00 : f32
      %45 = vector.broadcast %cst_29 : f32 to vector<2x256xf32>
      %46 = arith.addf %45, %44 : vector<2x256xf32>
      %47 = arith.divf %45, %46 : vector<2x256xf32>
      %48 = vector.extract_strided_slice %41 {offsets = [0, 256], sizes = [2, 256], strides = [1, 1]} : vector<2x1024xf32> to vector<2x256xf32>
      %49 = arith.negf %48 : vector<2x256xf32>
      %50 = math.exp %49 : vector<2x256xf32>
      %cst_30 = arith.constant 1.000000e+00 : f32
      %51 = vector.broadcast %cst_30 : f32 to vector<2x256xf32>
      %52 = arith.addf %51, %50 : vector<2x256xf32>
      %53 = arith.divf %51, %52 : vector<2x256xf32>
      %54 = vector.extract_strided_slice %41 {offsets = [0, 512], sizes = [2, 256], strides = [1, 1]} : vector<2x1024xf32> to vector<2x256xf32>
      %55 = math.tanh %54 : vector<2x256xf32>
      %56 = vector.extract_strided_slice %41 {offsets = [0, 768], sizes = [2, 256], strides = [1, 1]} : vector<2x1024xf32> to vector<2x256xf32>
      %57 = arith.negf %56 : vector<2x256xf32>
      %58 = math.exp %57 : vector<2x256xf32>
      %cst_31 = arith.constant 1.000000e+00 : f32
      %59 = vector.broadcast %cst_31 : f32 to vector<2x256xf32>
      %60 = arith.addf %59, %58 : vector<2x256xf32>
      %61 = arith.divf %59, %60 : vector<2x256xf32>
      %62 = arith.mulf %53, %arg12 : vector<2x256xf32>
      %63 = arith.mulf %47, %55 : vector<2x256xf32>
      %64 = arith.addf %62, %63 : vector<2x256xf32>
      %65 = math.tanh %64 : vector<2x256xf32>
      %66 = arith.mulf %61, %65 : vector<2x256xf32>
      scf.yield %66, %64 : vector<2x256xf32>, vector<2x256xf32>
    }
    %c4_i32_1 = arith.constant 4 : i32
    %cst_2 = arith.constant 0.000000e+00 : f32
    %4 = vector.broadcast %cst_2 : f32 to vector<2x256xf32>
    %5 = arith.cmpf ogt, %3#0, %4 : vector<2x256xf32>
    %cst_3 = arith.constant 0.00999999977 : f32
    %6 = vector.broadcast %cst_3 : f32 to vector<2x256xf32>
    %7 = arith.mulf %6, %3#0 : vector<2x256xf32>
    %8 = arith.select %5, %3#0, %7 : vector<2x256xi1>, vector<2x256xf32>
    %9 = arith.truncf %8 : vector<2x256xf32> to vector<2x256xbf16>
    %c0 = arith.constant 0 : index
    %c0_4 = arith.constant 0 : index
    %10 = vector.load %arg3[%c0, %c0_4] : memref<256x128xbf16, #tpu.memory_space<vmem>>, vector<256x128xbf16>
    %cst_5 = arith.constant dense<0.000000e+00> : vector<2x128xf32>
    %11 = tpu.matmul %9, %10, %cst_5 {dimension_numbers = #tpu.dot_dimension_numbers<[1], [0], [0], [1], [0, 0, 1, 1], [], []>} : vector<2x256xbf16>, vector<256x128xbf16>, vector<2x128xf32> -> vector<2x128xf32>
    %c0_6 = arith.constant 0 : index
    %c0_7 = arith.constant 0 : index
    %12 = vector.load %arg4[%c0_6, %c0_7] : memref<1x128xf32, #tpu.memory_space<vmem>>, vector<1x128xf32>
    %13 = vector.broadcast %12 : vector<1x128xf32> to vector<2x128xf32>
    %14 = arith.addf %11, %13 : vector<2x128xf32>
    %cst_8 = arith.constant 0.000000e+00 : f32
    %15 = vector.broadcast %cst_8 : f32 to vector<2x128xf32>
    %16 = arith.maximumf %14, %15 : vector<2x128xf32>
    %17 = arith.truncf %16 : vector<2x128xf32> to vector<2x128xbf16>
    %c0_9 = arith.constant 0 : index
    %c0_10 = arith.constant 0 : index
    %18 = vector.load %arg5[%c0_9, %c0_10] : memref<128x32xbf16, #tpu.memory_space<vmem>>, vector<128x32xbf16>
    %cst_11 = arith.constant dense<0.000000e+00> : vector<2x32xf32>
    %19 = tpu.matmul %17, %18, %cst_11 {dimension_numbers = #tpu.dot_dimension_numbers<[1], [0], [0], [1], [0, 0, 1, 1], [], []>} : vector<2x128xbf16>, vector<128x32xbf16>, vector<2x32xf32> -> vector<2x32xf32>
    %c0_12 = arith.constant 0 : index
    %c0_13 = arith.constant 0 : index
    %20 = vector.load %arg6[%c0_12, %c0_13] : memref<1x32xf32, #tpu.memory_space<vmem>>, vector<1x32xf32>
    %21 = vector.broadcast %20 : vector<1x32xf32> to vector<2x32xf32>
    %22 = arith.addf %19, %21 : vector<2x32xf32>
    %cst_14 = arith.constant 0.000000e+00 : f32
    %23 = vector.broadcast %cst_14 : f32 to vector<2x32xf32>
    %24 = arith.maximumf %22, %23 : vector<2x32xf32>
    %25 = arith.truncf %24 : vector<2x32xf32> to vector<2x32xbf16>
    %c0_15 = arith.constant 0 : index
    %c0_16 = arith.constant 0 : index
    %26 = vector.load %arg7[%c0_15, %c0_16] : memref<32x1xbf16, #tpu.memory_space<vmem>>, vector<32x1xbf16>
    %cst_17 = arith.constant dense<0.000000e+00> : vector<2x1xf32>
    %27 = tpu.matmul %25, %26, %cst_17 {dimension_numbers = #tpu.dot_dimension_numbers<[1], [0], [0], [1], [0, 0, 1, 1], [], []>} : vector<2x32xbf16>, vector<32x1xbf16>, vector<2x1xf32> -> vector<2x1xf32>
    %c0_18 = arith.constant 0 : index
    %c0_19 = arith.constant 0 : index
    %28 = vector.load %arg8[%c0_18, %c0_19] : memref<1x1xf32, #tpu.memory_space<vmem>>, vector<1x1xf32>
    %29 = vector.broadcast %28 : vector<1x1xf32> to vector<2x1xf32>
    %30 = arith.addf %27, %29 : vector<2x1xf32>
    %c0_20 = arith.constant 0 : index
    %c0_21 = arith.constant 0 : index
    %31 = vector.load %arg9[%c0_20, %c0_21] : memref<2x1xf32, #tpu.memory_space<vmem>>, vector<2x1xf32>
    tpu.vector_store %arg9[%c0_20, %c0_21], %30 {strides = array<i32>} : memref<2x1xf32, #tpu.memory_space<vmem>>, vector<2x1xf32>,
    return
  }
}

</mosaic_0001>

<bundles_post_ra>
// kernel: model_forward.3
= control target key start
LH: loop header
LB: loop body
LE: loop exit
PB: predicated region body
PF: predicated region fallthrough
CT: control target
= control target key end

     0   :  { %v1908_v1 = vmov 0.0   ;;  %v1910_v2 = vmov 0.0   ;;  %s1912_s11 = smov 0   ;;  %s2464_s0 = inlined_call_operand.vmem [shape: f32[4,2,1024], index: 0, kind: input, shape index: {}]   ;;  %s2465_s1 = inlined_call_operand.vmem [shape: bf16[256,1024], index: 1, kind: input, shape index: {}]   ;;  %s2466_s2 = inlined_call_operand.vmem [shape: f32[1,1024], index: 2, kind: input, shape index: {}]   ;;  %s2467_s3 = inlined_call_operand.vmem [shape: bf16[256,128], index: 3, kind: input, shape index: {}]   ;;  %s2468_s4 = inlined_call_operand.vmem [shape: f32[1,128], index: 4, kind: input, shape index: {}]   ;;  %s2469_s5 = inlined_call_operand.vmem [shape: bf16[128,32], index: 5, kind: input, shape index: {}]   ;;  %s2470_s6 = inlined_call_operand.vmem [shape: f32[1,32], index: 6, kind: input, shape index: {}]   ;;  %s2471_s7 = inlined_call_operand.vmem [shape: bf16[32,1], index: 7, kind: input, shape index: {}]   ;;  %s2472_s8 = inlined_call_operand.<no memory space> [shape: f32[1,1], index: 8, kind: input, shape index: {}]   ;;  %s2473_s9 = inlined_call_operand.vmem [shape: f32[2,1], index: 9, kind: output, shape index: {}]  }
   0x1   :  { %v14_v0 = vstv %s2472_s8 }
   0x2   :  { %15 = vst [vmem:[#allocation2] sm:$0x1] %v14_v0 }
   0x3 LB: > { %v61_v3 = vld [vmem:[%s2465_s1] sm:$0xff]  ;;  %v62_v5 = vld [vmem:[%s2465_s1 + $0x8] sm:$0xff]  ;;  %v52_v6 = vlaneseq  ;;  %v1852_v12 = vmov 1983009808   ;;  %s1696_s17 = sshll.u32 %s1850_s11, 4  ;;  %s40_s11 = sadd.s32 1, %s1850_s11   ;;  %s1850_s11 = sphi %s1912_s11, %s40_s11   ;;  %v1846_v2 = vphi %v1910_v2, %v2474_v2   ;;  %v1842_v1 = vphi %v1908_v1, %v1138_v1  }
   0x4   : > { %v65_v4 = vld [vmem:[%s2465_s1 + $0x20] sm:$0xff]  ;;  %v66_v8 = vld [vmem:[%s2465_s1 + $0x28] sm:$0xff]  ;;  %v50_v13 = vunpack.c.l.s4 %v1852_v12  ;;  %s2342_s20 = scalar_lea.vmem %s2464_s0, %s1696_s17  ;;  %p37_p0 = scmp.ge.s32.totalorder %s40_s11, 4  }
   0x5   : > { %v1536_v7 = vcombine.high %v61_v3, %v65_v4  ;;  %v1535_v9 = vcombine.low %v61_v3, %v65_v4  ;;  %v69_v10 = vld [vmem:[%s2465_s1 + $0x40] sm:$0xff]  ;;  %v1538_v14 = vcombine.high %v62_v5, %v66_v8  ;;  %v1537_v15 = vcombine.low %v62_v5, %v66_v8  ;;  %v70_v17 = vld [vmem:[%s2465_s1 + $0x48] sm:$0xff] }
   0x6   : > { %v73_v11 = vld [vmem:[%s2465_s1 + $0x60] sm:$0xff]  ;;  %v74_v18 = vld [vmem:[%s2465_s1 + $0x68] sm:$0xff]  ;;  %v51_v24 = vunpack.c.0.s8 %v50_v13  ;;  %v1957_v25 = vshrl.u32 %v52_v6, 7  ;;  %vm1854_vm1 = vmmov (%p37_p0), 0   ;;  %vm1470_vm2 = vcmask (%p37_p0), 261120  }
   0x7   : > { %v1544_v16 = vcombine.high %v69_v10, %v73_v11  ;;  %v77_v19 = vld [vmem:[%s2465_s1 + $0x80] sm:$0xff]  ;;  %829 = vmatprep.subr.bf16.mxu0 %v1536_v7  ;;  %v1546_v20 = vcombine.high %v70_v17, %v74_v18  ;;  %v78_v22 = vld [vmem:[%s2465_s1 + $0x88] sm:$0xff]  ;;  %870 = vmatprep.subr.bf16.mxu1 %v1538_v14  ;;  %v1543_v26 = vcombine.low %v69_v10, %v73_v11  ;;  %vm1514_vm3 = vcmask (%p37_p0), 1024  }
   0x8   : > { %v81_v21 = vld [vmem:[%s2465_s1 + $0xa0] sm:$0xff]  ;;  %v82_v23 = vld [vmem:[%s2465_s1 + $0xa8] sm:$0xff]  ;;  %830 = vmatpush1.bf16.msra.mxu0 %v1535_v9  ;;  %871 = vmatpush1.bf16.msra.mxu1 %v1537_v15  ;;  %v1545_v27 = vcombine.low %v70_v17, %v74_v18  ;;  %v1972_v34 = vsub.s32 %v51_v24, %v1957_v25 }
   0x9   : > { %831 = vmatprep.subr.bf16.mxu0 %v1544_v16  ;;  %v1552_v28 = vcombine.high %v77_v19, %v81_v21  ;;  %872 = vmatprep.subr.bf16.mxu1 %v1546_v20  ;;  %v1554_v29 = vcombine.high %v78_v22, %v82_v23  ;;  %v85_v30 = vld [vmem:[%s2465_s1 + $0xc0] sm:$0xff]  ;;  %v86_v32 = vld [vmem:[%s2465_s1 + $0xc8] sm:$0xff]  ;;  %v1551_v35 = vcombine.low %v77_v19, %v81_v21 }
   0xa   : > { %v89_v31 = vld [vmem:[%s2465_s1 + $0xe0] sm:$0xff]  ;;  %v90_v33 = vld [vmem:[%s2465_s1 + $0xe8] sm:$0xff]  ;;  %v1553_v36 = vcombine.low %v78_v22, %v82_v23  ;;  %v1975_v38 = vrot.slane %v1846_v2, %v1972_v34 }
   0xb   : > { %v1560_v37 = vcombine.high %v85_v30, %v89_v31  ;;  %v1562_v39 = vcombine.high %v86_v32, %v90_v33  ;;  %v93_v40 = vld [vmem:[%s2465_s1 + $0x100] sm:$0xff]  ;;  %v94_v42 = vld [vmem:[%s2465_s1 + $0x108] sm:$0xff]  ;;  %v1559_v45 = vcombine.low %v85_v30, %v89_v31  ;;  %v1561_v46 = vcombine.low %v86_v32, %v90_v33 }
   0xc   : > { %832 = vmatpush1.bf16.msra.mxu0 %v1543_v26  ;;  %873 = vmatpush1.bf16.msra.mxu1 %v1545_v27  ;;  %v97_v41 = vld [vmem:[%s2465_s1 + $0x120] sm:$0xff]  ;;  %v98_v43 = vld [vmem:[%s2465_s1 + $0x128] sm:$0xff]  ;;  %v56_v44 = vcombine.high %v1975_v38, %v1975_v38 }
   0xd   : > { %833 = vmatprep.subr.bf16.mxu0 %v1552_v28  ;;  %874 = vmatprep.subr.bf16.mxu1 %v1554_v29  ;;  %v1568_v47 = vcombine.high %v93_v40, %v97_v41  ;;  %v1570_v49 = vcombine.high %v94_v42, %v98_v43  ;;  %v101_v50 = vld [vmem:[%s2465_s1 + $0x140] sm:$0xff]  ;;  %v102_v52 = vld [vmem:[%s2465_s1 + $0x148] sm:$0xff]  ;;  %v1567_v54 = vcombine.low %v93_v40, %v97_v41 }
   0xe   : > { %v1991_v48 = vpack.c.bf16 %v56_v44, %v56_v44  ;;  %v105_v51 = vld [vmem:[%s2465_s1 + $0x160] sm:$0xff]  ;;  %v106_v53 = vld [vmem:[%s2465_s1 + $0x168] sm:$0xff]  ;;  %v1569_v55 = vcombine.low %v94_v42, %v98_v43 }
   0xf   : > { %v1576_v56 = vcombine.high %v101_v50, %v105_v51  ;;  %v1578_v57 = vcombine.high %v102_v52, %v106_v53  ;;  %v109_v58 = vld [vmem:[%s2465_s1 + $0x180] sm:$0xff]  ;;  %v110_v60 = vld [vmem:[%s2465_s1 + $0x188] sm:$0xff]  ;;  %v1575_v62 = vcombine.low %v101_v50, %v105_v51  ;;  %v1577_v63 = vcombine.low %v102_v52, %v106_v53 }
  0x10   : > { %834 = vmatpush1.bf16.msra.mxu0 %v1551_v35  ;;  %875 = vmatpush1.bf16.msra.mxu1 %v1553_v36  ;;  %v113_v59 = vld [vmem:[%s2465_s1 + $0x1a0] sm:$0xff]  ;;  %v114_v61 = vld [vmem:[%s2465_s1 + $0x1a8] sm:$0xff] }
  0x11   : > { %835 = vmatprep.subr.bf16.mxu0 %v1560_v37  ;;  %876 = vmatprep.subr.bf16.mxu1 %v1562_v39  ;;  %v1584_v0 = vcombine.high %v109_v58, %v113_v59  ;;  %v1586_v2 = vcombine.high %v110_v60, %v114_v61  ;;  %v117_v3 = vld [vmem:[%s2465_s1 + $0x1c0] sm:$0xff]  ;;  %v118_v5 = vld [vmem:[%s2465_s1 + $0x1c8] sm:$0xff]  ;;  %v1583_v7 = vcombine.low %v109_v58, %v113_v59 }
  0x12   : > { %861 = vmatprep.mubr.bf16.mxu0 %v1991_v48  ;;  %902 = vmatprep.mubr.bf16.mxu1 %v1991_v48  ;;  %v121_v4 = vld [vmem:[%s2465_s1 + $0x1e0] sm:$0xff]  ;;  %v122_v6 = vld [vmem:[%s2465_s1 + $0x1e8] sm:$0xff]  ;;  %v1585_v8 = vcombine.low %v110_v60, %v114_v61 }
  0x13   : > { %v1592_v9 = vcombine.high %v117_v3, %v121_v4  ;;  %v1594_v10 = vcombine.high %v118_v5, %v122_v6  ;;  %v125_v11 = vld [vmem:[%s2465_s1 + $0x200] sm:$0xff]  ;;  %v126_v13 = vld [vmem:[%s2465_s1 + $0x208] sm:$0xff]  ;;  %v1591_v15 = vcombine.low %v117_v3, %v121_v4  ;;  %v1593_v16 = vcombine.low %v118_v5, %v122_v6 }
  0x14   : > { %836 = vmatpush1.bf16.msra.mxu0 %v1559_v45  ;;  %877 = vmatpush1.bf16.msra.mxu1 %v1561_v46  ;;  %v129_v12 = vld [vmem:[%s2465_s1 + $0x220] sm:$0xff]  ;;  %v130_v14 = vld [vmem:[%s2465_s1 + $0x228] sm:$0xff] }
  0x15   : > { %837 = vmatprep.subr.bf16.mxu0 %v1568_v47  ;;  %878 = vmatprep.subr.bf16.mxu1 %v1570_v49  ;;  %v1600_v17 = vcombine.high %v125_v11, %v129_v12  ;;  %v1602_v18 = vcombine.high %v126_v13, %v130_v14  ;;  %v133_v19 = vld [vmem:[%s2465_s1 + $0x240] sm:$0xff]  ;;  %v134_v21 = vld [vmem:[%s2465_s1 + $0x248] sm:$0xff]  ;;  %v1599_v23 = vcombine.low %v125_v11, %v129_v12 }
  0x16   : > { %v137_v20 = vld [vmem:[%s2465_s1 + $0x260] sm:$0xff]  ;;  %v138_v22 = vld [vmem:[%s2465_s1 + $0x268] sm:$0xff]  ;;  %v1601_v24 = vcombine.low %v126_v13, %v130_v14 }
  0x17   : > { %v1608_v26 = vcombine.high %v133_v19, %v137_v20  ;;  %v1610_v27 = vcombine.high %v134_v21, %v138_v22  ;;  %v141_v28 = vld [vmem:[%s2465_s1 + $0x280] sm:$0xff]  ;;  %v142_v30 = vld [vmem:[%s2465_s1 + $0x288] sm:$0xff]  ;;  %v1607_v32 = vcombine.low %v133_v19, %v137_v20  ;;  %v1609_v33 = vcombine.low %v134_v21, %v138_v22  ;;  %v68_v19 = vld [vmem:[%s2465_s1 + $0x38] sm:$0xff] }
  0x18   : > { %838 = vmatpush1.bf16.msra.mxu0 %v1567_v54  ;;  %879 = vmatpush1.bf16.msra.mxu1 %v1569_v55  ;;  %v145_v29 = vld [vmem:[%s2465_s1 + $0x2a0] sm:$0xff]  ;;  %v146_v31 = vld [vmem:[%s2465_s1 + $0x2a8] sm:$0xff] }
  0x19   : > { %839 = vmatprep.subr.bf16.mxu0 %v1576_v56  ;;  %880 = vmatprep.subr.bf16.mxu1 %v1578_v57  ;;  %v1616_v35 = vcombine.high %v141_v28, %v145_v29  ;;  %v1618_v36 = vcombine.high %v142_v30, %v146_v31  ;;  %v149_v37 = vld [vmem:[%s2465_s1 + $0x2c0] sm:$0xff]  ;;  %v150_v40 = vld [vmem:[%s2465_s1 + $0x2c8] sm:$0xff]  ;;  %v1615_v42 = vcombine.low %v141_v28, %v145_v29  ;;  %v72_v28 = vld [vmem:[%s2465_s1 + $0x58] sm:$0xff] }
  0x1a   : > { %v153_v39 = vld [vmem:[%s2465_s1 + $0x2e0] sm:$0xff]  ;;  %v154_v41 = vld [vmem:[%s2465_s1 + $0x2e8] sm:$0xff]  ;;  %v1617_v43 = vcombine.low %v142_v30, %v146_v31  ;;  %v76_v29 = vld [vmem:[%s2465_s1 + $0x78] sm:$0xff] }
  0x1b   : > { %v1624_v44 = vcombine.high %v149_v37, %v153_v39  ;;  %v1626_v45 = vcombine.high %v150_v40, %v154_v41  ;;  %v157_v46 = vld [vmem:[%s2465_s1 + $0x300] sm:$0xff]  ;;  %v158_v49 = vld [vmem:[%s2465_s1 + $0x308] sm:$0xff]  ;;  %v1623_v51 = vcombine.low %v149_v37, %v153_v39  ;;  %v1625_v52 = vcombine.low %v150_v40, %v154_v41  ;;  %v84_v37 = vld [vmem:[%s2465_s1 + $0xb8] sm:$0xff] }
  0x1c   : > { %840 = vmatpush1.bf16.msra.mxu0 %v1575_v62  ;;  %881 = vmatpush1.bf16.msra.mxu1 %v1577_v63  ;;  %v161_v47 = vld [vmem:[%s2465_s1 + $0x320] sm:$0xff]  ;;  %v162_v50 = vld [vmem:[%s2465_s1 + $0x328] sm:$0xff]  ;;  %v1549_v40 = vcombine.low %v72_v28, %v76_v29 }
  0x1d   : > { %841 = vmatprep.subr.bf16.mxu0 %v1584_v0  ;;  %882 = vmatprep.subr.bf16.mxu1 %v1586_v2  ;;  %v1632_v53 = vcombine.high %v157_v46, %v161_v47  ;;  %v1634_v54 = vcombine.high %v158_v49, %v162_v50  ;;  %v165_v55 = vld [vmem:[%s2465_s1 + $0x340] sm:$0xff]  ;;  %v166_v57 = vld [vmem:[%s2465_s1 + $0x348] sm:$0xff]  ;;  %v1631_v59 = vcombine.low %v157_v46, %v161_v47  ;;  %v92_v46 = vld [vmem:[%s2465_s1 + $0xf8] sm:$0xff] }
  0x1e   : > { %v169_v56 = vld [vmem:[%s2465_s1 + $0x360] sm:$0xff]  ;;  %v170_v58 = vld [vmem:[%s2465_s1 + $0x368] sm:$0xff]  ;;  %v1633_v60 = vcombine.low %v158_v49, %v162_v50 }
  0x1f   : > { %v1640_v61 = vcombine.high %v165_v55, %v169_v56  ;;  %v1642_v62 = vcombine.high %v166_v57, %v170_v58  ;;  %v173_v63 = vld [vmem:[%s2465_s1 + $0x380] sm:$0xff]  ;;  %v174_v2 = vld [vmem:[%s2465_s1 + $0x388] sm:$0xff]  ;;  %v1639_v4 = vcombine.low %v165_v55, %v169_v56  ;;  %v1641_v5 = vcombine.low %v166_v57, %v170_v58 }
  0x20   : > { %842 = vmatpush1.bf16.msra.mxu0 %v1583_v7  ;;  %883 = vmatpush1.bf16.msra.mxu1 %v1585_v8  ;;  %v177_v0 = vld [vmem:[%s2465_s1 + $0x3a0] sm:$0xff]  ;;  %v178_v3 = vld [vmem:[%s2465_s1 + $0x3a8] sm:$0xff] }
  0x21   : > { %843 = vmatprep.subr.bf16.mxu0 %v1592_v9  ;;  %884 = vmatprep.subr.bf16.mxu1 %v1594_v10  ;;  %v1648_v6 = vcombine.high %v173_v63, %v177_v0  ;;  %v1650_v7 = vcombine.high %v174_v2, %v178_v3  ;;  %v181_v8 = vld [vmem:[%s2465_s1 + $0x3c0] sm:$0xff]  ;;  %v182_v10 = vld [vmem:[%s2465_s1 + $0x3c8] sm:$0xff]  ;;  %v1647_v12 = vcombine.low %v173_v63, %v177_v0 }
  0x22   : > { %v185_v9 = vld [vmem:[%s2465_s1 + $0x3e0] sm:$0xff]  ;;  %v186_v11 = vld [vmem:[%s2465_s1 + $0x3e8] sm:$0xff]  ;;  %v1649_v13 = vcombine.low %v174_v2, %v178_v3 }
  0x23   : > { %v1656_v14 = vcombine.high %v181_v8, %v185_v9  ;;  %v1655_v20 = vcombine.low %v181_v8, %v185_v9  ;;  %v1657_v21 = vcombine.low %v182_v10, %v186_v11 }
  0x24   : > { %844 = vmatpush1.bf16.msra.mxu0 %v1591_v15  ;;  %885 = vmatpush1.bf16.msra.mxu1 %v1593_v16  ;;  %v1658_v15 = vcombine.high %v182_v10, %v186_v11  ;;  %v63_v16 = vld [vmem:[%s2465_s1 + $0x10] sm:$0xff] }
  0x25   : > { %845 = vmatprep.subr.bf16.mxu0 %v1600_v17  ;;  %886 = vmatprep.subr.bf16.mxu1 %v1602_v18  ;;  %v67_v17 = vld [vmem:[%s2465_s1 + $0x30] sm:$0xff]  ;;  %v64_v18 = vld [vmem:[%s2465_s1 + $0x18] sm:$0xff] }
  0x26   : > { %v1540_v22 = vcombine.high %v63_v16, %v67_v17  ;;  %v1539_v30 = vcombine.low %v63_v16, %v67_v17  ;;  %v1541_v31 = vcombine.low %v64_v18, %v68_v19 }
  0x28   : > { %846 = vmatpush1.bf16.msra.mxu0 %v1599_v23  ;;  %887 = vmatpush1.bf16.msra.mxu1 %v1601_v24  ;;  %v1542_v23 = vcombine.high %v64_v18, %v68_v19  ;;  %v71_v24 = vld [vmem:[%s2465_s1 + $0x50] sm:$0xff] }
  0x29   : > { %847 = vmatprep.subr.bf16.mxu0 %v1608_v26  ;;  %888 = vmatprep.subr.bf16.mxu1 %v1610_v27  ;;  %v75_v26 = vld [vmem:[%s2465_s1 + $0x70] sm:$0xff]  ;;  %v2147_v27 = vpack.c.bf16 %v1975_v38, %v1975_v38 }
  0x2a   : > { %v79_v38 = vld [vmem:[%s2465_s1 + $0x90] sm:$0xff]  ;;  %v1547_v39 = vcombine.low %v71_v24, %v75_v26 }
  0x2c   : > { %848 = vmatpush1.bf16.msra.mxu0 %v1607_v32  ;;  %889 = vmatpush1.bf16.msra.mxu1 %v1609_v33  ;;  %v1548_v32 = vcombine.high %v71_v24, %v75_v26  ;;  %v1550_v33 = vcombine.high %v72_v28, %v76_v29 }
  0x2d   : > { %849 = vmatprep.subr.bf16.mxu0 %v1616_v35  ;;  %890 = vmatprep.subr.bf16.mxu1 %v1618_v36  ;;  %v83_v35 = vld [vmem:[%s2465_s1 + $0xb0] sm:$0xff]  ;;  %v80_v36 = vld [vmem:[%s2465_s1 + $0x98] sm:$0xff] }
  0x2e   : > { %v1556_v41 = vcombine.high %v79_v38, %v83_v35  ;;  %v1555_v47 = vcombine.low %v79_v38, %v83_v35  ;;  %v1557_v49 = vcombine.low %v80_v36, %v84_v37 }
  0x30   : > { %850 = vmatpush1.bf16.msra.mxu0 %v1615_v42  ;;  %891 = vmatpush1.bf16.msra.mxu1 %v1617_v43  ;;  %v1558_v42 = vcombine.high %v80_v36, %v84_v37  ;;  %v87_v43 = vld [vmem:[%s2465_s1 + $0xd0] sm:$0xff] }
  0x31   : > { %851 = vmatprep.subr.bf16.mxu0 %v1624_v44  ;;  %892 = vmatprep.subr.bf16.mxu1 %v1626_v45  ;;  %v91_v44 = vld [vmem:[%s2465_s1 + $0xf0] sm:$0xff]  ;;  %v88_v45 = vld [vmem:[%s2465_s1 + $0xd8] sm:$0xff] }
  0x32   : > { %v1564_v50 = vcombine.high %v87_v43, %v91_v44  ;;  %v1563_v55 = vcombine.low %v87_v43, %v91_v44  ;;  %v1565_v56 = vcombine.low %v88_v45, %v92_v46 }
  0x34   : > { %852 = vmatpush1.bf16.msra.mxu0 %v1623_v51  ;;  %893 = vmatpush1.bf16.msra.mxu1 %v1625_v52  ;;  %v1566_v51 = vcombine.high %v88_v45, %v92_v46  ;;  %v95_v52 = vld [vmem:[%s2465_s1 + $0x110] sm:$0xff] }
  0x35   : > { %853 = vmatprep.subr.bf16.mxu0 %v1632_v53  ;;  %894 = vmatprep.subr.bf16.mxu1 %v1634_v54  ;;  %v99_v53 = vld [vmem:[%s2465_s1 + $0x130] sm:$0xff]  ;;  %v100_v54 = vld [vmem:[%s2465_s1 + $0x138] sm:$0xff] }
  0x36   : > { %v1572_v57 = vcombine.high %v95_v52, %v99_v53  ;;  %v1571_v63 = vcombine.low %v95_v52, %v99_v53 }
  0x38   : > { %854 = vmatpush1.bf16.msra.mxu0 %v1631_v59  ;;  %895 = vmatpush1.bf16.msra.mxu1 %v1633_v60  ;;  %v103_v59 = vld [vmem:[%s2465_s1 + $0x150] sm:$0xff] }
  0x39   : > { %855 = vmatprep.subr.bf16.mxu0 %v1640_v61  ;;  %896 = vmatprep.subr.bf16.mxu1 %v1642_v62  ;;  %v107_v60 = vld [vmem:[%s2465_s1 + $0x170] sm:$0xff]  ;;  %v104_v61 = vld [vmem:[%s2465_s1 + $0x158] sm:$0xff] }
  0x3a   : > { %v108_v62 = vld [vmem:[%s2465_s1 + $0x178] sm:$0xff]  ;;  %v1580_v2 = vcombine.high %v103_v59, %v107_v60  ;;  %v1579_v8 = vcombine.low %v103_v59, %v107_v60 }
  0x3b   : > { %v1582_v3 = vcombine.high %v104_v61, %v108_v62  ;;  %v1581_v9 = vcombine.low %v104_v61, %v108_v62 }
  0x3c   : > { %856 = vmatpush1.bf16.msra.mxu0 %v1639_v4  ;;  %897 = vmatpush1.bf16.msra.mxu1 %v1641_v5  ;;  %v111_v4 = vld [vmem:[%s2465_s1 + $0x190] sm:$0xff] }
  0x3d   : > { %857 = vmatprep.subr.bf16.mxu0 %v1648_v6  ;;  %898 = vmatprep.subr.bf16.mxu1 %v1650_v7  ;;  %v115_v5 = vld [vmem:[%s2465_s1 + $0x1b0] sm:$0xff]  ;;  %v112_v6 = vld [vmem:[%s2465_s1 + $0x198] sm:$0xff] }
  0x3e   : > { %v116_v7 = vld [vmem:[%s2465_s1 + $0x1b8] sm:$0xff]  ;;  %v1588_v10 = vcombine.high %v111_v4, %v115_v5  ;;  %v1587_v16 = vcombine.low %v111_v4, %v115_v5 }
  0x3f   : > { %v1590_v11 = vcombine.high %v112_v6, %v116_v7  ;;  %v1589_v17 = vcombine.low %v112_v6, %v116_v7 }
  0x40   : > { %858 = vmatpush1.bf16.msra.mxu0 %v1647_v12  ;;  %899 = vmatpush1.bf16.msra.mxu1 %v1649_v13  ;;  %v119_v12 = vld [vmem:[%s2465_s1 + $0x1d0] sm:$0xff] }
  0x41   : > { %859 = vmatprep.subr.bf16.mxu0 %v1656_v14  ;;  %900 = vmatprep.subr.bf16.mxu1 %v1658_v15  ;;  %v123_v13 = vld [vmem:[%s2465_s1 + $0x1f0] sm:$0xff]  ;;  %v120_v14 = vld [vmem:[%s2465_s1 + $0x1d8] sm:$0xff] }
  0x42   : > { %v124_v15 = vld [vmem:[%s2465_s1 + $0x1f8] sm:$0xff]  ;;  %v1596_v18 = vcombine.high %v119_v12, %v123_v13  ;;  %v1595_v24 = vcombine.low %v119_v12, %v123_v13 }
  0x43   : > { %v1598_v19 = vcombine.high %v120_v14, %v124_v15  ;;  %v1597_v26 = vcombine.low %v120_v14, %v124_v15 }
  0x44   : > { %860 = vmatpush1.bf16.msra.mxu0 %v1655_v20  ;;  %901 = vmatpush1.bf16.msra.mxu1 %v1657_v21  ;;  %v127_v20 = vld [vmem:[%s2465_s1 + $0x210] sm:$0xff] }
  0x45   : > { %911 = vmatprep.subr.bf16.mxu0 %v1540_v22  ;;  %952 = vmatprep.subr.bf16.mxu1 %v1542_v23  ;;  %v131_v21 = vld [vmem:[%s2465_s1 + $0x230] sm:$0xff]  ;;  %v128_v22 = vld [vmem:[%s2465_s1 + $0x218] sm:$0xff] }
  0x46   : > { %v132_v23 = vld [vmem:[%s2465_s1 + $0x238] sm:$0xff]  ;;  %v1604_v28 = vcombine.high %v127_v20, %v131_v21  ;;  %v1603_v38 = vcombine.low %v127_v20, %v131_v21 }
  0x47   : > { %862 = vmatmul.mubr.bf16.vlgmr.msra.gmra.mrb[0].mxu0 %v2147_v27  ;;  %903 = vmatmul.mubr.bf16.vlgmr.msra.gmra.mrb[0].mxu1 %v2147_v27  ;;  %v1606_v29 = vcombine.high %v128_v22, %v132_v23  ;;  %v1605_v35 = vcombine.low %v128_v22, %v132_v23 }
  0x48   : > { %912 = vmatpush1.bf16.msra.mxu0 %v1539_v30  ;;  %953 = vmatpush1.bf16.msra.mxu1 %v1541_v31  ;;  %v135_v30 = vld [vmem:[%s2465_s1 + $0x250] sm:$0xff] }
  0x49   : > { %913 = vmatprep.subr.bf16.mxu0 %v1548_v32  ;;  %954 = vmatprep.subr.bf16.mxu1 %v1550_v33  ;;  %v139_v31 = vld [vmem:[%s2465_s1 + $0x270] sm:$0xff]  ;;  %v136_v32 = vld [vmem:[%s2465_s1 + $0x258] sm:$0xff] }
  0x4a   : > { %943 = vmatprep.mubr.bf16.mxu0 %v1991_v48  ;;  %984 = vmatprep.mubr.bf16.mxu1 %v1991_v48  ;;  %v96_v48 = vld [vmem:[%s2465_s1 + $0x118] sm:$0xff]  ;;  %v1612_v36 = vcombine.high %v135_v30, %v139_v31  ;;  %v1611_v43 = vcombine.low %v135_v30, %v139_v31 }
  0x4b   : > { %v1574_v58 = vcombine.high %v96_v48, %v100_v54  ;;  %v1573_v0 = vcombine.low %v96_v48, %v100_v54  ;;  %v140_v33 = vld [vmem:[%s2465_s1 + $0x278] sm:$0xff] }
  0x4c   : > { %914 = vmatpush1.bf16.msra.mxu0 %v1547_v39  ;;  %955 = vmatpush1.bf16.msra.mxu1 %v1549_v40  ;;  %v1614_v37 = vcombine.high %v136_v32, %v140_v33  ;;  %v143_v39 = vld [vmem:[%s2465_s1 + $0x290] sm:$0xff]  ;;  %v1613_v44 = vcombine.low %v136_v32, %v140_v33 }
  0x4d   : > { %915 = vmatprep.subr.bf16.mxu0 %v1556_v41  ;;  %956 = vmatprep.subr.bf16.mxu1 %v1558_v42  ;;  %v147_v40 = vld [vmem:[%s2465_s1 + $0x2b0] sm:$0xff]  ;;  %v144_v41 = vld [vmem:[%s2465_s1 + $0x298] sm:$0xff] }
  0x4e   : > { %v148_v42 = vld [vmem:[%s2465_s1 + $0x2b8] sm:$0xff]  ;;  %v1620_v45 = vcombine.high %v143_v39, %v147_v40  ;;  %v1619_v52 = vcombine.low %v143_v39, %v147_v40 }
  0x4f   : > { %v1622_v46 = vcombine.high %v144_v41, %v148_v42  ;;  %v1621_v53 = vcombine.low %v144_v41, %v148_v42  ;;  %v1043_v42 = vsub.s32 0, %v1957_v25 }
  0x50   : > { %916 = vmatpush1.bf16.msra.mxu0 %v1555_v47  ;;  %957 = vmatpush1.bf16.msra.mxu1 %v1557_v49  ;;  %v151_v47 = vld [vmem:[%s2465_s1 + $0x2d0] sm:$0xff] }
  0x51   : > { %917 = vmatprep.subr.bf16.mxu0 %v1564_v50  ;;  %958 = vmatprep.subr.bf16.mxu1 %v1566_v51  ;;  %v155_v49 = vld [vmem:[%s2465_s1 + $0x2f0] sm:$0xff]  ;;  %v152_v50 = vld [vmem:[%s2465_s1 + $0x2d8] sm:$0xff] }
  0x52   : > { %v156_v51 = vld [vmem:[%s2465_s1 + $0x2f8] sm:$0xff]  ;;  %v1628_v48 = vcombine.high %v151_v47, %v155_v49  ;;  %v1627_v59 = vcombine.low %v151_v47, %v155_v49 }
  0x53   : > { %v1630_v54 = vcombine.high %v152_v50, %v156_v51  ;;  %v1629_v60 = vcombine.low %v152_v50, %v156_v51 }
  0x54   : > { %918 = vmatpush1.bf16.msra.mxu0 %v1563_v55  ;;  %959 = vmatpush1.bf16.msra.mxu1 %v1565_v56  ;;  %v159_v55 = vld [vmem:[%s2465_s1 + $0x310] sm:$0xff] }
  0x55   : > { %919 = vmatprep.subr.bf16.mxu0 %v1572_v57  ;;  %960 = vmatprep.subr.bf16.mxu1 %v1574_v58  ;;  %v163_v56 = vld [vmem:[%s2465_s1 + $0x330] sm:$0xff]  ;;  %v160_v57 = vld [vmem:[%s2465_s1 + $0x318] sm:$0xff] }
  0x56   : > { %v164_v58 = vld [vmem:[%s2465_s1 + $0x338] sm:$0xff]  ;;  %v1636_v61 = vcombine.high %v159_v55, %v163_v56  ;;  %v1635_v4 = vcombine.low %v159_v55, %v163_v56 }
  0x57   : > { %v1638_v62 = vcombine.high %v160_v57, %v164_v58  ;;  %v1637_v5 = vcombine.low %v160_v57, %v164_v58 }
  0x58   : > { %920 = vmatpush1.bf16.msra.mxu0 %v1571_v63  ;;  %961 = vmatpush1.bf16.msra.mxu1 %v1573_v0  ;;  %v167_v63 = vld [vmem:[%s2465_s1 + $0x350] sm:$0xff] }
  0x59   : > { %921 = vmatprep.subr.bf16.mxu0 %v1580_v2  ;;  %962 = vmatprep.subr.bf16.mxu1 %v1582_v3  ;;  %v171_v0 = vld [vmem:[%s2465_s1 + $0x370] sm:$0xff]  ;;  %v168_v2 = vld [vmem:[%s2465_s1 + $0x358] sm:$0xff] }
  0x5a   : > { %v172_v3 = vld [vmem:[%s2465_s1 + $0x378] sm:$0xff]  ;;  %v1644_v6 = vcombine.high %v167_v63, %v171_v0  ;;  %v1643_v12 = vcombine.low %v167_v63, %v171_v0  ;;  %v1067_v63 = vsub.s32 6, %v1957_v25  ;;  %v1071_v0 = vsub.s32 7, %v1957_v25 }
  0x5b   : > { %v1646_v7 = vcombine.high %v168_v2, %v172_v3  ;;  %v1645_v13 = vcombine.low %v168_v2, %v172_v3 }
  0x5c   : > { %922 = vmatpush1.bf16.msra.mxu0 %v1579_v8  ;;  %963 = vmatpush1.bf16.msra.mxu1 %v1581_v9  ;;  %v175_v8 = vld [vmem:[%s2465_s1 + $0x390] sm:$0xff] }
  0x5d   : > { %923 = vmatprep.subr.bf16.mxu0 %v1588_v10  ;;  %964 = vmatprep.subr.bf16.mxu1 %v1590_v11  ;;  %v179_v9 = vld [vmem:[%s2465_s1 + $0x3b0] sm:$0xff]  ;;  %v176_v10 = vld [vmem:[%s2465_s1 + $0x398] sm:$0xff] }
  0x5e   : > { %v180_v11 = vld [vmem:[%s2465_s1 + $0x3b8] sm:$0xff]  ;;  %v1652_v14 = vcombine.high %v175_v8, %v179_v9  ;;  %v1651_v20 = vcombine.low %v175_v8, %v179_v9 }
  0x5f   : > { %v1654_v15 = vcombine.high %v176_v10, %v180_v11  ;;  %v1653_v21 = vcombine.low %v176_v10, %v180_v11 }
  0x60   : > { %924 = vmatpush1.bf16.msra.mxu0 %v1587_v16  ;;  %965 = vmatpush1.bf16.msra.mxu1 %v1589_v17  ;;  %v183_v16 = vld [vmem:[%s2465_s1 + $0x3d0] sm:$0xff] }
  0x61   : > { %925 = vmatprep.subr.bf16.mxu0 %v1596_v18  ;;  %966 = vmatprep.subr.bf16.mxu1 %v1598_v19  ;;  %v187_v17 = vld [vmem:[%s2465_s1 + $0x3f0] sm:$0xff]  ;;  %v184_v18 = vld [vmem:[%s2465_s1 + $0x3d8] sm:$0xff] }
  0x62   : > { %v188_v19 = vld [vmem:[%s2465_s1 + $0x3f8] sm:$0xff]  ;;  %v1660_v22 = vcombine.high %v183_v16, %v187_v17 }
  0x63   : > { %v1662_v23 = vcombine.high %v184_v18, %v188_v19 }
  0x64   : > { %926 = vmatpush1.bf16.msra.mxu0 %v1595_v24  ;;  %967 = vmatpush1.bf16.msra.mxu1 %v1597_v26  ;;  %v1659_v24 = vcombine.low %v183_v16, %v187_v17  ;;  %v1661_v26 = vcombine.low %v184_v18, %v188_v19 }
  0x65   : > { %927 = vmatprep.subr.bf16.mxu0 %v1604_v28  ;;  %968 = vmatprep.subr.bf16.mxu1 %v1606_v29 }
  0x68   : > { %928 = vmatpush1.bf16.msra.mxu0 %v1603_v38  ;;  %969 = vmatpush1.bf16.msra.mxu1 %v1605_v35 }
  0x69   : > { %929 = vmatprep.subr.bf16.mxu0 %v1612_v36  ;;  %970 = vmatprep.subr.bf16.mxu1 %v1614_v37 }
  0x6c   : > { %930 = vmatpush1.bf16.msra.mxu0 %v1611_v43  ;;  %971 = vmatpush1.bf16.msra.mxu1 %v1613_v44  ;;  %v1051_v43 = vsub.s32 2, %v1957_v25  ;;  %v1055_v44 = vsub.s32 3, %v1957_v25 }
  0x6d   : > { %931 = vmatprep.subr.bf16.mxu0 %v1620_v45  ;;  %972 = vmatprep.subr.bf16.mxu1 %v1622_v46  ;;  %v1039_v45 = vld [vmem:[%s2466_s2] sm:$0xff] }
  0x6e   : > { %v1044_v46 = vrot.slane %v1039_v45, %v1043_v42  ;;  %v1052_v49 = vrot.slane %v1039_v45, %v1051_v43  ;;  %v1056_v50 = vrot.slane %v1039_v45, %v1055_v44  ;;  %v1802_v44 = vld [vmem:[%s2467_s3 + $0x40] sm:$0xff] (%p37_p0)  }
  0x70   : > { %932 = vmatpush1.bf16.msra.mxu0 %v1619_v52  ;;  %973 = vmatpush1.bf16.msra.mxu1 %v1621_v53  ;;  %v1074_v52 = vcombine.low %v1052_v49, %v1056_v50  ;;  %v1806_v49 = vld [vmem:[%s2467_s3 + $0x50] sm:$0xff] (%p37_p0)  }
  0x71   : > { %933 = vmatprep.subr.bf16.mxu0 %v1628_v48  ;;  %974 = vmatprep.subr.bf16.mxu1 %v1630_v54  ;;  %v46_v54 = vld [vmem:[%s2342_s20] sm:$0xff]  ;;  %v1807_v50 = vld [vmem:[%s2467_s3 + $0x10] sm:$0xff] (%p37_p0)  }
  0x72   : > { %v1088_v48 = vrot.slane %v1074_v52, %v1972_v34  ;;  %v1809_v52 = vld [vmem:[%s2467_s3 + $0x18] sm:$0xff] (%p37_p0)  }
  0x74   : > { %934 = vmatpush1.bf16.msra.mxu0 %v1627_v59  ;;  %975 = vmatpush1.bf16.msra.mxu1 %v1629_v60  ;;  %v1059_v60 = vsub.s32 4, %v1957_v25 }
  0x75   : > { %935 = vmatprep.subr.bf16.mxu0 %v1636_v61  ;;  %976 = vmatprep.subr.bf16.mxu1 %v1638_v62  ;;  %v1063_v62 = vsub.s32 5, %v1957_v25 }
  0x76   : > { %v1060_v2 = vrot.slane %v1039_v45, %v1059_v60  ;;  %v1819_v60 = vld [vmem:[%s2469_s5 + $0x8] sm:$0xff] (%p37_p0)  }
  0x77   : > { %v1064_v3 = vrot.slane %v1039_v45, %v1063_v62  ;;  %v1815_v62 = vld [vmem:[%s2467_s3 + $0x30] sm:$0xff] (%p37_p0)  }
  0x78   : > { %936 = vmatpush1.bf16.msra.mxu0 %v1635_v4  ;;  %977 = vmatpush1.bf16.msra.mxu1 %v1637_v5  ;;  %v1068_v4 = vrot.slane %v1039_v45, %v1067_v63  ;;  %v1072_v5 = vrot.slane %v1039_v45, %v1071_v0  ;;  %v1820_v0 = vld [vmem:[%s2469_s5 + $0x10] sm:$0xff] (%p37_p0)  }
  0x79   : > { %937 = vmatprep.subr.bf16.mxu0 %v1644_v6  ;;  %978 = vmatprep.subr.bf16.mxu1 %v1646_v7  ;;  %v1090_v6 = vcombine.low %v1060_v2, %v1064_v3  ;;  %v1817_v3 = vld [vmem:[%s2467_s3 + $0x38] sm:$0xff] (%p37_p0)  }
  0x7a   : > { %v1091_v7 = vcombine.low %v1068_v4, %v1072_v5  ;;  %v1821_v4 = vld [vmem:[%s2469_s5 + $0x18] sm:$0xff] (%p37_p0)  }
  0x7c   : > { %938 = vmatpush1.bf16.msra.mxu0 %v1643_v12  ;;  %979 = vmatpush1.bf16.msra.mxu1 %v1645_v13 }
  0x7d   : > { %939 = vmatprep.subr.bf16.mxu0 %v1652_v14  ;;  %980 = vmatprep.subr.bf16.mxu1 %v1654_v15  ;;  %v1098_v15 = vrot.slane %v1090_v6, %v1972_v34  ;;  %v1822_v6 = vld [vmem:[%s2469_s5 + $0x20] sm:$0xff] (%p37_p0)  }
  0x80   : > { %940 = vmatpush1.bf16.msra.mxu0 %v1651_v20  ;;  %981 = vmatpush1.bf16.msra.mxu1 %v1653_v21 }
  0x81   : > { %941 = vmatprep.subr.bf16.mxu0 %v1660_v22  ;;  %982 = vmatprep.subr.bf16.mxu1 %v1662_v23  ;;  %v47_v23 = vld [vmem:[%s2342_s20 + $0x8] sm:$0xff] }
  0x84   : > { %942 = vmatpush1.bf16.msra.mxu0 %v1659_v24  ;;  %983 = vmatpush1.bf16.msra.mxu1 %v1661_v26 }
  0x85   :  { %1697 = vmatprep.subr.bf16.mxu0 (%p37_p0), %v1802_v44 }
  0x87   : > { %944 = vmatmul.mubr.bf16.vlgmr.msra.gmra.mrb[4].mxu0 %v2147_v27  ;;  %985 = vmatmul.mubr.bf16.vlgmr.msra.gmra.mrb[4].mxu1 %v2147_v27  ;;  %v1047_v27 = vsub.s32 1, %v1957_v25  ;;  %v1105_v25 = vrot.slane %v1091_v7, %v1972_v34  ;;  %v1823_v7 = vld [vmem:[%s2469_s5 + $0x28] sm:$0xff] (%p37_p0)  }
  0x89   : > { %v1048_v47 = vrot.slane %v1039_v45, %v1047_v27  ;;  %v1803_v45 = vld [vmem:[%s2467_s3] sm:$0xff] (%p37_p0)  }
  0x8a   :  { %1698 = vmatpush3.bf16.msra.mxu0 (%p37_p0), %v1803_v45 }
  0x8b   : > { %v1073_v51 = vcombine.low %v1044_v46, %v1048_v47  ;;  %v1804_v46 = vld [vmem:[%s2467_s3 + $0x48] sm:$0xff] (%p37_p0)   ;;  %v1853_v47 = vmov (%p37_p0), 0.0  }
  0x8c   :  { %1731 = vmatprep.subr.bf16.mxu1 (%p37_p0), %v1853_v47  ;;  %1699 = vmatprep.subr.bf16.mxu0 (%p37_p0), %v1804_v46 }
  0x8d   : > { %v1081_v53 = vrot.slane %v1073_v51, %v1972_v34  ;;  %v1808_v51 = vld [vmem:[%s2467_s3 + $0x58] sm:$0xff] (%p37_p0)   ;;  %1747 = vmatprep.mubr.msk.bf16.mxu1 (%p37_p0), %vm1854_vm1, %v1853_v47 }
  0x8f   : > { %v1089_v56 = vcombine.low %v1081_v53, %v1088_v48  ;;  %v1810_v53 = vld [vmem:[%s2467_s3 + $0x60] sm:$0xff] (%p37_p0)  }
  0x90   :  { %v1811_v48 = vld [vmem:[%s2467_s3 + $0x20] sm:$0xff] (%p37_p0)  }
 0x11a   : > { %v863_v28 = vpop.f32.mrb[0].mxu0  ;;  %v904_v29 = vpop.f32.mrb[0].mxu1 }
 0x11b   : > { %v865_v30 = vpop.f32.mrb[1].mxu0  ;;  %v906_v32 = vpop.f32.mrb[1].mxu1 }
 0x11c   : > { %v1001_v31 = vcombine.low %v863_v28, %v865_v30  ;;  %v867_v33 = vpop.f32.mrb[2].mxu0  ;;  %v1002_v38 = vcombine.low %v904_v29, %v906_v32  ;;  %v908_v35 = vpop.f32.mrb[2].mxu1  ;;  %v1106_v28 = vcombine.low %v1098_v15, %v1105_v25 }
 0x11d   : > { %v868_v36 = vpop.f32.mrb[3].mxu0  ;;  %v909_v39 = vpop.f32.mrb[3].mxu1 }
 0x11e   : > { %v1009_v37 = vrot.slane %v1001_v31, %v1972_v34  ;;  %v1016_v40 = vrot.slane %v1002_v38, %v1972_v34 }
 0x120   : > { %v1017_v41 = vcombine.low %v1009_v37, %v1016_v40 }
 0x122   : > { %v1037_v55 = vadd.f32 %v1017_v41, %v46_v54  ;;  %v1812_v54 = vld [vmem:[%s2467_s3 + $0x68] sm:$0xff] (%p37_p0)  }
 0x124   : > { %v1109_v57 = vadd.f32 %v1089_v56, %v1037_v55  ;;  %v1818_v56 = vld [vmem:[%s2469_s5] sm:$0xff] (%p37_p0)  }
 0x125   :  { %1732 = vmatpush3.bf16.msra.mxu1 (%p37_p0), %v1818_v56 }
 0x126   : > { %v1118_v58 = vrot.slane %v1109_v57, 4  ;;  %v1663_v61 = vmul.f32 -1.442695, %v1109_v57  ;;  %v1813_v57 = vld [vmem:[%s2467_s3 + $0x28] sm:$0xff] (%p37_p0)   ;;  %1733 = vmatprep.subr.bf16.mxu1 (%p37_p0), %v1853_v47 }
 0x128   : > { %v1664_v59 = vmul.f32 -1.442695, %v1118_v58 }
 0x129   :  { %1734 = vmatpush3.bf16.msra.mxu1 (%p37_p0), %v1819_v60 }
 0x12a   : > { %1786 = vpow2.f32 %v1664_v59  ;;  %1735 = vmatprep.subr.bf16.mxu1 (%p37_p0), %v1853_v47 }
 0x12b   : > { %1788 = vpow2.f32 %v1663_v61  ;;  %v1814_v61 = vld [vmem:[%s2467_s3 + $0x70] sm:$0xff] (%p37_p0)  }
 0x12d   :  { %1736 = vmatpush3.bf16.msra.mxu1 (%p37_p0), %v1820_v0 }
 0x12e   :  { %1737 = vmatprep.subr.bf16.mxu1 (%p37_p0), %v1853_v47 }
 0x131   :  { %1738 = vmatpush3.bf16.msra.mxu1 (%p37_p0), %v1821_v4 }
 0x132   :  { %1739 = vmatprep.subr.bf16.mxu1 (%p37_p0), %v1853_v47 }
 0x134   : > { %v1787_v18 = vpop.eup %1786 }
 0x135   : > { %v1789_v21 = vpop.eup %1788  ;;  %v1123_v24 = vadd.f32 1.0, %v1787_v18  ;;  %1740 = vmatpush3.bf16.msra.mxu1 (%p37_p0), %v1822_v6 }
 0x136   : > { %v1114_v29 = vadd.f32 1.0, %v1789_v21  ;;  %1741 = vmatprep.subr.bf16.mxu1 (%p37_p0), %v1853_v47 }
 0x137   : > { %1790 = vrcp.f32 %v1123_v24 }
 0x138   : > { %1792 = vrcp.f32 %v1114_v29 }
 0x139   :  { %1742 = vmatpush3.bf16.msra.mxu1 (%p37_p0), %v1823_v7 }
 0x13a   :  { %1743 = vmatprep.subr.bf16.mxu1 (%p37_p0), %v1853_v47 }
 0x141   : > { %v1791_v38 = vpop.eup %1790 }
 0x142   : > { %v1793_v35 = vpop.eup %1792  ;;  %v1136_v37 = vmul.f32 %v1842_v1, %v1791_v38 }
 0x15a   : > { %v945_v8 = vpop.f32.mrb[4].mxu0  ;;  %v986_v9 = vpop.f32.mrb[4].mxu1 }
 0x15b   : > { %v947_v10 = vpop.f32.mrb[5].mxu0  ;;  %v988_v12 = vpop.f32.mrb[5].mxu1 }
 0x15c   : > { %v1018_v11 = vcombine.low %v945_v8, %v947_v10  ;;  %v949_v13 = vpop.f32.mrb[6].mxu0  ;;  %v1019_v14 = vcombine.low %v986_v9, %v988_v12  ;;  %v990_v16 = vpop.f32.mrb[6].mxu1  ;;  %v1824_v8 = vld [vmem:[%s2469_s5 + $0x30] sm:$0xff] (%p37_p0)   ;;  %v1825_v9 = vld [vmem:[%s2469_s5 + $0x38] sm:$0xff] (%p37_p0)   ;;  %v1826_v10 = vld [vmem:[%s2471_s7] sm:$0xff] (%p37_p0)  }
 0x15d   : > { %v950_v17 = vpop.f32.mrb[7].mxu0  ;;  %v991_v20 = vpop.f32.mrb[7].mxu1  ;;  %1744 = vmatpush3.bf16.msra.mxu1 (%p37_p0), %v1824_v8  ;;  %v1666_v12 = vld [vmem:[%s2468_s4] ss:$0 sm:$0xff] (%p37_p0) }
 0x15e   : > { %v1026_v19 = vrot.slane %v1018_v11, %v1972_v34  ;;  %v1033_v22 = vrot.slane %v1019_v14, %v1972_v34  ;;  %1745 = vmatprep.subr.bf16.mxu1 (%p37_p0), %v1853_v47  ;;  %v1683_v20 = vld [vmem:[%s2470_s6] ss:$0 sm:$0xff] (%p37_p0) }
 0x160   : > { %v1034_v26 = vcombine.low %v1026_v19, %v1033_v22  ;;  %v1827_v19 = vld [vmem:[%s2471_s7 + $0x8] sm:$0xff] (%p37_p0)  }
 0x161   :  { %1746 = vmatpush3.bf16.msra.mxu1 (%p37_p0), %v1825_v9 }
 0x162   : > { %v1038_v30 = vadd.f32 %v1034_v26, %v47_v23 }
 0x164   : > { %v1110_v31 = vadd.f32 %v1106_v28, %v1038_v30  ;;  %v1692_v30 = vld [vmem:[#allocation2] ss:$0 sm:$0xff] (%p37_p0) }
 0x166   : > { %1794 = vtanh.f32 %v1110_v31  ;;  %v1128_v32 = vrot.slane %v1110_v31, 4 }
 0x168   : > { %v1665_v33 = vmul.f32 -1.442695, %v1128_v32 }
 0x16a   : > { %1796 = vpow2.f32 %v1665_v33 }
 0x170   : > { %v1795_v36 = vpop.eup %1794 }
 0x171   : > { %v1137_v39 = vmul.f32 %v1795_v36, %v1793_v35 }
 0x173   : > { %v1138_v1 = vadd.f32 %v1137_v39, %v1136_v37  }
 0x174   : > { %v1797_v40 = vpop.eup %1796 }
 0x175   : > { %v1133_v41 = vadd.f32 1.0, %v1797_v40  ;;  %1798 = vtanh.f32 %v1138_v1  ;;  %v1805_v1 = vld [vmem:[%s2467_s3 + $0x8] sm:$0xff] (%p37_p0)  }
 0x176   :  { %1700 = vmatpush3.bf16.msra.mxu0 (%p37_p0), %v1805_v1 }
 0x177   : > { %1800 = vrcp.f32 %v1133_v41  ;;  %1701 = vmatprep.subr.bf16.mxu0 (%p37_p0), %v1806_v49 }
 0x17a   :  { %1702 = vmatpush3.bf16.msra.mxu0 (%p37_p0), %v1807_v50 }
 0x17b   :  { %1703 = vmatprep.subr.bf16.mxu0 (%p37_p0), %v1808_v51 }
 0x17e   :  { %39 = sbr.rel (!%p37_p0) target bundleno = 3 (0x3), region = 64  ;;  %1704 = vmatpush3.bf16.msra.mxu0 (%p37_p0), %v1809_v52 }
 0x17f   : > { %v1799_v42 = vpop.eup %1798  ;;  %1705 = vmatprep.subr.bf16.mxu0 (%p37_p0), %v1810_v53 }
 0x181   : > { %v1801_v27 = vpop.eup %1800 }
 0x182   : > { %v1140_v43 = vmul.f32 %v1801_v27, %v1799_v42   ;;  %1706 = vmatpush3.bf16.msra.mxu0 (%p37_p0), %v1811_v48 }
 0x183   :  { %1707 = vmatprep.subr.bf16.mxu0 (%p37_p0), %v1812_v54 }
 0x184   : > { %v2474_v2 = vmov %v1140_v43  ;;  %vm1141_vm0 = vcmp.gt.f32.partialorder (%p37_p0), %v1140_v43, 0.0  ;;  %v1142_v55 = vmul.f32 (%p37_p0), 0.01, %v1140_v43 }
 0x186   :  { %v1143_v58 = vsel %vm1141_vm0, %v1140_v43, %v1142_v55  ;;  %1708 = vmatpush3.bf16.msra.mxu0 %v1813_v57 }
 0x187   :  { %v1151_v59 = vrot.slane %v1143_v58, %v1972_v34  ;;  %v1816_v34 = vld [vmem:[%s2467_s3 + $0x78] sm:$0xff]   ;;  %1709 = vmatprep.subr.bf16.mxu0 %v1814_v61 }
 0x189   :  { %v1152_v63 = vcombine.high %v1151_v59, %v1151_v59  ;;  %v1155_v5 = vpack.c.bf16 %v1151_v59, %v1151_v59 }
 0x18a   :  { %1710 = vmatpush3.bf16.msra.mxu0 %v1815_v62 }
 0x18b   :  { %v1156_v2 = vpack.c.bf16 %v1152_v63, %v1152_v63  ;;  %1711 = vmatprep.subr.bf16.mxu0 %v1816_v34 }
 0x18d   :  { %1324 = vmatprep.mubr.bf16.mxu0 %v1156_v2 }
 0x18e   :  { %1712 = vmatpush3.bf16.msra.mxu0 %v1817_v3 }
 0x18f   :  { %1751 = vmatprep.subr.bf16.mxu0 %v1853_v47 }
 0x191   :  { %1325 = vmatmul.mubr.bf16.vlgmr.msra.gmra.mrb[0].mxu0 %v1155_v5 }
 0x192   :  { %1755 = vmatprep.mubr.msk.bf16.mxu0 %vm1854_vm1, %v1853_v47  ;;  %1752 = vmatpush3.bf16.msra.mxu0 %v1826_v10 }
 0x193   :  { %1753 = vmatprep.subr.bf16.mxu0 %v1853_v47 }
 0x196   :  { %1754 = vmatpush3.bf16.msra.mxu0 %v1827_v19 }
 0x264   :  { %v1713_v11 = vpop.f32.mrb[0].mxu0 }
 0x265   :  { %v1714_v13 = vpop.f32.mrb[1].mxu0 }
 0x266   :  { %v1715_v14 = vadd.f32 %v1714_v13, %v1713_v11  ;;  %v1716_v15 = vpop.f32.mrb[2].mxu0 }
 0x267   :  { %v1717_v25 = vpop.f32.mrb[3].mxu0 }
 0x268   :  { %v1327_v16 = vadd.f32 %v1715_v14, %v1666_v12 }
 0x26a   :  { %v1332_v17 = vmax.f32 %v1327_v16, 0.0 }
 0x26c   :  { %v1333_v18 = vpack.c.bf16 %v1332_v17, %v1332_v17 }
 0x26e   :  { %1748 = vmatmul.mubr.bf16.vlgmr.msra.gmra.mrb[0].mxu1 %v1333_v18 }
 0x341   :  { %v1439_v21 = vpop.f32.mrb[0].mxu1 }
 0x342   :  { %v1440_v22 = vadd.f32 %v1683_v20, %v1439_v21  ;;  %v1749_v23 = vpop.f32.mrb[1].mxu1 }
 0x343   :  { %v1442_v24 = vpop.f32.mrb[2].mxu1 }
 0x344   :  { %v1445_v26 = vmax.f32 %v1440_v22, 0.0  ;;  %v1750_v28 = vpop.f32.mrb[3].mxu1 }
 0x346   :  { %v1446_v29 = vpack.c.bf16 %v1445_v26, %v1445_v26 }
 0x348   :  { %1756 = vmatmul.mubr.msk.bf16.vlgmr.msra.gmra.mrb[4].mxu0 %vm1470_vm2, %v1446_v29 }
 0x41b   :  { %v1508_v31 = vpop.f32.mrb[4].mxu0 }
 0x41c   :  { %v1509_v32 = vadd.f32 %v1692_v30, %v1508_v31  ;;  %v1757_v33 = vpop.f32.mrb[5].mxu0 }
 0x41d   :  { %v1511_v38 = vpop.f32.mrb[6].mxu0 }
 0x41e   :  { %1515 = vst.msk [vmem:[%s2473_s9] sm:$0x3] %vm1514_vm3, %v1509_v32  ;;  %v1758_v35 = vpop.f32.mrb[7].mxu0 }

// kernel: model_forward.2
= control target key start
LH: loop header
LB: loop body
LE: loop exit
PB: predicated region body
PF: predicated region fallthrough
CT: control target
= control target key end

     0   :  { %s10870_s0 = inlined_call_operand.vmem [shape: bf16[2,16,768], index: 0, kind: input, shape index: {}]   ;;  %s10871_s1 = inlined_call_operand.hbm [shape: bf16[2,768,1280], index: 1, kind: input, shape index: {}]   ;;  %s10872_s2 = inlined_call_operand.hbm [shape: f32[2,1,1280], index: 2, kind: input, shape index: {}]   ;;  %s10873_s3 = inlined_call_operand.hbm [shape: bf16[2,1280,512], index: 3, kind: input, shape index: {}]   ;;  %s10874_s4 = inlined_call_operand.hbm [shape: f32[2,1,512], index: 4, kind: input, shape index: {}]   ;;  %s10875_s5 = inlined_call_operand.hbm [shape: bf16[2,512,1024], index: 5, kind: input, shape index: {}]   ;;  %s10876_s6 = inlined_call_operand.vmem [shape: f32[2,16,1024], index: 6, kind: output, shape index: {}]  }
   0x1   :  { %10887 = sst [smem:[#allocation22_spill]] %s10870_s0 }
   0x2   :  { %10888 = sst [smem:[#allocation23_spill]] %s10872_s2 }
   0x3   :  { %10889 = sst [smem:[#allocation24_spill]] %s10874_s4 }
   0x4   :  { %10890 = sst [smem:[#allocation25_spill]] %s10876_s6 }
   0x5   :  { %11 = vsyncpa [#allocation5], 0 }
   0x6   :  { %13 = vsyncpa [#allocation5 + $0x1], 0 }
   0x7   :  { %14 = vsyncpa [#allocation7], 0 }
   0x8   :  { %16 = vsyncpa [#allocation7 + $0x1], 0 }
   0x9   :  { %17 = vsyncpa [#allocation10], 0 }
   0xa   :  { %19 = vsyncpa [#allocation10 + $0x1], 0  ;;  %s9490_s21 = smov 0   ;;  %s9492_s22 = smov 0  }
   0xb   :  { %s9494_s23 = smov 0   ;;  %s9496_s24 = smov 0  }
   0xc   :  { %s9498_s25 = smov 0   ;;  %s9500_s26 = smov 0  }
   0xd   :  { %s9502_s27 = smov 0   ;;  %s9504_s28 = smov 0  }
   0xe   :  { %s9506_s29 = smov 0   ;;  %s9508_s30 = smov 0  }
   0xf   :  { %s9510_s7 = smov 0  }
  0x10 LB: > { %10891 = sst [smem:[#allocation15_spill]] %s9408_s23  ;;  %s10877_s8 = sadd.s32 4294967295, %s9440_s7   ;;  %s9440_s7 = sphi %s9510_s7, %s25_s7   ;;  %s9436_s30 = sphi %s9508_s30, %s10927_s30   ;;  %s9432_s29 = sphi %s9506_s29, %s10919_s29   ;;  %s9428_s28 = sphi %s9504_s28, %s10926_s28   ;;  %s9424_s27 = sphi %s9502_s27, %s10918_s27   ;;  %s9420_s26 = sphi %s9500_s26, %s10925_s26   ;;  %s9416_s25 = sphi %s9498_s25, %s10924_s25   ;;  %s9412_s24 = sphi %s9496_s24, %s10923_s24   ;;  %s9408_s23 = sphi %s9494_s23, %s10916_s23   ;;  %s9404_s22 = sphi %s9492_s22, %s10922_s22   ;;  %s9400_s21 = sphi %s9490_s21, %s10921_s21  }
  0x11   : > { %10892 = sst [smem:[#allocation16_spill]] %s9424_s27  ;;  %s34_s9 = sadd.s32 1, %s9432_s29 }
  0x12   : > { %10893 = sst [smem:[#allocation17_spill]] %s9432_s29  ;;  %p35_p0 = scmp.ge.s32.totalorder %s34_s9, 2 }
  0x13   : > { %s37_s10 = sadd.s32 1, %s9436_s30  ;;  %s46_s11 = sadd.s32 1, %s9420_s26 }
  0x14   : > { %p53_p1 = scmp.ne.s32.totalorder %s9420_s26, %s9416_s25  ;;  %s10929_s9 = smov (%p35_p0, %s34_s9), 0 }
  0x15   : > { %10894 = sst [smem:[#allocation18_spill]] %s10929_s9  ;;  %s10931_s10 = smov (!%p35_p0, %s37_s10), %s9436_s30 }
  0x16   : > { %s42_s12 = ssub.s32 %s9432_s29, %s10929_s9  ;;  %p54_p2 = scmp.eq.s32.totalorder %s9440_s7, 0 }
  0x17   : > { %p39_p3 = scmp.ge.s32.totalorder %s10931_s10, 2  ;;  %p87_p4 = scmp.ne.s32.totalorder %s9416_s25, %s9412_s24 }
  0x18   : > { %p9558_p5 = por %p54_p2, %p53_p1  ;;  %p9564_p6 = scmp.eq.s32.totalorder %s10877_s8, 0 }
  0x19   : > { %s10933_s10 = smov (%p39_p3, %s10931_s10), 0  ;;  %s100_s16 = sadd.s32 1, %s9408_s23 }
  0x1a   : > { %s10895_s13 = scalar_select %p9558_p5, 1, 0 }
  0x1b   : > { %10897 = sst [smem:[#allocation19_spill]] %s10933_s10  ;;  %p9572_p7 = por %p9564_p6, %p87_p4 }
  0x1c   : > { %s41_s17 = ssub.s32 %s9436_s30, %s10933_s10  ;;  %p107_p8 = scmp.ne.s32.totalorder %s9408_s23, %s9404_s22 }
  0x1d   : > { %s10898_s15 = scalar_select %p9572_p7, 1, 0 }
  0x1e   : > { %s43_s18 = sor.u32 %s42_s12, %s41_s17  ;;  %p98_p9 = scmp.eq.s32.totalorder %s41_s17, 0 }
  0x1f   : > { %p44_p10 = scmp.eq.s32.totalorder %s43_s18, 0  ;;  %p9583_p11 = por %p107_p8, %p54_p2 }
  0x20   : > { %s9588_s20 = scalar_select %p98_p9, %s9408_s23, %s100_s16  }
  0x21   : > { %s9591_s24 = scalar_select %p44_p10, %s9420_s26, %s46_s11  }
  0x22   : > { %10900 = sst [smem:[#allocation20_spill]] %s9588_s20  ;;  %p113_p12 = scmp.ne.s32.totalorder %s9404_s22, %s9400_s21 }
  0x23   : > { %10901 = sst [smem:[#allocation21_spill]] %s9591_s24  ;;  %p7214_p0 = scmp.ge.s32.totalorder %s9440_s7, 4 }
  0x24   : > { %p9597_p13 = por %p113_p12, %p9564_p6 }
  0x25   : > { %237 = sbr.rel (%p7214_p0) target bundleno = 191 (0xbf), region = 16 }
  0x26   : > { %s10902_s8 = scalar_select %p9597_p13, 1, 0 }
  0x2c   : > { %240 = sbr.rel (!%p9558_p5) target bundleno = 55 (0x37), region = 20  ;;  %s242_s12 = sand.u32 (%p9558_p5), 1, %s9420_s26  }
  0x2d   : > { %s245_s16 = smul.u32 (%p9558_p5), 3, %s9432_s29  ;;  %s10903_s0 = sld [smem:[#allocation22_spill]] (%p9558_p5) }
  0x2e   : > { %s8156_s17 = smul.u32 (%p9558_p5), 24, %s242_s12 }
  0x2f   : > { %s8157_s11 = smul.u32 (%p9558_p5), 12, %s9436_s30 }
  0x30   : > { %s244_s24 = scalar_lea.vmem (%p9558_p5), [#allocation3], %s8156_s17 }
  0x31   : > { %s247_s18 = sadd.s32 (%p9558_p5), %s8157_s11, %s245_s16 }
  0x32   : > { %s7215_s21 = sshll.u32 (%p9558_p5), %s247_s18, 2 }
  0x33   : > { %s249_s9 = scalar_lea.vmem %s10903_s0, %s7215_s21 }
  0x34   : > { %v264_v0 = vld [vmem:[%s249_s9] sm:$0xff]  ;;  %v266_v1 = vld [vmem:[%s249_s9 + $0x18] sm:$0xff]  ;;  %v7216_v2 = vld [vmem:[%s249_s9 + $0x8] sm:$0xf] }
  0x35   : > { %265 = vst [vmem:[%s244_s24] sm:$0xff] %v264_v0  ;;  %267 = vst [vmem:[%s244_s24 + $0xc] sm:$0xff] %v266_v1  ;;  %v7218_v3 = vld [vmem:[%s249_s9 + $0x20] sm:$0xf] }
  0x36   : > { %7217 = vst [vmem:[%s244_s24 + $0x8] sm:$0xf] %v7216_v2  ;;  %7219 = vst [vmem:[%s244_s24 + $0x14] sm:$0xf] %v7218_v3 }
  0x37 PF: > { %s10881_s12 = sand.u32 1, %s9440_s7   ;;  %s9612_s16 = sand.u32 1, %s9408_s23  }
  0x38   : > { %s8161_s10 = smul.u32 10, %s9612_s16  ;;  %s10904_s2 = sld [smem:[#allocation23_spill]] }
  0x39   : > { %s8162_s11 = smul.u32 160, %s9436_s30  ;;  %s9624_s0 = scalar_lea.sflag [#allocation7], %s10881_s12 }
  0x3a   : > { %s313_s9 = scalar_lea.vmem [#allocation6], %s8161_s10 }
  0x3b   : > { %s321_s24 = sshll.u32 %s313_s9, 4  ;;  %s322_s24 = int_to_ptr.vmem [resolvable:$true] %s321_s24 }
  0x3e   : > { %s9620_s14 = scalar_lea.hbm %s10904_s2, %s8162_s11  ;;  %s9206_s11 = scalar_lea.hbm %s10904_s2, 320 }
  0x3f   : > { %s9202_s20 = scalar_lea.hbm %s9620_s14, 160  ;;  %p9207_p4 = scmp.lt.u32.totalorder %s9620_s14, %s10904_s2 }
  0x40   : > { %p9203_p1 = scmp.ne.s32.totalorder %s9620_s14, %s9202_s20  ;;  %p9208_p6 = scmp.lt.u32.totalorder %s9206_s11, %s9202_s20 }
  0x41   : > { %p9210_p9 = scmp.lt.u32.totalorder %s9202_s20, %s9620_s14 }
  0x42   : > { %p9204_p2 = pnand %p9203_p1, %p9583_p11  ;;  %p9209_p8 = por %p9208_p6, %p9207_p4 }
  0x44   : > { %p9205_p3 = pneg %p9204_p2  ;;  %p9211_p10 = por %p9210_p9, %p9209_p8 }
  0x46   : > { %p9212_p12 = pnand %p9211_p10, %p9205_p3 }
  0x48   : > { %9215 = shalt.err (!%p9212_p12)
}
  0x49   : > { %s9216_s10 = scalar_lea.vmem %s322_s24, 160  ;;  %s9442_s9 = smov [#allocation6]  }
  0x4a   : > { %p9217_p0 = scmp.ne.s32.totalorder %s322_s24, %s9216_s10  ;;  %s9220_s12 = sshll.u32 %s9442_s9, 4  ;;  %s9221_s12 = int_to_ptr.vmem [resolvable:$false] %s9220_s12 }
  0x4b   : > { %s9222_s23 = scalar_lea.vmem %s9221_s12, 320  ;;  %p9223_p13 = scmp.lt.s32.totalorder %s322_s24, %s9221_s12 }
  0x4c   : > { %p9218_p1 = pnand %p9217_p0, %p9583_p11  ;;  %p9224_p7 = scmp.lt.s32.totalorder %s9222_s23, %s9216_s10 }
  0x4e   : > { %p9219_p2 = pneg %p9218_p1  ;;  %p9225_p5 = por %p9224_p7, %p9223_p13 }
  0x50   : > { %p9226_p4 = pnand %p9225_p5, %p9219_p2 }
  0x52   : > { %9229 = shalt.err (!%p9226_p4)
}
  0x53   : > { %8170 = dma.hbm_to_vmem [thread:$0]  (%p9583_p11), %s9620_s14, 160, %s322_s24, %s9624_s0  }
  0x54   : > { %s8077_s20 = sshll.u32 %s9436_s30, 6  ;;  %s10905_s18 = sshll.u32 %s9612_s16, 2 }
  0x55   : > { %s353_s11 = scalar_lea.vmem [#allocation9], %s10905_s18  ;;  %s10906_s4 = sld [smem:[#allocation24_spill]] }
  0x56   : > { %s361_s17 = sshll.u32 %s353_s11, 4  ;;  %s10907_s10 = sand.u32 1, %s9440_s7   ;;  %s362_s17 = int_to_ptr.vmem [resolvable:$true] %s361_s17 }
  0x57   : > { %s9654_s23 = scalar_lea.sflag [#allocation10], %s10907_s10 }
  0x5b   : > { %s9650_s12 = scalar_lea.hbm %s10906_s4, %s8077_s20  ;;  %s9234_s18 = scalar_lea.hbm %s10906_s4, 128 }
  0x5c   : > { %s9230_s2 = scalar_lea.hbm %s9650_s12, 64  ;;  %p9235_p3 = scmp.lt.u32.totalorder %s9650_s12, %s10906_s4 }
  0x5d   : > { %p9231_p5 = scmp.ne.s32.totalorder %s9650_s12, %s9230_s2  ;;  %p9236_p6 = scmp.lt.u32.totalorder %s9234_s18, %s9230_s2 }
  0x5e   : > { %p9238_p9 = scmp.lt.u32.totalorder %s9230_s2, %s9650_s12 }
  0x5f   : > { %p9232_p7 = pnand %p9231_p5, %p9583_p11  ;;  %p9237_p8 = por %p9236_p6, %p9235_p3 }
  0x61   : > { %p9233_p13 = pneg %p9232_p7  ;;  %p9239_p10 = por %p9238_p9, %p9237_p8 }
  0x63   : > { %p9240_p12 = pnand %p9239_p10, %p9233_p13 }
  0x65   : > { %9243 = shalt.err (!%p9240_p12)
}
  0x66   : > { %s9244_s21 = scalar_lea.vmem %s362_s17, 64  ;;  %s9443_s9 = smov [#allocation9]  }
  0x67   : > { %p9245_p0 = scmp.ne.s32.totalorder %s362_s17, %s9244_s21  ;;  %s9248_s10 = sshll.u32 %s9443_s9, 4  ;;  %s9249_s10 = int_to_ptr.vmem [resolvable:$false] %s9248_s10 }
  0x68   : > { %s9250_s14 = scalar_lea.vmem %s9249_s10, 128  ;;  %p9251_p4 = scmp.lt.s32.totalorder %s362_s17, %s9249_s10 }
  0x69   : > { %p9246_p1 = pnand %p9245_p0, %p9583_p11  ;;  %p9252_p5 = scmp.lt.s32.totalorder %s9250_s14, %s9244_s21 }
  0x6b   : > { %p9247_p2 = pneg %p9246_p1  ;;  %p9253_p7 = por %p9252_p5, %p9251_p4 }
  0x6d   : > { %p9254_p3 = pnand %p9253_p7, %p9247_p2 }
  0x6f   : > { %9257 = shalt.err (!%p9254_p3)
}
  0x70   : > { %8172 = dma.hbm_to_vmem [thread:$0]  (%p9583_p11), %s9650_s12, 64, %s362_s17, %s9654_s23  }
  0x71   : > { %s285_s2 = sand.u32 1, %s9420_s26   ;;  %s8179_s18 = smul.u32 480, %s9432_s29 }
  0x72   : > { %s8158_s24 = smul.u32 1920, %s285_s2  ;;  %s9686_s12 = scalar_lea.sflag [#allocation5], %s285_s2 }
  0x73   : > { %s8160_s11 = smul.u32 960, %s9436_s30  ;;  %p10908_p6 = scmp.ne.s32.totalorder %s10895_s13, 0 }
  0x74   : > { %s289_s20 = scalar_lea.vmem [#allocation4], %s8158_s24  ;;  %s8163_s14 = smul.u32 2560, %s9612_s16 }
  0x75   : > { %s299_s21 = sshll.u32 %s289_s20, 4  ;;  %s296_s9 = sadd.s32 %s8179_s18, %s8160_s11  ;;  %s9677_s21 = int_to_ptr.vmem [resolvable:$true] %s299_s21 }
  0x76   : > { %s7220_s10 = sshll.u32 %s296_s9, 6  ;;  %s8164_s17 = smul.u32 40960, %s9436_s30 }
  0x77   : > { %s9683_s6 = scalar_lea.hbm %s10871_s1, %s7220_s10  ;;  %s9262_s11 = scalar_lea.hbm %s10871_s1, 122880 }
  0x78   : > { %s9258_s29 = scalar_lea.hbm %s9683_s6, 30720  ;;  %p9263_p10 = scmp.lt.u32.totalorder %s9683_s6, %s10871_s1 }
  0x79   : > { %p9259_p13 = scmp.ne.s32.totalorder %s9683_s6, %s9258_s29  ;;  %p9264_p12 = scmp.lt.u32.totalorder %s9262_s11, %s9258_s29 }
  0x7a   : > { %p9266_p1 = scmp.lt.u32.totalorder %s9258_s29, %s9683_s6 }
  0x7b   : > { %p9260_p8 = pnand %p9259_p13, %p10908_p6  ;;  %p9265_p0 = por %p9264_p12, %p9263_p10 }
  0x7d   : > { %p9261_p9 = pneg %p9260_p8  ;;  %p9267_p2 = por %p9266_p1, %p9265_p0 }
  0x7f   : > { %p9268_p4 = pnand %p9267_p2, %p9261_p9 }
  0x81   : > { %9271 = shalt.err (!%p9268_p4)
}
  0x82   : > { %s9272_s27 = scalar_lea.vmem %s9677_s21, 30720  ;;  %s9444_s2 = smov [#allocation4]  }
  0x83   : > { %p9273_p5 = scmp.ne.s32.totalorder %s9677_s21, %s9272_s27  ;;  %s9276_s9 = sshll.u32 %s9444_s2, 4  ;;  %s9277_s9 = int_to_ptr.vmem [resolvable:$false] %s9276_s9 }
  0x84   : > { %s9278_s10 = scalar_lea.vmem %s9277_s9, 61440  ;;  %p9279_p13 = scmp.lt.s32.totalorder %s9677_s21, %s9277_s9 }
  0x85   : > { %p9274_p7 = pnand %p9273_p5, %p10908_p6  ;;  %p9280_p8 = scmp.lt.s32.totalorder %s9278_s10, %s9272_s27 }
  0x87   : > { %p9275_p3 = pneg %p9274_p7  ;;  %p9281_p10 = por %p9280_p8, %p9279_p13 }
  0x89   : > { %p9282_p12 = pnand %p9281_p10, %p9275_p3 }
  0x8b   : > { %9285 = shalt.err (!%p9282_p12)
}
  0x8c   : > { %s9445_s29 = smov 640   ;;  %s9446_s24 = smov 40  }
  0x8d   : > { %8169 = dma.hbm_to_vmem [thread:$0]  (%p10908_p6), %s9683_s6, 30720, %s9677_s21, %s9686_s12, %s9445_s29, %s9445_s29, %s9446_s24  }
  0x8e   : > { %s9715_s20 = scalar_lea.hbm %s10873_s3, %s8164_s17  ;;  %s332_s4 = scalar_lea.vmem [#allocation8], %s8163_s14 }
  0x8f   : > { %s339_s27 = sshll.u32 %s332_s4, 4  ;;  %s9286_s2 = scalar_lea.hbm %s9715_s20, 40960  ;;  %s9719_s27 = int_to_ptr.vmem [resolvable:$true] %s339_s27 }
  0x90   : > { %p9287_p9 = scmp.ne.s32.totalorder %s9715_s20, %s9286_s2  ;;  %s9290_s21 = scalar_lea.hbm %s10873_s3, 81920 }
  0x91   : > { %p9291_p1 = scmp.lt.u32.totalorder %s9715_s20, %s10873_s3  ;;  %p9292_p2 = scmp.lt.u32.totalorder %s9290_s21, %s9286_s2 }
  0x92   : > { %p9288_p0 = pnand %p9287_p9, %p9583_p11  ;;  %p9294_p5 = scmp.lt.u32.totalorder %s9286_s2, %s9715_s20 }
  0x93   : > { %p9293_p4 = por %p9292_p2, %p9291_p1 }
  0x94   : > { %p9289_p6 = pneg %p9288_p0 }
  0x95   : > { %p9295_p7 = por %p9294_p5, %p9293_p4 }
  0x97   : > { %p9296_p3 = pnand %p9295_p7, %p9289_p6 }
  0x99   : > { %9299 = shalt.err (!%p9296_p3)
}
  0x9a   : > { %s9300_s14 = scalar_lea.vmem %s9719_s27, 40960  ;;  %s9447_s9 = smov [#allocation8]  }
  0x9b   : > { %p9301_p13 = scmp.ne.s32.totalorder %s9719_s27, %s9300_s14  ;;  %s9304_s10 = sshll.u32 %s9447_s9, 4  ;;  %s9305_s10 = int_to_ptr.vmem [resolvable:$false] %s9304_s10 }
  0x9c   : > { %s9306_s29 = scalar_lea.vmem %s9305_s10, 81920  ;;  %p9307_p12 = scmp.lt.s32.totalorder %s9719_s27, %s9305_s10 }
  0x9d   : > { %p9302_p8 = pnand %p9301_p13, %p9583_p11  ;;  %p9308_p9 = scmp.lt.s32.totalorder %s9306_s29, %s9300_s14 }
  0x9f   : > { %p9303_p10 = pneg %p9302_p8  ;;  %p9309_p0 = por %p9308_p9, %p9307_p12 }
  0xa1   : > { %p9310_p1 = pnand %p9309_p0, %p9303_p10 }
  0xa3   : > { %9313 = shalt.err (!%p9310_p1)
}
  0xa4   : > { %s9448_s24 = smov 256   ;;  %s9449_s18 = smov 16  }
  0xa5   : > { %8171 = dma.hbm_to_vmem [thread:$0]  (%p9583_p11), %s9715_s20, 40960, %s9719_s27, %s9624_s0, %s9448_s24, %s9448_s24, %s9449_s18  }
  0xa6   : > { %s7226_s11 = sshll.u32 %s9612_s16, 11  ;;  %s8078_s4 = sshll.u32 %s9436_s30, 15 }
  0xa7   : > { %s9748_s13 = scalar_lea.hbm %s10875_s5, %s8078_s4  ;;  %s372_s21 = scalar_lea.vmem [#allocation11], %s7226_s11 }
  0xa8   : > { %s379_s17 = sshll.u32 %s372_s21, 4  ;;  %s9314_s12 = scalar_lea.hbm %s9748_s13, 32768  ;;  %s9750_s17 = int_to_ptr.vmem [resolvable:$true] %s379_s17 }
  0xa9   : > { %p9315_p6 = scmp.ne.s32.totalorder %s9748_s13, %s9314_s12  ;;  %s9318_s20 = scalar_lea.hbm %s10875_s5, 65536 }
  0xaa   : > { %p9319_p5 = scmp.lt.u32.totalorder %s9748_s13, %s10875_s5  ;;  %p9320_p7 = scmp.lt.u32.totalorder %s9318_s20, %s9314_s12 }
  0xab   : > { %p9316_p2 = pnand %p9315_p6, %p9583_p11  ;;  %p9322_p13 = scmp.lt.u32.totalorder %s9314_s12, %s9748_s13 }
  0xac   : > { %p9321_p3 = por %p9320_p7, %p9319_p5 }
  0xad   : > { %p9317_p4 = pneg %p9316_p2 }
  0xae   : > { %p9323_p8 = por %p9322_p13, %p9321_p3 }
  0xb0   : > { %p9324_p10 = pnand %p9323_p8, %p9317_p4 }
  0xb2   : > { %9327 = shalt.err (!%p9324_p10)
}
  0xb3   : > { %s9328_s9 = scalar_lea.vmem %s9750_s17, 32768  ;;  %s9450_s10 = smov [#allocation11]  }
  0xb4   : > { %p9329_p12 = scmp.ne.s32.totalorder %s9750_s17, %s9328_s9  ;;  %s9332_s29 = sshll.u32 %s9450_s10, 4  ;;  %s9333_s29 = int_to_ptr.vmem [resolvable:$false] %s9332_s29 }
  0xb5   : > { %s9334_s24 = scalar_lea.vmem %s9333_s29, 65536  ;;  %p9335_p1 = scmp.lt.s32.totalorder %s9750_s17, %s9333_s29 }
  0xb6   : > { %p9330_p9 = pnand %p9329_p12, %p9583_p11  ;;  %p9336_p6 = scmp.lt.s32.totalorder %s9334_s24, %s9328_s9 }
  0xb8   : > { %p9331_p0 = pneg %p9330_p9  ;;  %p9337_p2 = por %p9336_p6, %p9335_p1 }
  0xba   : > { %p9338_p5 = pnand %p9337_p2, %p9331_p0 }
  0xbc   : > { %9341 = shalt.err (!%p9338_p5)
}
  0xbd   : > { %s9451_s18 = smov 512   ;;  %s9452_s11 = smov 32  }
  0xbe   : > { %8173 = dma.hbm_to_vmem [thread:$0]  (%p9583_p11), %s9748_s13, 32768, %s9750_s17, %s9654_s23, %s9451_s18, %s9451_s18, %s9452_s11  }
  0xbf PF: > { %p7229_p4 = scmp.ge.s32.totalorder %s9440_s7, 1  ;;  %p387_p7 = scmp.lt.s32.totalorder %s9440_s7, 5 }
  0xc1   : > { %p388_p3 = pnand %p7229_p4, %p387_p7 }
  0xc2   : > { %s394_s4 = sand.u32 (!%p388_p3), 1, %s9416_s25   ;;  %p10909_p13 = scmp.ne.s32.totalorder (!%p388_p3), %s10898_s15, 0 }
  0xc3   : > { %391 = sbr.rel (%p388_p3) target bundleno = 1630 (0x65e), region = 66  ;;  %s401_s12 = scalar_lea.sflag (!%p388_p3), [#allocation5], %s394_s4 }
  0xc4   : > { %s8165_s2 = smul.u32 (!%p388_p3), 24, %s394_s4 }
  0xc5   : > { %s8166_s6 = smul.u32 (!%p388_p3), 1920, %s394_s4 }
  0xc6   : > { %s9777_s21 = scalar_lea.vmem (!%p388_p3), [#allocation3], %s8165_s2 }
  0xc7   : > { %s9779_s0 = scalar_lea.vmem (!%p388_p3), [#allocation4], %s8166_s6 }
  0xca   : > { %9387 = dma.done.wait (%p10909_p13), %s401_s12, 30720  }
  0xcb   : > { %9389 = vsyncadd (%p10909_p13), %s401_s12, 4294936576  ;;  %s10910_s19 = sadd.s32 4294967295, %s9440_s7   ;;  %s411_s13 = sand.u32 1, %s9404_s22  }
  0xcc   : > { %s409_s23 = sand.u32 1, %s10910_s19   ;;  %s8167_s17 = smul.u32 10, %s411_s13 }
  0xcd   : > { %s410_s16 = scalar_lea.sflag [#allocation7], %s409_s23  ;;  %p10911_p11 = scmp.ne.s32.totalorder %s10902_s8, 0 }
  0xce   : > { %s9788_s20 = scalar_lea.vmem [#allocation6], %s8167_s17 }
  0xcf   : > { %9391 = dma.done.wait (%p10911_p11), %s410_s16, 41120  }
  0xd0   : > { %9393 = vsyncadd (%p10911_p11), %s410_s16, 4294926176  ;;  %s8168_s27 = smul.u32 2560, %s411_s13  ;;  %s7230_s14 = sshll.u32 %s411_s13, 2 }
  0xd1   : > { %s428_s9 = scalar_lea.sflag [#allocation10], %s409_s23  ;;  %s9796_s10 = scalar_lea.vmem [#allocation9], %s7230_s14 }
  0xd2   : > { %s9794_s15 = scalar_lea.vmem [#allocation8], %s8168_s27 }
  0xd3   : > { %9395 = dma.done.wait (%p10911_p11), %s428_s9, 32832  }
  0xd4   : > { %9397 = vsyncadd (%p10911_p11), %s428_s9, 4294934464  ;;  %s7231_s29 = sshll.u32 %s411_s13, 11  ;;  %p495_p8 = scmp.lt.s32.totalorder %s9428_s28, 1 }
  0xd5   : > { %s10912_s4 = sld [smem:[#allocation25_spill]]  ;;  %s9809_s6 = scalar_lea.vmem [#allocation11], %s7231_s29 }
  0xd6   : > { %s10935_s28 = smov (!%p495_p8, %s9428_s28), 1  ;;  %s10913_s12 = sld [smem:[#allocation16_spill]] }
  0xd7   : > { %s8079_s24 = sshll.u32 %s10935_s28, 7 }
  0xdb   : > { %s9807_s2 = scalar_lea.vmem %s10912_s4, %s8079_s24 }
  0xdc   : > { %p7234_p10 = scmp.ne.s32.totalorder %s10913_s12, 0 }
  0xdd   : > { %v9453_v4 = vmov (!%p7234_p10), 0.0  }
  0xde   : > { %504 = sbr.rel (%p7234_p10) target bundleno = 232 (0xe8), region = 94  ;;  %505 = vst [vmem:[#allocation2] sm:$0xff] (!%p7234_p10), %v9453_v4  ;;  %506 = vst [vmem:[#allocation2 + $0x8] sm:$0xff] (!%p7234_p10), %v9453_v4 }
  0xdf   : > { %507 = vst [vmem:[#allocation2 + $0x10] sm:$0xff] (!%p7234_p10), %v9453_v4  ;;  %508 = vst [vmem:[#allocation2 + $0x18] sm:$0xff] (!%p7234_p10), %v9453_v4 }
  0xe0   : > { %509 = vst [vmem:[#allocation2 + $0x20] sm:$0xff] (!%p7234_p10), %v9453_v4  ;;  %510 = vst [vmem:[#allocation2 + $0x28] sm:$0xff] (!%p7234_p10), %v9453_v4 }
  0xe1   : > { %511 = vst [vmem:[#allocation2 + $0x30] sm:$0xff] (!%p7234_p10), %v9453_v4  ;;  %512 = vst [vmem:[#allocation2 + $0x38] sm:$0xff] (!%p7234_p10), %v9453_v4 }
  0xe2   : > { %513 = vst [vmem:[#allocation2 + $0x40] sm:$0xff] (!%p7234_p10), %v9453_v4  ;;  %514 = vst [vmem:[#allocation2 + $0x48] sm:$0xff] (!%p7234_p10), %v9453_v4 }
  0xe3   : > { %515 = vst [vmem:[#allocation2 + $0x50] sm:$0xff] (!%p7234_p10), %v9453_v4  ;;  %516 = vst [vmem:[#allocation2 + $0x58] sm:$0xff] (!%p7234_p10), %v9453_v4 }
  0xe4   : > { %517 = vst [vmem:[#allocation2 + $0x60] sm:$0xff] (!%p7234_p10), %v9453_v4  ;;  %518 = vst [vmem:[#allocation2 + $0x68] sm:$0xff] (!%p7234_p10), %v9453_v4 }
  0xe5   : > { %519 = vst [vmem:[#allocation2 + $0x70] sm:$0xff] %v9453_v4  ;;  %520 = vst [vmem:[#allocation2 + $0x78] sm:$0xff] %v9453_v4 }
  0xe6   : > { %521 = vst [vmem:[#allocation2 + $0x80] sm:$0xff] %v9453_v4  ;;  %522 = vst [vmem:[#allocation2 + $0x88] sm:$0xff] %v9453_v4 }
  0xe7   : > { %523 = vst [vmem:[#allocation2 + $0x90] sm:$0xff] %v9453_v4  ;;  %524 = vst [vmem:[#allocation2 + $0x98] sm:$0xff] %v9453_v4 }
  0xe8 PF: > { %v8276_v5 = vld [vmem:[%s9779_s0 + $0x4] ss:$40 sps:$4 sm:$0xff]   ;;  %v9454_v7 = vmov 0   ;;  %v8280_v8 = vld [vmem:[%s9779_s0] ss:$40 sps:$4 sm:$0xff]   ;;  %s10914_s28 = sld [smem:[#allocation16_spill]] }
  0xe9   : > { %v8278_v6 = vld [vmem:[%s9779_s0 + $0x504] ss:$40 sps:$4 sm:$0xff]   ;;  %2080 = vmatprep.mubr.bf16.mxu0 %v9454_v7  ;;  %2005 = vmatprep.subr.bf16.mxu1 %v8276_v5  ;;  %v8281_v9 = vld [vmem:[%s9779_s0 + $0x500] ss:$40 sps:$4 sm:$0xff]   ;;  %v8282_v10 = vld [vmem:[%s9779_s0 + $0x54] ss:$40 sps:$4 sm:$0xff]  }
  0xea   : > { %2048 = vmatprep.subr.bf16.mxu0 %v8278_v6  ;;  %2006 = vmatpush1.bf16.msra.mxu1 %v8280_v8  ;;  %v8284_v11 = vld [vmem:[%s9779_s0 + $0x554] ss:$40 sps:$4 sm:$0xff]   ;;  %v8286_v12 = vld [vmem:[%s9779_s0 + $0x50] ss:$40 sps:$4 sm:$0xff]   ;;  %v8288_v14 = vld [vmem:[%s9779_s0 + $0xa4] ss:$40 sps:$4 sm:$0xff]  }
  0xeb   : > { %2049 = vmatpush1.bf16.msra.mxu0 %v8281_v9  ;;  %2007 = vmatprep.subr.bf16.mxu1 %v8282_v10  ;;  %v8287_v13 = vld [vmem:[%s9779_s0 + $0x550] ss:$40 sps:$4 sm:$0xff]   ;;  %v8290_v15 = vld [vmem:[%s9779_s0 + $0x5a4] ss:$40 sps:$4 sm:$0xff]   ;;  %v8292_v16 = vld [vmem:[%s9779_s0 + $0xa0] ss:$40 sps:$4 sm:$0xff]  }
  0xec   : > { %2050 = vmatprep.subr.bf16.mxu0 %v8284_v11  ;;  %v8293_v17 = vld [vmem:[%s9779_s0 + $0x5a0] ss:$40 sps:$4 sm:$0xff]   ;;  %v8294_v18 = vld [vmem:[%s9779_s0 + $0xf4] ss:$40 sps:$4 sm:$0xff]   ;;  %v8298_v20 = vld [vmem:[%s9779_s0 + $0xf0] ss:$40 sps:$4 sm:$0xff]  }
  0xed   : > { %v8296_v19 = vld [vmem:[%s9779_s0 + $0x5f4] ss:$40 sps:$4 sm:$0xff]   ;;  %v8299_v21 = vld [vmem:[%s9779_s0 + $0x5f0] ss:$40 sps:$4 sm:$0xff]   ;;  %v8300_v22 = vld [vmem:[%s9779_s0 + $0x144] ss:$40 sps:$4 sm:$0xff]  }
  0xee   : > { %2008 = vmatpush1.bf16.msra.mxu1 %v8286_v12  ;;  %v8302_v23 = vld [vmem:[%s9779_s0 + $0x644] ss:$40 sps:$4 sm:$0xff]   ;;  %v8304_v24 = vld [vmem:[%s9779_s0 + $0x140] ss:$40 sps:$4 sm:$0xff]   ;;  %v8306_v26 = vld [vmem:[%s9779_s0 + $0x194] ss:$40 sps:$4 sm:$0xff]  }
  0xef   : > { %2051 = vmatpush1.bf16.msra.mxu0 %v8287_v13  ;;  %2009 = vmatprep.subr.bf16.mxu1 %v8288_v14  ;;  %v8305_v25 = vld [vmem:[%s9779_s0 + $0x640] ss:$40 sps:$4 sm:$0xff]   ;;  %v8308_v27 = vld [vmem:[%s9779_s0 + $0x694] ss:$40 sps:$4 sm:$0xff]   ;;  %v8310_v28 = vld [vmem:[%s9779_s0 + $0x190] ss:$40 sps:$4 sm:$0xff]  }
  0xf0   : > { %2052 = vmatprep.subr.bf16.mxu0 %v8290_v15  ;;  %v8311_v29 = vld [vmem:[%s9779_s0 + $0x690] ss:$40 sps:$4 sm:$0xff]   ;;  %v8312_v30 = vld [vmem:[%s9779_s0 + $0x1e4] ss:$40 sps:$4 sm:$0xff]   ;;  %v8316_v32 = vld [vmem:[%s9779_s0 + $0x1e0] ss:$40 sps:$4 sm:$0xff]  }
  0xf1   : > { %v8314_v31 = vld [vmem:[%s9779_s0 + $0x6e4] ss:$40 sps:$4 sm:$0xff]   ;;  %v8317_v33 = vld [vmem:[%s9779_s0 + $0x6e0] ss:$40 sps:$4 sm:$0xff]   ;;  %v8318_v34 = vld [vmem:[%s9779_s0 + $0x234] ss:$40 sps:$4 sm:$0xff]  }
  0xf2   : > { %2010 = vmatpush1.bf16.msra.mxu1 %v8292_v16  ;;  %v8320_v35 = vld [vmem:[%s9779_s0 + $0x734] ss:$40 sps:$4 sm:$0xff]   ;;  %v8322_v36 = vld [vmem:[%s9779_s0 + $0x230] ss:$40 sps:$4 sm:$0xff]   ;;  %v8324_v38 = vld [vmem:[%s9779_s0 + $0x284] ss:$40 sps:$4 sm:$0xff]  }
  0xf3   : > { %2053 = vmatpush1.bf16.msra.mxu0 %v8293_v17  ;;  %2011 = vmatprep.subr.bf16.mxu1 %v8294_v18  ;;  %v8323_v37 = vld [vmem:[%s9779_s0 + $0x730] ss:$40 sps:$4 sm:$0xff]   ;;  %v8328_v39 = vld [vmem:[%s9779_s0 + $0x14] ss:$40 sps:$4 sm:$0xff]   ;;  %v8329_v42 = vld [vmem:[%s9779_s0 + $0x280] ss:$40 sps:$4 sm:$0xff]  }
  0xf4   : > { %2054 = vmatprep.subr.bf16.mxu0 %v8296_v19  ;;  %v9848_v40 = vld [vmem:[%s9777_s21 + $0x8] ss:$12 sps:$4 sm:$0xff]   ;;  %v8333_v45 = vld [vmem:[%s9779_s0 + $0x60] ss:$40 sps:$4 sm:$0xff]   ;;  %v8378_v9 = vld [vmem:[%s9779_s0 + $0xc] ss:$40 sps:$4 sm:$0xff]  }
  0xf5   : > { %v8326_v41 = vld [vmem:[%s9779_s0 + $0x10] ss:$40 sps:$4 sm:$0xff]   ;;  %v8331_v43 = vld [vmem:[%s9779_s0 + $0x2d4] ss:$40 sps:$4 sm:$0xff]   ;;  %v8335_v44 = vld [vmem:[%s9779_s0 + $0x64] ss:$40 sps:$4 sm:$0xff]  }
  0xf6   : > { %2012 = vmatpush1.bf16.msra.mxu1 %v8298_v20  ;;  %v8336_v46 = vld [vmem:[%s9779_s0 + $0x2d0] ss:$40 sps:$4 sm:$0xff]   ;;  %v8337_v47 = vld [vmem:[%s9779_s0 + $0x324] ss:$40 sps:$4 sm:$0xff]   ;;  %v8341_v48 = vld [vmem:[%s9779_s0 + $0xb4] ss:$40 sps:$4 sm:$0xff]  }
  0xf7   : > { %2055 = vmatpush1.bf16.msra.mxu0 %v8299_v21  ;;  %2013 = vmatprep.subr.bf16.mxu1 %v8300_v22  ;;  %v8339_v49 = vld [vmem:[%s9779_s0 + $0xb0] ss:$40 sps:$4 sm:$0xff]   ;;  %v8342_v50 = vld [vmem:[%s9779_s0 + $0x320] ss:$40 sps:$4 sm:$0xff]   ;;  %v8343_v51 = vld [vmem:[%s9779_s0 + $0x374] ss:$40 sps:$4 sm:$0xff]  }
  0xf8   : > { %2056 = vmatprep.subr.bf16.mxu0 %v8302_v23  ;;  %v8347_v52 = vld [vmem:[%s9779_s0 + $0x104] ss:$40 sps:$4 sm:$0xff]   ;;  %v8345_v53 = vld [vmem:[%s9779_s0 + $0x100] ss:$40 sps:$4 sm:$0xff]   ;;  %v8348_v54 = vld [vmem:[%s9779_s0 + $0x370] ss:$40 sps:$4 sm:$0xff]  }
  0xf9   : > { %v8349_v55 = vld [vmem:[%s9779_s0 + $0x3c4] ss:$40 sps:$4 sm:$0xff]   ;;  %v8353_v57 = vld [vmem:[%s9779_s0 + $0x154] ss:$40 sps:$4 sm:$0xff]   ;;  %v8351_v58 = vld [vmem:[%s9779_s0 + $0x150] ss:$40 sps:$4 sm:$0xff]  }
  0xfa   : > { %2014 = vmatpush1.bf16.msra.mxu1 %v8304_v24  ;;  %v9867_v56 = vld [vmem:[%s9777_s21 + $0x4] ss:$12 sps:$4 sm:$0xff]   ;;  %v9889_v11 = vld [vmem:[%s9777_s21] ss:$12 sps:$4 sm:$0xff]   ;;  %p7478_p12 = scmp.ne.s32.totalorder %s10914_s28, 1 }
  0xfb   : > { %2057 = vmatpush1.bf16.msra.mxu0 %v8305_v25  ;;  %2015 = vmatprep.subr.bf16.mxu1 %v8306_v26  ;;  %v8354_v59 = vld [vmem:[%s9779_s0 + $0x3c0] ss:$40 sps:$4 sm:$0xff]   ;;  %v8355_v60 = vld [vmem:[%s9779_s0 + $0x414] ss:$40 sps:$4 sm:$0xff]   ;;  %v8359_v61 = vld [vmem:[%s9779_s0 + $0x1a4] ss:$40 sps:$4 sm:$0xff]  }
  0xfc   : > { %2058 = vmatprep.subr.bf16.mxu0 %v8308_v27  ;;  %2037 = vmatprep.mubr.bf16.mxu1 %v9867_v56  ;;  %v8357_v62 = vld [vmem:[%s9779_s0 + $0x1a0] ss:$40 sps:$4 sm:$0xff]   ;;  %v8360_v63 = vld [vmem:[%s9779_s0 + $0x410] ss:$40 sps:$4 sm:$0xff]   ;;  %v8361_v0 = vld [vmem:[%s9779_s0 + $0x464] ss:$40 sps:$4 sm:$0xff]  }
  0xfd   : > { %v8365_v1 = vld [vmem:[%s9779_s0 + $0x1f4] ss:$40 sps:$4 sm:$0xff]   ;;  %v8363_v2 = vld [vmem:[%s9779_s0 + $0x1f0] ss:$40 sps:$4 sm:$0xff]   ;;  %v8366_v3 = vld [vmem:[%s9779_s0 + $0x460] ss:$40 sps:$4 sm:$0xff]  }
  0xfe   : > { %2016 = vmatpush1.bf16.msra.mxu1 %v8310_v28  ;;  %v8367_v4 = vld [vmem:[%s9779_s0 + $0x4b4] ss:$40 sps:$4 sm:$0xff]   ;;  %v8371_v5 = vld [vmem:[%s9779_s0 + $0x244] ss:$40 sps:$4 sm:$0xff]   ;;  %v8369_v6 = vld [vmem:[%s9779_s0 + $0x240] ss:$40 sps:$4 sm:$0xff]  }
  0xff   : > { %2059 = vmatpush1.bf16.msra.mxu0 %v8311_v29  ;;  %2017 = vmatprep.subr.bf16.mxu1 %v8312_v30  ;;  %v8372_v8 = vld [vmem:[%s9779_s0 + $0x4b0] ss:$40 sps:$4 sm:$0xff]   ;;  %v8381_v10 = vld [vmem:[%s9779_s0 + $0x294] ss:$40 sps:$4 sm:$0xff]   ;;  %v8387_v15 = vld [vmem:[%s9779_s0 + $0x2e4] ss:$40 sps:$4 sm:$0xff]  }
 0x100   : > { %2060 = vmatprep.subr.bf16.mxu0 %v8314_v31  ;;  %v8376_v12 = vld [vmem:[%s9779_s0 + $0x8] ss:$40 sps:$4 sm:$0xff]   ;;  %v8384_v14 = vld [vmem:[%s9779_s0 + $0x5c] ss:$40 sps:$4 sm:$0xff]   ;;  %v8382_v16 = vld [vmem:[%s9779_s0 + $0x58] ss:$40 sps:$4 sm:$0xff]  }
 0x101   : > { %v8379_v13 = vld [vmem:[%s9779_s0 + $0x290] ss:$40 sps:$4 sm:$0xff]   ;;  %v8385_v17 = vld [vmem:[%s9779_s0 + $0x2e0] ss:$40 sps:$4 sm:$0xff]   ;;  %v8390_v18 = vld [vmem:[%s9779_s0 + $0xac] ss:$40 sps:$4 sm:$0xff]  }
 0x102   : > { %2018 = vmatpush1.bf16.msra.mxu1 %v8316_v32  ;;  %v8393_v19 = vld [vmem:[%s9779_s0 + $0x334] ss:$40 sps:$4 sm:$0xff]   ;;  %v8388_v20 = vld [vmem:[%s9779_s0 + $0xa8] ss:$40 sps:$4 sm:$0xff]   ;;  %v8399_v23 = vld [vmem:[%s9779_s0 + $0x384] ss:$40 sps:$4 sm:$0xff]  }
 0x103   : > { %2061 = vmatpush1.bf16.msra.mxu0 %v8317_v33  ;;  %2019 = vmatprep.subr.bf16.mxu1 %v8318_v34  ;;  %v8391_v21 = vld [vmem:[%s9779_s0 + $0x330] ss:$40 sps:$4 sm:$0xff]   ;;  %v8396_v22 = vld [vmem:[%s9779_s0 + $0xfc] ss:$40 sps:$4 sm:$0xff]   ;;  %v8397_v25 = vld [vmem:[%s9779_s0 + $0x380] ss:$40 sps:$4 sm:$0xff]  }
 0x104   : > { %2062 = vmatprep.subr.bf16.mxu0 %v8320_v35  ;;  %v8394_v24 = vld [vmem:[%s9779_s0 + $0xf8] ss:$40 sps:$4 sm:$0xff]   ;;  %v8402_v26 = vld [vmem:[%s9779_s0 + $0x14c] ss:$40 sps:$4 sm:$0xff]   ;;  %v8400_v28 = vld [vmem:[%s9779_s0 + $0x148] ss:$40 sps:$4 sm:$0xff]  }
 0x105   : > { %v8405_v27 = vld [vmem:[%s9779_s0 + $0x3d4] ss:$40 sps:$4 sm:$0xff]   ;;  %v8403_v29 = vld [vmem:[%s9779_s0 + $0x3d0] ss:$40 sps:$4 sm:$0xff]   ;;  %v8411_v31 = vld [vmem:[%s9779_s0 + $0x424] ss:$40 sps:$4 sm:$0xff]  }
 0x106   : > { %2020 = vmatpush1.bf16.msra.mxu1 %v8322_v36  ;;  %v8408_v30 = vld [vmem:[%s9779_s0 + $0x19c] ss:$40 sps:$4 sm:$0xff]   ;;  %v8406_v32 = vld [vmem:[%s9779_s0 + $0x198] ss:$40 sps:$4 sm:$0xff]   ;;  %v8414_v34 = vld [vmem:[%s9779_s0 + $0x1ec] ss:$40 sps:$4 sm:$0xff]  }
 0x107   : > { %2063 = vmatpush1.bf16.msra.mxu0 %v8323_v37  ;;  %2021 = vmatprep.subr.bf16.mxu1 %v8324_v38  ;;  %v8409_v33 = vld [vmem:[%s9779_s0 + $0x420] ss:$40 sps:$4 sm:$0xff]   ;;  %v8417_v35 = vld [vmem:[%s9779_s0 + $0x474] ss:$40 sps:$4 sm:$0xff]   ;;  %v8415_v37 = vld [vmem:[%s9779_s0 + $0x470] ss:$40 sps:$4 sm:$0xff]  }
 0x108   : > { %2177 = vmatprep.subr.bf16.mxu0 %v8328_v39  ;;  %v8412_v36 = vld [vmem:[%s9779_s0 + $0x1e8] ss:$40 sps:$4 sm:$0xff]   ;;  %v8420_v38 = vld [vmem:[%s9779_s0 + $0x23c] ss:$40 sps:$4 sm:$0xff]  }
 0x109   : > { %v8423_v39 = vld [vmem:[%s9779_s0 + $0x4c4] ss:$40 sps:$4 sm:$0xff]  }
 0x10a   : > { %2081 = vmatmul.mubr.bf16.vlgmr.msra.gmra.mrb[0].mxu0 %v9848_v40  ;;  %2022 = vmatpush1.bf16.msra.mxu1 %v8329_v42  ;;  %v8421_v42 = vld [vmem:[%s9779_s0 + $0x4c0] ss:$40 sps:$4 sm:$0xff]  }
 0x10b   : > { %2178 = vmatpush1.bf16.msra.mxu0 %v8326_v41  ;;  %2023 = vmatprep.subr.bf16.mxu1 %v8331_v43  ;;  %v8418_v41 = vld [vmem:[%s9779_s0 + $0x238] ss:$40 sps:$4 sm:$0xff]   ;;  %v8426_v43 = vld [vmem:[%s9779_s0 + $0x28c] ss:$40 sps:$4 sm:$0xff]  }
 0x10c   : > { %2179 = vmatprep.subr.bf16.mxu0 %v8335_v44  ;;  %2209 = vmatprep.mubr.bf16.mxu0 %v9867_v56  ;;  %v8429_v44 = vld [vmem:[%s9779_s0 + $0x514] ss:$40 sps:$4 sm:$0xff]  }
 0x10e   : > { %2024 = vmatpush1.bf16.msra.mxu1 %v8336_v46  ;;  %v8427_v46 = vld [vmem:[%s9779_s0 + $0x510] ss:$40 sps:$4 sm:$0xff]  }
 0x10f   : > { %2180 = vmatpush1.bf16.msra.mxu0 %v8333_v45  ;;  %2025 = vmatprep.subr.bf16.mxu1 %v8337_v47  ;;  %v8424_v45 = vld [vmem:[%s9779_s0 + $0x288] ss:$40 sps:$4 sm:$0xff]   ;;  %v8432_v47 = vld [vmem:[%s9779_s0 + $0x2dc] ss:$40 sps:$4 sm:$0xff]  }
 0x110   : > { %2181 = vmatprep.subr.bf16.mxu0 %v8341_v48  ;;  %v8435_v48 = vld [vmem:[%s9779_s0 + $0x564] ss:$40 sps:$4 sm:$0xff]  }
 0x112   : > { %2026 = vmatpush1.bf16.msra.mxu1 %v8342_v50  ;;  %v8433_v50 = vld [vmem:[%s9779_s0 + $0x560] ss:$40 sps:$4 sm:$0xff]  }
 0x113   : > { %2182 = vmatpush1.bf16.msra.mxu0 %v8339_v49  ;;  %2027 = vmatprep.subr.bf16.mxu1 %v8343_v51  ;;  %v8430_v49 = vld [vmem:[%s9779_s0 + $0x2d8] ss:$40 sps:$4 sm:$0xff]   ;;  %v8438_v51 = vld [vmem:[%s9779_s0 + $0x32c] ss:$40 sps:$4 sm:$0xff]  }
 0x114   : > { %2183 = vmatprep.subr.bf16.mxu0 %v8347_v52  ;;  %v8441_v52 = vld [vmem:[%s9779_s0 + $0x5b4] ss:$40 sps:$4 sm:$0xff]  }
 0x116   : > { %2028 = vmatpush1.bf16.msra.mxu1 %v8348_v54  ;;  %v8439_v54 = vld [vmem:[%s9779_s0 + $0x5b0] ss:$40 sps:$4 sm:$0xff]  }
 0x117   : > { %2184 = vmatpush1.bf16.msra.mxu0 %v8345_v53  ;;  %2029 = vmatprep.subr.bf16.mxu1 %v8349_v55  ;;  %v8436_v53 = vld [vmem:[%s9779_s0 + $0x328] ss:$40 sps:$4 sm:$0xff]   ;;  %v8444_v55 = vld [vmem:[%s9779_s0 + $0x37c] ss:$40 sps:$4 sm:$0xff]  }
 0x118   : > { %2185 = vmatprep.subr.bf16.mxu0 %v8353_v57  ;;  %v8447_v57 = vld [vmem:[%s9779_s0 + $0x604] ss:$40 sps:$4 sm:$0xff]  }
 0x11a   : > { %2030 = vmatpush1.bf16.msra.mxu1 %v8354_v59  ;;  %v8445_v59 = vld [vmem:[%s9779_s0 + $0x600] ss:$40 sps:$4 sm:$0xff]  }
 0x11b   : > { %2186 = vmatpush1.bf16.msra.mxu0 %v8351_v58  ;;  %2031 = vmatprep.subr.bf16.mxu1 %v8355_v60  ;;  %v8442_v58 = vld [vmem:[%s9779_s0 + $0x378] ss:$40 sps:$4 sm:$0xff]   ;;  %v8450_v60 = vld [vmem:[%s9779_s0 + $0x3cc] ss:$40 sps:$4 sm:$0xff]  }
 0x11c   : > { %2187 = vmatprep.subr.bf16.mxu0 %v8359_v61  ;;  %v8453_v61 = vld [vmem:[%s9779_s0 + $0x654] ss:$40 sps:$4 sm:$0xff]  }
 0x11e   : > { %2032 = vmatpush1.bf16.msra.mxu1 %v8360_v63  ;;  %v8451_v63 = vld [vmem:[%s9779_s0 + $0x650] ss:$40 sps:$4 sm:$0xff]  }
 0x11f   : > { %2188 = vmatpush1.bf16.msra.mxu0 %v8357_v62  ;;  %2033 = vmatprep.subr.bf16.mxu1 %v8361_v0  ;;  %v8448_v62 = vld [vmem:[%s9779_s0 + $0x3c8] ss:$40 sps:$4 sm:$0xff]   ;;  %v8456_v0 = vld [vmem:[%s9779_s0 + $0x41c] ss:$40 sps:$4 sm:$0xff]  }
 0x120   : > { %2189 = vmatprep.subr.bf16.mxu0 %v8365_v1  ;;  %v8459_v1 = vld [vmem:[%s9779_s0 + $0x6a4] ss:$40 sps:$4 sm:$0xff]  }
 0x122   : > { %2034 = vmatpush1.bf16.msra.mxu1 %v8366_v3  ;;  %v8457_v3 = vld [vmem:[%s9779_s0 + $0x6a0] ss:$40 sps:$4 sm:$0xff]  }
 0x123   : > { %2190 = vmatpush1.bf16.msra.mxu0 %v8363_v2  ;;  %2035 = vmatprep.subr.bf16.mxu1 %v8367_v4  ;;  %v8454_v2 = vld [vmem:[%s9779_s0 + $0x418] ss:$40 sps:$4 sm:$0xff]   ;;  %v8462_v4 = vld [vmem:[%s9779_s0 + $0x46c] ss:$40 sps:$4 sm:$0xff]  }
 0x124   : > { %2191 = vmatprep.subr.bf16.mxu0 %v8371_v5  ;;  %v8465_v5 = vld [vmem:[%s9779_s0 + $0x6f4] ss:$40 sps:$4 sm:$0xff]  }
 0x126   : > { %2036 = vmatpush1.bf16.msra.mxu1 %v8372_v8  ;;  %v8463_v8 = vld [vmem:[%s9779_s0 + $0x6f0] ss:$40 sps:$4 sm:$0xff]  }
 0x127   : > { %2192 = vmatpush1.bf16.msra.mxu0 %v8369_v6  ;;  %2091 = vmatprep.subr.bf16.mxu1 %v8378_v9  ;;  %v8460_v6 = vld [vmem:[%s9779_s0 + $0x468] ss:$40 sps:$4 sm:$0xff]   ;;  %v8468_v9 = vld [vmem:[%s9779_s0 + $0x4bc] ss:$40 sps:$4 sm:$0xff]  }
 0x128   : > { %2193 = vmatprep.subr.bf16.mxu0 %v8381_v10  ;;  %v8471_v10 = vld [vmem:[%s9779_s0 + $0x744] ss:$40 sps:$4 sm:$0xff]  }
 0x129   : > { %2038 = vmatmul.mubr.bf16.vlgmr.msra.gmra.mrb[0].mxu1 %v9889_v11 }
 0x12a   : > { %2092 = vmatpush1.bf16.msra.mxu1 %v8376_v12  ;;  %2123 = vmatprep.mubr.bf16.mxu1 %v9867_v56  ;;  %v8466_v12 = vld [vmem:[%s9779_s0 + $0x4b8] ss:$40 sps:$4 sm:$0xff]  }
 0x12b   : > { %2194 = vmatpush1.bf16.msra.mxu0 %v8379_v13  ;;  %2093 = vmatprep.subr.bf16.mxu1 %v8384_v14  ;;  %v8469_v13 = vld [vmem:[%s9779_s0 + $0x740] ss:$40 sps:$4 sm:$0xff]   ;;  %v8474_v14 = vld [vmem:[%s9779_s0 + $0x50c] ss:$40 sps:$4 sm:$0xff]  }
 0x12c   : > { %2195 = vmatprep.subr.bf16.mxu0 %v8387_v15  ;;  %v8477_v15 = vld [vmem:[%s9779_s0 + $0x24] ss:$40 sps:$4 sm:$0xff]  }
 0x12e   : > { %2094 = vmatpush1.bf16.msra.mxu1 %v8382_v16  ;;  %v8472_v16 = vld [vmem:[%s9779_s0 + $0x508] ss:$40 sps:$4 sm:$0xff]  }
 0x12f   : > { %2196 = vmatpush1.bf16.msra.mxu0 %v8385_v17  ;;  %2095 = vmatprep.subr.bf16.mxu1 %v8390_v18  ;;  %v8475_v17 = vld [vmem:[%s9779_s0 + $0x20] ss:$40 sps:$4 sm:$0xff]   ;;  %v8480_v18 = vld [vmem:[%s9779_s0 + $0x55c] ss:$40 sps:$4 sm:$0xff]  }
 0x130   : > { %2197 = vmatprep.subr.bf16.mxu0 %v8393_v19  ;;  %v8483_v19 = vld [vmem:[%s9779_s0 + $0x74] ss:$40 sps:$4 sm:$0xff]  }
 0x132   : > { %2096 = vmatpush1.bf16.msra.mxu1 %v8388_v20  ;;  %v8478_v20 = vld [vmem:[%s9779_s0 + $0x558] ss:$40 sps:$4 sm:$0xff]  }
 0x133   : > { %2198 = vmatpush1.bf16.msra.mxu0 %v8391_v21  ;;  %2097 = vmatprep.subr.bf16.mxu1 %v8396_v22  ;;  %v8481_v21 = vld [vmem:[%s9779_s0 + $0x70] ss:$40 sps:$4 sm:$0xff]   ;;  %v8486_v22 = vld [vmem:[%s9779_s0 + $0x5ac] ss:$40 sps:$4 sm:$0xff]  }
 0x134   : > { %2199 = vmatprep.subr.bf16.mxu0 %v8399_v23  ;;  %v8489_v23 = vld [vmem:[%s9779_s0 + $0xc4] ss:$40 sps:$4 sm:$0xff]  }
 0x136   : > { %2098 = vmatpush1.bf16.msra.mxu1 %v8394_v24  ;;  %v8484_v24 = vld [vmem:[%s9779_s0 + $0x5a8] ss:$40 sps:$4 sm:$0xff]  }
 0x137   : > { %2200 = vmatpush1.bf16.msra.mxu0 %v8397_v25  ;;  %2099 = vmatprep.subr.bf16.mxu1 %v8402_v26  ;;  %v8487_v25 = vld [vmem:[%s9779_s0 + $0xc0] ss:$40 sps:$4 sm:$0xff]   ;;  %v8492_v26 = vld [vmem:[%s9779_s0 + $0x5fc] ss:$40 sps:$4 sm:$0xff]  }
 0x138   : > { %2201 = vmatprep.subr.bf16.mxu0 %v8405_v27  ;;  %v8495_v27 = vld [vmem:[%s9779_s0 + $0x114] ss:$40 sps:$4 sm:$0xff]  }
 0x13a   : > { %2100 = vmatpush1.bf16.msra.mxu1 %v8400_v28  ;;  %v8490_v28 = vld [vmem:[%s9779_s0 + $0x5f8] ss:$40 sps:$4 sm:$0xff]  }
 0x13b   : > { %2202 = vmatpush1.bf16.msra.mxu0 %v8403_v29  ;;  %2101 = vmatprep.subr.bf16.mxu1 %v8408_v30  ;;  %v8493_v29 = vld [vmem:[%s9779_s0 + $0x110] ss:$40 sps:$4 sm:$0xff]   ;;  %v8498_v30 = vld [vmem:[%s9779_s0 + $0x64c] ss:$40 sps:$4 sm:$0xff]  }
 0x13c   : > { %2203 = vmatprep.subr.bf16.mxu0 %v8411_v31  ;;  %v8501_v31 = vld [vmem:[%s9779_s0 + $0x164] ss:$40 sps:$4 sm:$0xff]  }
 0x13e   : > { %2102 = vmatpush1.bf16.msra.mxu1 %v8406_v32  ;;  %v8496_v32 = vld [vmem:[%s9779_s0 + $0x648] ss:$40 sps:$4 sm:$0xff]  }
 0x13f   : > { %2204 = vmatpush1.bf16.msra.mxu0 %v8409_v33  ;;  %2103 = vmatprep.subr.bf16.mxu1 %v8414_v34  ;;  %v8499_v33 = vld [vmem:[%s9779_s0 + $0x160] ss:$40 sps:$4 sm:$0xff]   ;;  %v8504_v34 = vld [vmem:[%s9779_s0 + $0x69c] ss:$40 sps:$4 sm:$0xff]  }
 0x140   : > { %2205 = vmatprep.subr.bf16.mxu0 %v8417_v35  ;;  %v8507_v35 = vld [vmem:[%s9779_s0 + $0x1b4] ss:$40 sps:$4 sm:$0xff]  }
 0x142   : > { %2104 = vmatpush1.bf16.msra.mxu1 %v8412_v36  ;;  %v8502_v36 = vld [vmem:[%s9779_s0 + $0x698] ss:$40 sps:$4 sm:$0xff]  }
 0x143   : > { %2206 = vmatpush1.bf16.msra.mxu0 %v8415_v37  ;;  %2105 = vmatprep.subr.bf16.mxu1 %v8420_v38  ;;  %v8505_v37 = vld [vmem:[%s9779_s0 + $0x1b0] ss:$40 sps:$4 sm:$0xff]   ;;  %v8510_v38 = vld [vmem:[%s9779_s0 + $0x6ec] ss:$40 sps:$4 sm:$0xff]  }
 0x144   : > { %2207 = vmatprep.subr.bf16.mxu0 %v8423_v39  ;;  %v8513_v39 = vld [vmem:[%s9779_s0 + $0x204] ss:$40 sps:$4 sm:$0xff]  }
 0x146   : > { %2106 = vmatpush1.bf16.msra.mxu1 %v8418_v41  ;;  %v8508_v41 = vld [vmem:[%s9779_s0 + $0x6e8] ss:$40 sps:$4 sm:$0xff]  }
 0x147   : > { %2208 = vmatpush1.bf16.msra.mxu0 %v8421_v42  ;;  %2107 = vmatprep.subr.bf16.mxu1 %v8426_v43  ;;  %v8511_v42 = vld [vmem:[%s9779_s0 + $0x200] ss:$40 sps:$4 sm:$0xff]   ;;  %v8516_v43 = vld [vmem:[%s9779_s0 + $0x73c] ss:$40 sps:$4 sm:$0xff]  }
 0x148   : > { %2220 = vmatprep.subr.bf16.mxu0 %v8429_v44  ;;  %v8519_v44 = vld [vmem:[%s9779_s0 + $0x254] ss:$40 sps:$4 sm:$0xff]  }
 0x14a   : > { %2210 = vmatmul.mubr.bf16.vlgmr.msra.gmra.mrb[4].mxu0 %v9889_v11  ;;  %2108 = vmatpush1.bf16.msra.mxu1 %v8424_v45  ;;  %v8514_v45 = vld [vmem:[%s9779_s0 + $0x738] ss:$40 sps:$4 sm:$0xff]  }
 0x14b   : > { %2221 = vmatpush1.bf16.msra.mxu0 %v8427_v46  ;;  %2109 = vmatprep.subr.bf16.mxu1 %v8432_v47  ;;  %v8517_v46 = vld [vmem:[%s9779_s0 + $0x250] ss:$40 sps:$4 sm:$0xff]   ;;  %v8522_v47 = vld [vmem:[%s9779_s0 + $0x1c] ss:$40 sps:$4 sm:$0xff]  }
 0x14c   : > { %2222 = vmatprep.subr.bf16.mxu0 %v8435_v48  ;;  %2252 = vmatprep.mubr.bf16.mxu0 %v9454_v7  ;;  %v8525_v48 = vld [vmem:[%s9779_s0 + $0x2a4] ss:$40 sps:$4 sm:$0xff]  }
 0x14e   : > { %2110 = vmatpush1.bf16.msra.mxu1 %v8430_v49  ;;  %v8520_v49 = vld [vmem:[%s9779_s0 + $0x18] ss:$40 sps:$4 sm:$0xff]  }
 0x14f   : > { %2223 = vmatpush1.bf16.msra.mxu0 %v8433_v50  ;;  %2111 = vmatprep.subr.bf16.mxu1 %v8438_v51  ;;  %v8523_v50 = vld [vmem:[%s9779_s0 + $0x2a0] ss:$40 sps:$4 sm:$0xff]   ;;  %v8528_v51 = vld [vmem:[%s9779_s0 + $0x6c] ss:$40 sps:$4 sm:$0xff]  }
 0x150   : > { %2224 = vmatprep.subr.bf16.mxu0 %v8441_v52  ;;  %v8531_v52 = vld [vmem:[%s9779_s0 + $0x2f4] ss:$40 sps:$4 sm:$0xff]  }
 0x152   : > { %2112 = vmatpush1.bf16.msra.mxu1 %v8436_v53  ;;  %v8526_v53 = vld [vmem:[%s9779_s0 + $0x68] ss:$40 sps:$4 sm:$0xff]  }
 0x153   : > { %2225 = vmatpush1.bf16.msra.mxu0 %v8439_v54  ;;  %2113 = vmatprep.subr.bf16.mxu1 %v8444_v55  ;;  %v8529_v54 = vld [vmem:[%s9779_s0 + $0x2f0] ss:$40 sps:$4 sm:$0xff]   ;;  %v8534_v55 = vld [vmem:[%s9779_s0 + $0xbc] ss:$40 sps:$4 sm:$0xff]  }
 0x154   : > { %2226 = vmatprep.subr.bf16.mxu0 %v8447_v57  ;;  %v8537_v57 = vld [vmem:[%s9779_s0 + $0x344] ss:$40 sps:$4 sm:$0xff]  }
 0x156   : > { %2114 = vmatpush1.bf16.msra.mxu1 %v8442_v58  ;;  %v8532_v58 = vld [vmem:[%s9779_s0 + $0xb8] ss:$40 sps:$4 sm:$0xff]  }
 0x157   : > { %2227 = vmatpush1.bf16.msra.mxu0 %v8445_v59  ;;  %2115 = vmatprep.subr.bf16.mxu1 %v8450_v60  ;;  %v8540_v59 = vld [vmem:[%s9779_s0 + $0x10c] ss:$40 sps:$4 sm:$0xff]  }
 0x158   : > { %2228 = vmatprep.subr.bf16.mxu0 %v8453_v61  ;;  %v8543_v60 = vld [vmem:[%s9779_s0 + $0x394] ss:$40 sps:$4 sm:$0xff]   ;;  %v8538_v61 = vld [vmem:[%s9779_s0 + $0x108] ss:$40 sps:$4 sm:$0xff]  }
 0x15a   : > { %2116 = vmatpush1.bf16.msra.mxu1 %v8448_v62  ;;  %v8541_v62 = vld [vmem:[%s9779_s0 + $0x390] ss:$40 sps:$4 sm:$0xff]  }
 0x15b   : > { %2229 = vmatpush1.bf16.msra.mxu0 %v8451_v63  ;;  %2117 = vmatprep.subr.bf16.mxu1 %v8456_v0  ;;  %v8549_v63 = vld [vmem:[%s9779_s0 + $0x3e4] ss:$40 sps:$4 sm:$0xff]   ;;  %v8544_v0 = vld [vmem:[%s9779_s0 + $0x158] ss:$40 sps:$4 sm:$0xff]  }
 0x15c   : > { %2230 = vmatprep.subr.bf16.mxu0 %v8459_v1  ;;  %v8547_v1 = vld [vmem:[%s9779_s0 + $0x3e0] ss:$40 sps:$4 sm:$0xff]  }
 0x15e   : > { %2118 = vmatpush1.bf16.msra.mxu1 %v8454_v2  ;;  %v8552_v2 = vld [vmem:[%s9779_s0 + $0x1ac] ss:$40 sps:$4 sm:$0xff]  }
 0x15f   : > { %2231 = vmatpush1.bf16.msra.mxu0 %v8457_v3  ;;  %2119 = vmatprep.subr.bf16.mxu1 %v8462_v4  ;;  %v8555_v3 = vld [vmem:[%s9779_s0 + $0x434] ss:$40 sps:$4 sm:$0xff]   ;;  %v8550_v4 = vld [vmem:[%s9779_s0 + $0x1a8] ss:$40 sps:$4 sm:$0xff]  }
 0x160   : > { %2232 = vmatprep.subr.bf16.mxu0 %v8465_v5  ;;  %v8553_v5 = vld [vmem:[%s9779_s0 + $0x430] ss:$40 sps:$4 sm:$0xff]  }
 0x162   : > { %2120 = vmatpush1.bf16.msra.mxu1 %v8460_v6  ;;  %v8558_v6 = vld [vmem:[%s9779_s0 + $0x1fc] ss:$40 sps:$4 sm:$0xff]  }
 0x163   : > { %2233 = vmatpush1.bf16.msra.mxu0 %v8463_v8  ;;  %2121 = vmatprep.subr.bf16.mxu1 %v8468_v9  ;;  %v8561_v8 = vld [vmem:[%s9779_s0 + $0x484] ss:$40 sps:$4 sm:$0xff]   ;;  %v8556_v9 = vld [vmem:[%s9779_s0 + $0x1f8] ss:$40 sps:$4 sm:$0xff]  }
 0x164   : > { %2234 = vmatprep.subr.bf16.mxu0 %v8471_v10  ;;  %v8559_v10 = vld [vmem:[%s9779_s0 + $0x480] ss:$40 sps:$4 sm:$0xff]  }
 0x166   : > { %2122 = vmatpush1.bf16.msra.mxu1 %v8466_v12  ;;  %v8564_v12 = vld [vmem:[%s9779_s0 + $0x24c] ss:$40 sps:$4 sm:$0xff]  }
 0x167   : > { %2235 = vmatpush1.bf16.msra.mxu0 %v8469_v13  ;;  %2134 = vmatprep.subr.bf16.mxu1 %v8474_v14  ;;  %v8567_v13 = vld [vmem:[%s9779_s0 + $0x4d4] ss:$40 sps:$4 sm:$0xff]   ;;  %v8562_v14 = vld [vmem:[%s9779_s0 + $0x248] ss:$40 sps:$4 sm:$0xff]  }
 0x168   : > { %2349 = vmatprep.subr.bf16.mxu0 %v8477_v15  ;;  %v8565_v15 = vld [vmem:[%s9779_s0 + $0x4d0] ss:$40 sps:$4 sm:$0xff]  }
 0x169   : > { %2124 = vmatmul.mubr.bf16.vlgmr.msra.gmra.mrb[4].mxu1 %v9889_v11 }
 0x16a   : > { %2253 = vmatmul.mubr.bf16.vlgmr.msra.gmra.mrb[4].mxu0 %v9848_v40  ;;  %2135 = vmatpush1.bf16.msra.mxu1 %v8472_v16  ;;  %v8570_v16 = vld [vmem:[%s9779_s0 + $0x29c] ss:$40 sps:$4 sm:$0xff]  }
 0x16b   : > { %2350 = vmatpush1.bf16.msra.mxu0 %v8475_v17  ;;  %2136 = vmatprep.subr.bf16.mxu1 %v8480_v18  ;;  %v8573_v17 = vld [vmem:[%s9779_s0 + $0x524] ss:$40 sps:$4 sm:$0xff]   ;;  %v8568_v18 = vld [vmem:[%s9779_s0 + $0x298] ss:$40 sps:$4 sm:$0xff]  }
 0x16c   : > { %2351 = vmatprep.subr.bf16.mxu0 %v8483_v19  ;;  %2166 = vmatprep.mubr.bf16.mxu1 %v9454_v7  ;;  %v8571_v19 = vld [vmem:[%s9779_s0 + $0x520] ss:$40 sps:$4 sm:$0xff]  }
 0x16d   : > { %2381 = vmatprep.mubr.bf16.mxu0 %v9867_v56 }
 0x16e   : > { %2137 = vmatpush1.bf16.msra.mxu1 %v8478_v20  ;;  %v8576_v20 = vld [vmem:[%s9779_s0 + $0x2ec] ss:$40 sps:$4 sm:$0xff]  }
 0x16f   : > { %2352 = vmatpush1.bf16.msra.mxu0 %v8481_v21  ;;  %2138 = vmatprep.subr.bf16.mxu1 %v8486_v22  ;;  %v8579_v21 = vld [vmem:[%s9779_s0 + $0x574] ss:$40 sps:$4 sm:$0xff]   ;;  %v8574_v22 = vld [vmem:[%s9779_s0 + $0x2e8] ss:$40 sps:$4 sm:$0xff]  }
 0x170   : > { %2353 = vmatprep.subr.bf16.mxu0 %v8489_v23  ;;  %v8577_v23 = vld [vmem:[%s9779_s0 + $0x570] ss:$40 sps:$4 sm:$0xff]  }
 0x172   : > { %2139 = vmatpush1.bf16.msra.mxu1 %v8484_v24  ;;  %v8582_v24 = vld [vmem:[%s9779_s0 + $0x33c] ss:$40 sps:$4 sm:$0xff]  }
 0x173   : > { %2354 = vmatpush1.bf16.msra.mxu0 %v8487_v25  ;;  %2140 = vmatprep.subr.bf16.mxu1 %v8492_v26  ;;  %v8585_v25 = vld [vmem:[%s9779_s0 + $0x5c4] ss:$40 sps:$4 sm:$0xff]   ;;  %v8580_v26 = vld [vmem:[%s9779_s0 + $0x338] ss:$40 sps:$4 sm:$0xff]  }
 0x174   : > { %2355 = vmatprep.subr.bf16.mxu0 %v8495_v27  ;;  %v8583_v27 = vld [vmem:[%s9779_s0 + $0x5c0] ss:$40 sps:$4 sm:$0xff]  }
 0x176   : > { %2141 = vmatpush1.bf16.msra.mxu1 %v8490_v28  ;;  %v8588_v28 = vld [vmem:[%s9779_s0 + $0x38c] ss:$40 sps:$4 sm:$0xff]  }
 0x177   : > { %2356 = vmatpush1.bf16.msra.mxu0 %v8493_v29  ;;  %2142 = vmatprep.subr.bf16.mxu1 %v8498_v30  ;;  %v8591_v29 = vld [vmem:[%s9779_s0 + $0x614] ss:$40 sps:$4 sm:$0xff]   ;;  %v8586_v30 = vld [vmem:[%s9779_s0 + $0x388] ss:$40 sps:$4 sm:$0xff]  }
 0x178   : > { %2357 = vmatprep.subr.bf16.mxu0 %v8501_v31  ;;  %v8589_v31 = vld [vmem:[%s9779_s0 + $0x610] ss:$40 sps:$4 sm:$0xff]  }
 0x17a   : > { %2143 = vmatpush1.bf16.msra.mxu1 %v8496_v32  ;;  %v8594_v32 = vld [vmem:[%s9779_s0 + $0x3dc] ss:$40 sps:$4 sm:$0xff]  }
 0x17b   : > { %2358 = vmatpush1.bf16.msra.mxu0 %v8499_v33  ;;  %2144 = vmatprep.subr.bf16.mxu1 %v8504_v34  ;;  %v8597_v33 = vld [vmem:[%s9779_s0 + $0x664] ss:$40 sps:$4 sm:$0xff]   ;;  %v8592_v34 = vld [vmem:[%s9779_s0 + $0x3d8] ss:$40 sps:$4 sm:$0xff]  }
 0x17c   : > { %2359 = vmatprep.subr.bf16.mxu0 %v8507_v35  ;;  %v8595_v35 = vld [vmem:[%s9779_s0 + $0x660] ss:$40 sps:$4 sm:$0xff]  }
 0x17e   : > { %2145 = vmatpush1.bf16.msra.mxu1 %v8502_v36  ;;  %v8600_v36 = vld [vmem:[%s9779_s0 + $0x42c] ss:$40 sps:$4 sm:$0xff]  }
 0x17f   : > { %2360 = vmatpush1.bf16.msra.mxu0 %v8505_v37  ;;  %2146 = vmatprep.subr.bf16.mxu1 %v8510_v38  ;;  %v8603_v37 = vld [vmem:[%s9779_s0 + $0x6b4] ss:$40 sps:$4 sm:$0xff]   ;;  %v8598_v38 = vld [vmem:[%s9779_s0 + $0x428] ss:$40 sps:$4 sm:$0xff]  }
 0x180   : > { %2361 = vmatprep.subr.bf16.mxu0 %v8513_v39  ;;  %v8601_v39 = vld [vmem:[%s9779_s0 + $0x6b0] ss:$40 sps:$4 sm:$0xff]  }
 0x182   : > { %2147 = vmatpush1.bf16.msra.mxu1 %v8508_v41  ;;  %v8606_v41 = vld [vmem:[%s9779_s0 + $0x47c] ss:$40 sps:$4 sm:$0xff]  }
 0x183   : > { %2362 = vmatpush1.bf16.msra.mxu0 %v8511_v42  ;;  %2148 = vmatprep.subr.bf16.mxu1 %v8516_v43  ;;  %v8609_v42 = vld [vmem:[%s9779_s0 + $0x704] ss:$40 sps:$4 sm:$0xff]   ;;  %v8604_v43 = vld [vmem:[%s9779_s0 + $0x478] ss:$40 sps:$4 sm:$0xff]  }
 0x184   : > { %2363 = vmatprep.subr.bf16.mxu0 %v8519_v44  ;;  %v8607_v44 = vld [vmem:[%s9779_s0 + $0x700] ss:$40 sps:$4 sm:$0xff]  }
 0x186   : > { %2149 = vmatpush1.bf16.msra.mxu1 %v8514_v45  ;;  %v8612_v45 = vld [vmem:[%s9779_s0 + $0x4cc] ss:$40 sps:$4 sm:$0xff]  }
 0x187   : > { %2364 = vmatpush1.bf16.msra.mxu0 %v8517_v46  ;;  %2263 = vmatprep.subr.bf16.mxu1 %v8522_v47  ;;  %v8615_v46 = vld [vmem:[%s9779_s0 + $0x754] ss:$40 sps:$4 sm:$0xff]   ;;  %v8610_v47 = vld [vmem:[%s9779_s0 + $0x4c8] ss:$40 sps:$4 sm:$0xff]  }
 0x188   : > { %2365 = vmatprep.subr.bf16.mxu0 %v8525_v48  ;;  %v8613_v48 = vld [vmem:[%s9779_s0 + $0x750] ss:$40 sps:$4 sm:$0xff]  }
 0x189   : > { %2167 = vmatmul.mubr.bf16.vlgmr.msra.gmra.mrb[4].mxu1 %v9848_v40  ;;  %v8535_v40 = vld [vmem:[%s9779_s0 + $0x340] ss:$40 sps:$4 sm:$0xff]  }
 0x18a   : > { %2264 = vmatpush1.bf16.msra.mxu1 %v8520_v49  ;;  %2295 = vmatprep.mubr.bf16.mxu1 %v9867_v56  ;;  %v8546_v56 = vld [vmem:[%s9779_s0 + $0x15c] ss:$40 sps:$4 sm:$0xff]  }
 0x18b   : > { %2366 = vmatpush1.bf16.msra.mxu0 %v8523_v50  ;;  %2265 = vmatprep.subr.bf16.mxu1 %v8528_v51  ;;  %v8618_v49 = vld [vmem:[%s9779_s0 + $0x51c] ss:$40 sps:$4 sm:$0xff]   ;;  %v8616_v50 = vld [vmem:[%s9779_s0 + $0x518] ss:$40 sps:$4 sm:$0xff]   ;;  %v8621_v51 = vld [vmem:[%s9779_s0 + $0x56c] ss:$40 sps:$4 sm:$0xff]  }
 0x18c   : > { %2367 = vmatprep.subr.bf16.mxu0 %v8531_v52  ;;  %v8640_v52 = vld [vmem:[%s9777_s21 + $0x8] ss:$12 sps:$4 sm:$0xff]  }
 0x18e   : > { %2266 = vmatpush1.bf16.msra.mxu1 %v8526_v53  ;;  %v8619_v53 = vld [vmem:[%s9779_s0 + $0x568] ss:$40 sps:$4 sm:$0xff]  }
 0x18f   : > { %2368 = vmatpush1.bf16.msra.mxu0 %v8529_v54  ;;  %2267 = vmatprep.subr.bf16.mxu1 %v8534_v55  ;;  %v8624_v54 = vld [vmem:[%s9779_s0 + $0x5bc] ss:$40 sps:$4 sm:$0xff]   ;;  %v8622_v55 = vld [vmem:[%s9779_s0 + $0x5b8] ss:$40 sps:$4 sm:$0xff]  }
 0x190   : > { %2369 = vmatprep.subr.bf16.mxu0 %v8537_v57  ;;  %v8627_v57 = vld [vmem:[%s9779_s0 + $0x60c] ss:$40 sps:$4 sm:$0xff]  }
 0x192   : > { %2268 = vmatpush1.bf16.msra.mxu1 %v8532_v58  ;;  %v8625_v58 = vld [vmem:[%s9779_s0 + $0x608] ss:$40 sps:$4 sm:$0xff]  }
 0x193   : > { %2370 = vmatpush1.bf16.msra.mxu0 %v8535_v40  ;;  %2269 = vmatprep.subr.bf16.mxu1 %v8540_v59  ;;  %v8630_v40 = vld [vmem:[%s9779_s0 + $0x65c] ss:$40 sps:$4 sm:$0xff]   ;;  %v8633_v59 = vld [vmem:[%s9779_s0 + $0x6ac] ss:$40 sps:$4 sm:$0xff]  }
 0x194   : > { %2371 = vmatprep.subr.bf16.mxu0 %v8543_v60  ;;  %v8636_v60 = vld [vmem:[%s9779_s0 + $0x6fc] ss:$40 sps:$4 sm:$0xff]  }
 0x196   : > { %2270 = vmatpush1.bf16.msra.mxu1 %v8538_v61 }
 0x197   : > { %2372 = vmatpush1.bf16.msra.mxu0 %v8541_v62  ;;  %2271 = vmatprep.subr.bf16.mxu1 %v8546_v56  ;;  %v8634_v56 = vld [vmem:[%s9779_s0 + $0x6f8] ss:$40 sps:$4 sm:$0xff]  }
 0x198   : > { %2373 = vmatprep.subr.bf16.mxu0 %v8549_v63 }
 0x19a   : > { %2272 = vmatpush1.bf16.msra.mxu1 %v8544_v0  ;;  %v8639_v0 = vld [vmem:[%s9779_s0 + $0x74c] ss:$40 sps:$4 sm:$0xff]  }
 0x19b   : > { %2374 = vmatpush1.bf16.msra.mxu0 %v8547_v1  ;;  %2273 = vmatprep.subr.bf16.mxu1 %v8552_v2  ;;  %v8637_v2 = vld [vmem:[%s9779_s0 + $0x748] ss:$40 sps:$4 sm:$0xff]  }
 0x19c   : > { %2375 = vmatprep.subr.bf16.mxu0 %v8555_v3  ;;  %v525_v3 = vld [vmem:[#allocation2] sm:$0xff] }
 0x19e   : > { %2274 = vmatpush1.bf16.msra.mxu1 %v8550_v4 }
 0x19f   : > { %2376 = vmatpush1.bf16.msra.mxu0 %v8553_v5  ;;  %2275 = vmatprep.subr.bf16.mxu1 %v8558_v6  ;;  %v526_v6 = vld [vmem:[#allocation2 + $0x8] sm:$0xff] }
 0x1a0   : > { %2377 = vmatprep.subr.bf16.mxu0 %v8561_v8 }
 0x1a2   : > { %2276 = vmatpush1.bf16.msra.mxu1 %v8556_v9 }
 0x1a3   : > { %2378 = vmatpush1.bf16.msra.mxu0 %v8559_v10  ;;  %2277 = vmatprep.subr.bf16.mxu1 %v8564_v12  ;;  %v535_v10 = vld [vmem:[#allocation2 + $0x50] sm:$0xff] }
 0x1a4   : > { %2379 = vmatprep.subr.bf16.mxu0 %v8567_v13 }
 0x1a6   : > { %2278 = vmatpush1.bf16.msra.mxu1 %v8562_v14 }
 0x1a7   : > { %2380 = vmatpush1.bf16.msra.mxu0 %v8565_v15  ;;  %2279 = vmatprep.subr.bf16.mxu1 %v8570_v16  ;;  %v536_v15 = vld [vmem:[#allocation2 + $0x58] sm:$0xff] }
 0x1a8   : > { %2392 = vmatprep.subr.bf16.mxu0 %v8573_v17 }
 0x1aa   : > { %2382 = vmatmul.mubr.bf16.vlgmr.msra.gmra.mrb[8].mxu0 %v9889_v11  ;;  %2280 = vmatpush1.bf16.msra.mxu1 %v8568_v18 }
 0x1ab   : > { %2393 = vmatpush1.bf16.msra.mxu0 %v8571_v19  ;;  %2281 = vmatprep.subr.bf16.mxu1 %v8576_v20 }
 0x1ac   : > { %2394 = vmatprep.subr.bf16.mxu0 %v8579_v21  ;;  %2424 = vmatprep.mubr.bf16.mxu0 %v9454_v7  ;;  %v529_v21 = vld [vmem:[#allocation2 + $0x20] sm:$0xff] }
 0x1ae   : > { %2282 = vmatpush1.bf16.msra.mxu1 %v8574_v22  ;;  %v530_v22 = vld [vmem:[#allocation2 + $0x28] sm:$0xff] }
 0x1af   : > { %2395 = vmatpush1.bf16.msra.mxu0 %v8577_v23  ;;  %2283 = vmatprep.subr.bf16.mxu1 %v8582_v24  ;;  %v539_v24 = vld [vmem:[#allocation2 + $0x70] sm:$0xff] }
 0x1b0   : > { %2396 = vmatprep.subr.bf16.mxu0 %v8585_v25 }
 0x1b2   : > { %2284 = vmatpush1.bf16.msra.mxu1 %v8580_v26 }
 0x1b3   : > { %2397 = vmatpush1.bf16.msra.mxu0 %v8583_v27  ;;  %2285 = vmatprep.subr.bf16.mxu1 %v8588_v28  ;;  %v540_v27 = vld [vmem:[#allocation2 + $0x78] sm:$0xff] }
 0x1b4   : > { %2398 = vmatprep.subr.bf16.mxu0 %v8591_v29 }
 0x1b6   : > { %2286 = vmatpush1.bf16.msra.mxu1 %v8586_v30 }
 0x1b7   : > { %2399 = vmatpush1.bf16.msra.mxu0 %v8589_v31  ;;  %2287 = vmatprep.subr.bf16.mxu1 %v8594_v32 }
 0x1b8   : > { %2400 = vmatprep.subr.bf16.mxu0 %v8597_v33  ;;  %v527_v33 = vld [vmem:[#allocation2 + $0x10] sm:$0xff] }
 0x1ba   : > { %2288 = vmatpush1.bf16.msra.mxu1 %v8592_v34  ;;  %v528_v34 = vld [vmem:[#allocation2 + $0x18] sm:$0xff] }
 0x1bb   : > { %2401 = vmatpush1.bf16.msra.mxu0 %v8595_v35  ;;  %2289 = vmatprep.subr.bf16.mxu1 %v8600_v36  ;;  %v537_v36 = vld [vmem:[#allocation2 + $0x60] sm:$0xff] }
 0x1bc   : > { %2402 = vmatprep.subr.bf16.mxu0 %v8603_v37 }
 0x1be   : > { %2290 = vmatpush1.bf16.msra.mxu1 %v8598_v38 }
 0x1bf   : > { %2403 = vmatpush1.bf16.msra.mxu0 %v8601_v39  ;;  %2291 = vmatprep.subr.bf16.mxu1 %v8606_v41  ;;  %v538_v39 = vld [vmem:[#allocation2 + $0x68] sm:$0xff] }
 0x1c0   : > { %2404 = vmatprep.subr.bf16.mxu0 %v8609_v42 }
 0x1c2   : > { %2292 = vmatpush1.bf16.msra.mxu1 %v8604_v43 }
 0x1c3   : > { %2405 = vmatpush1.bf16.msra.mxu0 %v8607_v44  ;;  %2293 = vmatprep.subr.bf16.mxu1 %v8612_v45 }
 0x1c4   : > { %2406 = vmatprep.subr.bf16.mxu0 %v8615_v46  ;;  %v533_v46 = vld [vmem:[#allocation2 + $0x40] sm:$0xff] }
 0x1c6   : > { %2294 = vmatpush1.bf16.msra.mxu1 %v8610_v47  ;;  %v534_v47 = vld [vmem:[#allocation2 + $0x48] sm:$0xff] }
 0x1c7   : > { %2407 = vmatpush1.bf16.msra.mxu0 %v8613_v48  ;;  %2306 = vmatprep.subr.bf16.mxu1 %v8618_v49  ;;  %v543_v49 = vld [vmem:[#allocation2 + $0x90] sm:$0xff] }
 0x1c9   : > { %2296 = vmatmul.mubr.bf16.vlgmr.msra.gmra.mrb[8].mxu1 %v9889_v11  ;;  %v8628_v11 = vld [vmem:[%s9779_s0 + $0x658] ss:$40 sps:$4 sm:$0xff]  }
 0x1ca   : > { %2425 = vmatmul.mubr.bf16.vlgmr.msra.gmra.mrb[8].mxu0 %v8640_v52  ;;  %2307 = vmatpush1.bf16.msra.mxu1 %v8616_v50 }
 0x1cb   : > { %2338 = vmatprep.mubr.bf16.mxu1 %v9454_v7  ;;  %2308 = vmatprep.subr.bf16.mxu1 %v8621_v51  ;;  %v8631_v7 = vld [vmem:[%s9779_s0 + $0x6a8] ss:$40 sps:$4 sm:$0xff]  }
 0x1ce   : > { %2309 = vmatpush1.bf16.msra.mxu1 %v8619_v53 }
 0x1cf   : > { %2310 = vmatprep.subr.bf16.mxu1 %v8624_v54 }
 0x1d2   : > { %2311 = vmatpush1.bf16.msra.mxu1 %v8622_v55 }
 0x1d3   : > { %2312 = vmatprep.subr.bf16.mxu1 %v8627_v57 }
 0x1d6   : > { %2313 = vmatpush1.bf16.msra.mxu1 %v8625_v58 }
 0x1d7   : > { %2314 = vmatprep.subr.bf16.mxu1 %v8630_v40  ;;  %v531_v40 = vld [vmem:[#allocation2 + $0x30] sm:$0xff] }
 0x1da   : > { %2315 = vmatpush1.bf16.msra.mxu1 %v8628_v11  ;;  %v532_v11 = vld [vmem:[#allocation2 + $0x38] sm:$0xff] }
 0x1db   : > { %2316 = vmatprep.subr.bf16.mxu1 %v8633_v59 }
 0x1dd   : > { %v2082_v61 = vpop.f32.mrb[0].mxu0 }
 0x1de   : > { %v2084_v62 = vpop.f32.mrb[1].mxu0  ;;  %2317 = vmatpush1.bf16.msra.mxu1 %v8631_v7  ;;  %v541_v7 = vld [vmem:[#allocation2 + $0x80] sm:$0xff] }
 0x1df   : > { %v2086_v63 = vpop.f32.mrb[2].mxu0  ;;  %2318 = vmatprep.subr.bf16.mxu1 %v8636_v60 }
 0x1e0   : > { %v2088_v1 = vpop.f32.mrb[3].mxu0 }
 0x1e2   : > { %2319 = vmatpush1.bf16.msra.mxu1 %v8634_v56 }
 0x1e3   : > { %2320 = vmatprep.subr.bf16.mxu1 %v8639_v0 }
 0x1e6   : > { %2321 = vmatpush1.bf16.msra.mxu1 %v8637_v2 }
 0x1e9   : > { %2339 = vmatmul.mubr.bf16.vlgmr.msra.gmra.mrb[8].mxu1 %v8640_v52  ;;  %v544_v52 = vld [vmem:[#allocation2 + $0x98] sm:$0xff] }
 0x1fc   : > { %v2039_v4 = vpop.f32.mrb[0].mxu1 }
 0x1fd   : > { %v2083_v5 = vadd.f32 %v2082_v61, %v2039_v4  ;;  %v2041_v8 = vpop.f32.mrb[1].mxu1  ;;  %v8643_v4 = vld [vmem:[%s9794_s15 + $0xc] ss:$16 sps:$4 sm:$0xff] (!%p7478_p12)  }
 0x1fe   : > { %v2085_v9 = vadd.f32 %v2084_v62, %v2041_v8  ;;  %v2043_v12 = vpop.f32.mrb[2].mxu1  ;;  %v542_v62 = vld [vmem:[#allocation2 + $0x88] sm:$0xff]  ;;  %4880 = vmatprep.subr.bf16.mxu1 (!%p7478_p12), %v8643_v4 }
 0x1ff   : > { %v2435_v13 = vadd.f32 %v2083_v5, %v525_v3  ;;  %v2087_v14 = vadd.f32 %v2086_v63, %v2043_v12  ;;  %v2045_v16 = vpop.f32.mrb[3].mxu1  ;;  %v8641_v3 = vld [vmem:[%s9794_s15 + $0x4] ss:$16 sps:$4 sm:$0xff] (!%p7478_p12)   ;;  %v8645_v5 = vld [vmem:[%s9794_s15] ss:$16 sps:$4 sm:$0xff] (!%p7478_p12)  }
 0x200   : > { %v2436_v17 = vadd.f32 %v2085_v9, %v526_v6  ;;  %v2089_v18 = vadd.f32 %v2088_v1, %v2045_v16  ;;  %4665 = vmatprep.subr.bf16.mxu0 (!%p7478_p12), %v8641_v3  ;;  %v8646_v6 = vld [vmem:[%s9794_s15 + $0x8] ss:$16 sps:$4 sm:$0xff] (!%p7478_p12)   ;;  %v8647_v8 = vld [vmem:[%s9794_s15 + $0x24] ss:$16 sps:$4 sm:$0xff] (!%p7478_p12)   ;;  %v8649_v9 = vld [vmem:[%s9794_s15 + $0x2c] ss:$16 sps:$4 sm:$0xff] (!%p7478_p12)  }
 0x201   : > { %2455 = vst [vmem:[#allocation2] sm:$0xff] %v2435_v13  ;;  %v2445_v19 = vadd.f32 %v2087_v14, %v535_v10  ;;  %4666 = vmatpush1.bf16.msra.mxu0 (!%p7478_p12), %v8645_v5  ;;  %4881 = vmatpush1.bf16.msra.mxu1 (!%p7478_p12), %v8646_v6  ;;  %v8651_v10 = vld [vmem:[%s9794_s15 + $0x20] ss:$16 sps:$4 sm:$0xff] (!%p7478_p12)   ;;  %v8652_v12 = vld [vmem:[%s9794_s15 + $0x28] ss:$16 sps:$4 sm:$0xff] (!%p7478_p12)  }
 0x202   : > { %2456 = vst [vmem:[#allocation2 + $0x8] sm:$0xff] %v2436_v17  ;;  %v2446_v20 = vadd.f32 %v2089_v18, %v536_v15  ;;  %4667 = vmatprep.subr.bf16.mxu0 (!%p7478_p12), %v8647_v8  ;;  %4882 = vmatprep.subr.bf16.mxu1 (!%p7478_p12), %v8649_v9  ;;  %v8653_v13 = vld [vmem:[%s9794_s15 + $0x44] ss:$16 sps:$4 sm:$0xff] (!%p7478_p12)   ;;  %v8655_v14 = vld [vmem:[%s9794_s15 + $0x4c] ss:$16 sps:$4 sm:$0xff] (!%p7478_p12)  }
 0x203   : > { %2465 = vst [vmem:[#allocation2 + $0x50] sm:$0xff] %v2445_v19  ;;  %v8657_v15 = vld [vmem:[%s9794_s15 + $0x40] ss:$16 sps:$4 sm:$0xff] (!%p7478_p12)   ;;  %v8658_v16 = vld [vmem:[%s9794_s15 + $0x48] ss:$16 sps:$4 sm:$0xff] (!%p7478_p12)  }
 0x204   : > { %2466 = vst [vmem:[#allocation2 + $0x58] sm:$0xff] %v2446_v20  ;;  %v8659_v17 = vld [vmem:[%s9794_s15 + $0x64] ss:$16 sps:$4 sm:$0xff] (!%p7478_p12)   ;;  %v8661_v18 = vld [vmem:[%s9794_s15 + $0x6c] ss:$16 sps:$4 sm:$0xff] (!%p7478_p12)  }
 0x205   : > { %4668 = vmatpush1.bf16.msra.mxu0 (!%p7478_p12), %v8651_v10  ;;  %4883 = vmatpush1.bf16.msra.mxu1 (!%p7478_p12), %v8652_v12  ;;  %v8663_v19 = vld [vmem:[%s9794_s15 + $0x60] ss:$16 sps:$4 sm:$0xff] (!%p7478_p12)   ;;  %v8664_v20 = vld [vmem:[%s9794_s15 + $0x68] ss:$16 sps:$4 sm:$0xff] (!%p7478_p12)   ;;  %v8719_v4 = vld [vmem:[%s9794_s15 + $0x1a4] ss:$16 sps:$4 sm:$0xff] (!%p7478_p12)  }
 0x206   : > { %4669 = vmatprep.subr.bf16.mxu0 (!%p7478_p12), %v8653_v13  ;;  %4884 = vmatprep.subr.bf16.mxu1 (!%p7478_p12), %v8655_v14  ;;  %v8721_v8 = vld [vmem:[%s9794_s15 + $0x1ac] ss:$16 sps:$4 sm:$0xff] (!%p7478_p12)   ;;  %v8723_v14 = vld [vmem:[%s9794_s15 + $0x1a0] ss:$16 sps:$4 sm:$0xff] (!%p7478_p12)  }
 0x209   : > { %4670 = vmatpush1.bf16.msra.mxu0 (!%p7478_p12), %v8657_v15  ;;  %4885 = vmatpush1.bf16.msra.mxu1 (!%p7478_p12), %v8658_v16  ;;  %v8724_v15 = vld [vmem:[%s9794_s15 + $0x1a8] ss:$16 sps:$4 sm:$0xff] (!%p7478_p12)   ;;  %v8725_v16 = vld [vmem:[%s9794_s15 + $0x1c4] ss:$16 sps:$4 sm:$0xff] (!%p7478_p12)  }
 0x20a   : > { %4671 = vmatprep.subr.bf16.mxu0 (!%p7478_p12), %v8659_v17  ;;  %4886 = vmatprep.subr.bf16.mxu1 (!%p7478_p12), %v8661_v18  ;;  %v2489_v3 = vld [vmem:[#allocation2 + $0x50] sm:$0xff] (!%p7478_p12) }
 0x20b   : > { %v8727_v17 = vld [vmem:[%s9794_s15 + $0x1cc] ss:$16 sps:$4 sm:$0xff] (!%p7478_p12)   ;;  %v8729_v18 = vld [vmem:[%s9794_s15 + $0x1c0] ss:$16 sps:$4 sm:$0xff] (!%p7478_p12)  }
 0x20d   : > { %4672 = vmatpush1.bf16.msra.mxu0 (!%p7478_p12), %v8663_v19  ;;  %4887 = vmatpush1.bf16.msra.mxu1 (!%p7478_p12), %v8664_v20  ;;  %v8730_v19 = vld [vmem:[%s9794_s15 + $0x1c8] ss:$16 sps:$4 sm:$0xff] (!%p7478_p12)   ;;  %v8731_v20 = vld [vmem:[%s9794_s15 + $0x1e4] ss:$16 sps:$4 sm:$0xff] (!%p7478_p12)  }
 0x23d   : > { %v2254_v23 = vpop.f32.mrb[4].mxu0 }
 0x23e   : > { %v2439_v25 = vadd.f32 %v2254_v23, %v529_v21  ;;  %v2256_v26 = vpop.f32.mrb[5].mxu0  ;;  %v8665_v21 = vld [vmem:[%s9794_s15 + $0x84] ss:$16 sps:$4 sm:$0xff] (!%p7478_p12)   ;;  %v8669_v23 = vld [vmem:[%s9794_s15 + $0x80] ss:$16 sps:$4 sm:$0xff] (!%p7478_p12)  }
 0x23f   : > { %v2440_v28 = vadd.f32 %v2256_v26, %v530_v22  ;;  %v2258_v29 = vpop.f32.mrb[6].mxu0  ;;  %v8667_v22 = vld [vmem:[%s9794_s15 + $0x8c] ss:$16 sps:$4 sm:$0xff] (!%p7478_p12)   ;;  %4673 = vmatprep.subr.bf16.mxu0 (!%p7478_p12), %v8665_v21 }
 0x240   : > { %2459 = vst [vmem:[#allocation2 + $0x20] sm:$0xff] %v2439_v25  ;;  %v2449_v30 = vadd.f32 %v2258_v29, %v539_v24  ;;  %v2260_v31 = vpop.f32.mrb[7].mxu0  ;;  %v8670_v24 = vld [vmem:[%s9794_s15 + $0x88] ss:$16 sps:$4 sm:$0xff] (!%p7478_p12)   ;;  %v8671_v25 = vld [vmem:[%s9794_s15 + $0xa4] ss:$16 sps:$4 sm:$0xff] (!%p7478_p12)   ;;  %4888 = vmatprep.subr.bf16.mxu1 (!%p7478_p12), %v8667_v22  ;;  %4674 = vmatpush1.bf16.msra.mxu0 (!%p7478_p12), %v8669_v23 }
 0x241   : > { %2460 = vst [vmem:[#allocation2 + $0x28] sm:$0xff] %v2440_v28  ;;  %v2450_v32 = vadd.f32 %v2260_v31, %v540_v27  ;;  %v8673_v26 = vld [vmem:[%s9794_s15 + $0xac] ss:$16 sps:$4 sm:$0xff] (!%p7478_p12)   ;;  %v8675_v27 = vld [vmem:[%s9794_s15 + $0xa0] ss:$16 sps:$4 sm:$0xff] (!%p7478_p12)   ;;  %4889 = vmatpush1.bf16.msra.mxu1 (!%p7478_p12), %v8670_v24  ;;  %4675 = vmatprep.subr.bf16.mxu0 (!%p7478_p12), %v8671_v25 }
 0x242   : > { %2469 = vst [vmem:[#allocation2 + $0x70] sm:$0xff] %v2449_v30  ;;  %v8676_v28 = vld [vmem:[%s9794_s15 + $0xa8] ss:$16 sps:$4 sm:$0xff] (!%p7478_p12)   ;;  %v8677_v29 = vld [vmem:[%s9794_s15 + $0xc4] ss:$16 sps:$4 sm:$0xff] (!%p7478_p12)   ;;  %4890 = vmatprep.subr.bf16.mxu1 (!%p7478_p12), %v8673_v26 }
 0x243   : > { %2470 = vst [vmem:[#allocation2 + $0x78] sm:$0xff] %v2450_v32  ;;  %v8679_v30 = vld [vmem:[%s9794_s15 + $0xcc] ss:$16 sps:$4 sm:$0xff] (!%p7478_p12)   ;;  %v8681_v31 = vld [vmem:[%s9794_s15 + $0xc0] ss:$16 sps:$4 sm:$0xff] (!%p7478_p12)  }
 0x244   : > { %v8682_v32 = vld [vmem:[%s9794_s15 + $0xc8] ss:$16 sps:$4 sm:$0xff] (!%p7478_p12)   ;;  %4676 = vmatpush1.bf16.msra.mxu0 (!%p7478_p12), %v8675_v27  ;;  %v8733_v21 = vld [vmem:[%s9794_s15 + $0x1ec] ss:$16 sps:$4 sm:$0xff] (!%p7478_p12)   ;;  %v8735_v22 = vld [vmem:[%s9794_s15 + $0x1e0] ss:$16 sps:$4 sm:$0xff] (!%p7478_p12)  }
 0x245   : > { %4891 = vmatpush1.bf16.msra.mxu1 (!%p7478_p12), %v8676_v28  ;;  %4677 = vmatprep.subr.bf16.mxu0 (!%p7478_p12), %v8677_v29  ;;  %v8736_v23 = vld [vmem:[%s9794_s15 + $0x1e8] ss:$16 sps:$4 sm:$0xff] (!%p7478_p12)   ;;  %v8739_v25 = vld [vmem:[%s9794_s15 + $0x204] ss:$16 sps:$4 sm:$0xff] (!%p7478_p12)   ;;  %v8742_v28 = vld [vmem:[%s9794_s15 + $0x20c] ss:$16 sps:$4 sm:$0xff] (!%p7478_p12)  }
 0x246   : > { %4892 = vmatprep.subr.bf16.mxu1 (!%p7478_p12), %v8679_v30 }
 0x248   : > { %4678 = vmatpush1.bf16.msra.mxu0 (!%p7478_p12), %v8681_v31 }
 0x249   : > { %4893 = vmatpush1.bf16.msra.mxu1 (!%p7478_p12), %v8682_v32 }
 0x25c   : > { %v2168_v35 = vpop.f32.mrb[4].mxu1 }
 0x25d   : > { %v2437_v37 = vadd.f32 %v2168_v35, %v527_v33  ;;  %v2170_v38 = vpop.f32.mrb[5].mxu1  ;;  %v8683_v33 = vld [vmem:[%s9794_s15 + $0xe4] ss:$16 sps:$4 sm:$0xff] (!%p7478_p12)   ;;  %v8687_v35 = vld [vmem:[%s9794_s15 + $0xe0] ss:$16 sps:$4 sm:$0xff] (!%p7478_p12)  }
 0x25e   : > { %v2438_v41 = vadd.f32 %v2170_v38, %v528_v34  ;;  %v2172_v42 = vpop.f32.mrb[6].mxu1  ;;  %v8685_v34 = vld [vmem:[%s9794_s15 + $0xec] ss:$16 sps:$4 sm:$0xff] (!%p7478_p12)   ;;  %4679 = vmatprep.subr.bf16.mxu0 (!%p7478_p12), %v8683_v33 }
 0x25f   : > { %2457 = vst [vmem:[#allocation2 + $0x10] sm:$0xff] %v2437_v37  ;;  %v2447_v43 = vadd.f32 %v2172_v42, %v537_v36  ;;  %v2174_v44 = vpop.f32.mrb[7].mxu1  ;;  %v8688_v36 = vld [vmem:[%s9794_s15 + $0xe8] ss:$16 sps:$4 sm:$0xff] (!%p7478_p12)   ;;  %v8689_v37 = vld [vmem:[%s9794_s15 + $0x104] ss:$16 sps:$4 sm:$0xff] (!%p7478_p12)   ;;  %4894 = vmatprep.subr.bf16.mxu1 (!%p7478_p12), %v8685_v34  ;;  %4680 = vmatpush1.bf16.msra.mxu0 (!%p7478_p12), %v8687_v35 }
 0x260   : > { %2458 = vst [vmem:[#allocation2 + $0x18] sm:$0xff] %v2438_v41  ;;  %v2448_v45 = vadd.f32 %v2174_v44, %v538_v39  ;;  %v8691_v38 = vld [vmem:[%s9794_s15 + $0x10c] ss:$16 sps:$4 sm:$0xff] (!%p7478_p12)   ;;  %v8693_v39 = vld [vmem:[%s9794_s15 + $0x100] ss:$16 sps:$4 sm:$0xff] (!%p7478_p12)   ;;  %4895 = vmatpush1.bf16.msra.mxu1 (!%p7478_p12), %v8688_v36  ;;  %4681 = vmatprep.subr.bf16.mxu0 (!%p7478_p12), %v8689_v37 }
 0x261   : > { %2467 = vst [vmem:[#allocation2 + $0x60] sm:$0xff] %v2447_v43  ;;  %v8694_v41 = vld [vmem:[%s9794_s15 + $0x108] ss:$16 sps:$4 sm:$0xff] (!%p7478_p12)   ;;  %v8695_v42 = vld [vmem:[%s9794_s15 + $0x124] ss:$16 sps:$4 sm:$0xff] (!%p7478_p12)   ;;  %v2503_v43 = vlaneseq (!%p7478_p12)  ;;  %4896 = vmatprep.subr.bf16.mxu1 (!%p7478_p12), %v8691_v38 }
 0x262   : > { %2468 = vst [vmem:[#allocation2 + $0x68] sm:$0xff] %v2448_v45  ;;  %v8697_v44 = vld [vmem:[%s9794_s15 + $0x12c] ss:$16 sps:$4 sm:$0xff] (!%p7478_p12)   ;;  %v8699_v45 = vld [vmem:[%s9794_s15 + $0x120] ss:$16 sps:$4 sm:$0xff] (!%p7478_p12)  }
 0x263   : > { %4682 = vmatpush1.bf16.msra.mxu0 (!%p7478_p12), %v8693_v39 }
 0x264   : > { %4897 = vmatpush1.bf16.msra.mxu1 (!%p7478_p12), %v8694_v41  ;;  %4683 = vmatprep.subr.bf16.mxu0 (!%p7478_p12), %v8695_v42 }
 0x265   : > { %4898 = vmatprep.subr.bf16.mxu1 (!%p7478_p12), %v8697_v44  ;;  %v8737_v44 = vld [vmem:[%s9794_s15 + $0x200] ss:$16 sps:$4 sm:$0xff] (!%p7478_p12)  }
 0x267   : > { %4684 = vmatpush1.bf16.msra.mxu0 (!%p7478_p12), %v8699_v45  ;;  %v8740_v45 = vld [vmem:[%s9794_s15 + $0x208] ss:$16 sps:$4 sm:$0xff] (!%p7478_p12)  }
 0x29d   : > { %v2426_v48 = vpop.f32.mrb[8].mxu0 }
 0x29e   : > { %v2443_v50 = vadd.f32 %v2426_v48, %v533_v46  ;;  %v2428_v51 = vpop.f32.mrb[9].mxu0  ;;  %v8700_v46 = vld [vmem:[%s9794_s15 + $0x128] ss:$16 sps:$4 sm:$0xff] (!%p7478_p12)   ;;  %v10122_v48 = vshrl.u32 (!%p7478_p12), %v2503_v43, 7 }
 0x29f   : > { %v2444_v53 = vadd.f32 %v2428_v51, %v534_v47  ;;  %v2430_v54 = vpop.f32.mrb[10].mxu0  ;;  %v8701_v47 = vld [vmem:[%s9794_s15 + $0x144] ss:$16 sps:$4 sm:$0xff] (!%p7478_p12)   ;;  %v8706_v51 = vld [vmem:[%s9794_s15 + $0x148] ss:$16 sps:$4 sm:$0xff] (!%p7478_p12)   ;;  %4899 = vmatpush1.bf16.msra.mxu1 (!%p7478_p12), %v8700_v46 }
 0x2a0   : > { %2463 = vst [vmem:[#allocation2 + $0x40] sm:$0xff] %v2443_v50  ;;  %v2453_v55 = vadd.f32 %v2430_v54, %v543_v49  ;;  %v2432_v57 = vpop.f32.mrb[11].mxu0  ;;  %v8703_v49 = vld [vmem:[%s9794_s15 + $0x14c] ss:$16 sps:$4 sm:$0xff] (!%p7478_p12)   ;;  %v8705_v50 = vld [vmem:[%s9794_s15 + $0x140] ss:$16 sps:$4 sm:$0xff] (!%p7478_p12)   ;;  %4685 = vmatprep.subr.bf16.mxu0 (!%p7478_p12), %v8701_v47 }
 0x2a1   : > { %2464 = vst [vmem:[#allocation2 + $0x48] sm:$0xff] %v2444_v53  ;;  %v2454_v58 = vadd.f32 %v2432_v57, %v544_v52  ;;  %v8707_v52 = vld [vmem:[%s9794_s15 + $0x164] ss:$16 sps:$4 sm:$0xff] (!%p7478_p12)   ;;  %v10129_v53 = vsub.s32 (!%p7478_p12), 1, %v10122_v48  ;;  %v10132_v54 = vsub.s32 (!%p7478_p12), 0, %v10122_v48  ;;  %4900 = vmatprep.subr.bf16.mxu1 (!%p7478_p12), %v8703_v49  ;;  %4686 = vmatpush1.bf16.msra.mxu0 (!%p7478_p12), %v8705_v50  ;;  %v2517_v50 = vsub.s32 (!%p7478_p12), 3, %v10122_v48 }
 0x2a2   : > { %2473 = vst [vmem:[#allocation2 + $0x90] sm:$0xff] %v2453_v55  ;;  %v8709_v55 = vld [vmem:[%s9794_s15 + $0x16c] ss:$16 sps:$4 sm:$0xff] (!%p7478_p12)   ;;  %v8711_v57 = vld [vmem:[%s9794_s15 + $0x160] ss:$16 sps:$4 sm:$0xff] (!%p7478_p12)   ;;  %4687 = vmatprep.subr.bf16.mxu0 (!%p7478_p12), %v8707_v52 }
 0x2a3   : > { %2474 = vst [vmem:[#allocation2 + $0x98] sm:$0xff] %v2454_v58  ;;  %v2480_v58 = vld [vmem:[#allocation2 + $0x8] sm:$0xff] (!%p7478_p12)  ;;  %4901 = vmatpush1.bf16.msra.mxu1 (!%p7478_p12), %v8706_v51  ;;  %v8748_v49 = vld [vmem:[%s9794_s15 + $0x22c] ss:$16 sps:$4 sm:$0xff] (!%p7478_p12)   ;;  %v8743_v51 = vld [vmem:[%s9794_s15 + $0x220] ss:$16 sps:$4 sm:$0xff] (!%p7478_p12)  }
 0x2a4   : > { %4902 = vmatprep.subr.bf16.mxu1 (!%p7478_p12), %v8709_v55  ;;  %v8745_v47 = vld [vmem:[%s9794_s15 + $0x224] ss:$16 sps:$4 sm:$0xff] (!%p7478_p12)   ;;  %v8746_v52 = vld [vmem:[%s9794_s15 + $0x228] ss:$16 sps:$4 sm:$0xff] (!%p7478_p12)  }
 0x2a5   : > { %4688 = vmatpush1.bf16.msra.mxu0 (!%p7478_p12), %v8711_v57  ;;  %v8751_v55 = vld [vmem:[%s9794_s15 + $0x244] ss:$16 sps:$4 sm:$0xff] (!%p7478_p12)   ;;  %v8754_v57 = vld [vmem:[%s9794_s15 + $0x24c] ss:$16 sps:$4 sm:$0xff] (!%p7478_p12)  }
 0x2bc   : > { %v2340_v59 = vpop.f32.mrb[8].mxu1  ;;  %2478 = sbr.rel (%p7478_p12) target bundleno = 1630 (0x65e), region = 98 }
 0x2bd   : > { %v2441_v60 = vadd.f32 %v2340_v59, %v531_v40  ;;  %v2342_v61 = vpop.f32.mrb[9].mxu1  ;;  %v2490_v40 = vld [vmem:[#allocation2 + $0x58] sm:$0xff] (!%p7478_p12) }
 0x2be   : > { %v2442_v56 = vadd.f32 %v2342_v61, %v532_v11  ;;  %v2344_v63 = vpop.f32.mrb[10].mxu1  ;;  %v10137_v11 = vld [vmem:[%s9788_s20] sm:$0xff] (!%p7478_p12) }
 0x2bf   : > { %2461 = vst [vmem:[#allocation2 + $0x30] sm:$0xff] %v2441_v60  ;;  %v2451_v0 = vadd.f32 %v2344_v63, %v541_v7  ;;  %v2346_v1 = vpop.f32.mrb[11].mxu1  ;;  %v8712_v59 = vld [vmem:[%s9794_s15 + $0x168] ss:$16 sps:$4 sm:$0xff] (!%p7478_p12)   ;;  %v8713_v7 = vld [vmem:[%s9794_s15 + $0x184] ss:$16 sps:$4 sm:$0xff] (!%p7478_p12)   ;;  %v2510_v60 = vrot.slane (!%p7478_p12), %v10137_v11, %v10129_v53  ;;  %v2506_v61 = vrot.slane (!%p7478_p12), %v10137_v11, %v10132_v54 }
 0x2c0   : > { %2462 = vst [vmem:[#allocation2 + $0x38] sm:$0xff] %v2442_v56  ;;  %v2452_v2 = vadd.f32 %v2346_v1, %v542_v62  ;;  %v8715_v62 = vld [vmem:[%s9794_s15 + $0x18c] ss:$16 sps:$4 sm:$0xff] (!%p7478_p12)   ;;  %v8717_v56 = vld [vmem:[%s9794_s15 + $0x180] ss:$16 sps:$4 sm:$0xff] (!%p7478_p12)   ;;  %4903 = vmatpush1.bf16.msra.mxu1 (!%p7478_p12), %v8712_v59  ;;  %4689 = vmatprep.subr.bf16.mxu0 (!%p7478_p12), %v8713_v7 }
 0x2c1   : > { %2471 = vst [vmem:[#allocation2 + $0x80] sm:$0xff] %v2451_v0  ;;  %v8718_v63 = vld [vmem:[%s9794_s15 + $0x188] ss:$16 sps:$4 sm:$0xff] (!%p7478_p12)   ;;  %v2554_v0 = vadd.f32 (!%p7478_p12), %v2510_v60, %v2480_v58  ;;  %v10148_v1 = vadd.f32 (!%p7478_p12), %v2510_v60, %v2490_v40  ;;  %v2563_v6 = vadd.f32 (!%p7478_p12), %v2506_v61, %v2489_v3  ;;  %4904 = vmatprep.subr.bf16.mxu1 (!%p7478_p12), %v8715_v62  ;;  %v8749_v40 = vld [vmem:[%s9794_s15 + $0x240] ss:$16 sps:$4 sm:$0xff] (!%p7478_p12)  }
 0x2c2   : > { %2472 = vst [vmem:[#allocation2 + $0x88] sm:$0xff] %v2452_v2  ;;  %v2479_v2 = vld [vmem:[#allocation2] sm:$0xff] (!%p7478_p12)  ;;  %4690 = vmatpush1.bf16.msra.mxu0 (!%p7478_p12), %v8717_v56  ;;  %v2518_v58 = vrot.slane (!%p7478_p12), %v10137_v11, %v2517_v50  ;;  %v8752_v59 = vld [vmem:[%s9794_s15 + $0x248] ss:$16 sps:$4 sm:$0xff] (!%p7478_p12)   ;;  %v8757_v7 = vld [vmem:[%s9794_s15 + $0x264] ss:$16 sps:$4 sm:$0xff] (!%p7478_p12)  }
 0x2c3   : > { %v2553_v5 = vadd.f32 %v2506_v61, %v2479_v2  ;;  %v7480_v9 = vmul.f32 -1.442695, %v2554_v0  ;;  %v7490_v10 = vmul.f32 -1.442695, %v10148_v1  ;;  %v7489_v13 = vmul.f32 -1.442695, %v2563_v6  ;;  %4691 = vmatprep.subr.bf16.mxu0 %v8719_v4 }
 0x2c4   : > { %4905 = vmatpush1.bf16.msra.mxu1 %v8718_v63  ;;  %v8760_v60 = vld [vmem:[%s9794_s15 + $0x26c] ss:$16 sps:$4 sm:$0xff]   ;;  %v2482_v61 = vld [vmem:[#allocation2 + $0x18] sm:$0xff]  ;;  %v2492_v62 = vld [vmem:[#allocation2 + $0x68] sm:$0xff]  ;;  %v2513_v56 = vsub.s32 2, %v10122_v48 }
 0x2c5   : > { %v7479_v12 = vmul.f32 -1.442695, %v2553_v5  ;;  %9121 = vpow2.f32 %v7480_v9  ;;  %4906 = vmatprep.subr.bf16.mxu1 %v8721_v8  ;;  %v8755_v63 = vld [vmem:[%s9794_s15 + $0x260] ss:$16 sps:$4 sm:$0xff]   ;;  %v10187_v2 = vadd.f32 %v2518_v58, %v2492_v62  ;;  %v8763_v3 = vld [vmem:[%s9794_s15 + $0x284] ss:$16 sps:$4 sm:$0xff]  }
 0x2c6   : > { %9123 = vpow2.f32 %v7490_v10  ;;  %4692 = vmatpush1.bf16.msra.mxu0 %v8723_v14  ;;  %v8766_v4 = vld [vmem:[%s9794_s15 + $0x28c] ss:$16 sps:$4 sm:$0xff]   ;;  %v8761_v8 = vld [vmem:[%s9794_s15 + $0x280] ss:$16 sps:$4 sm:$0xff]   ;;  %v2514_v9 = vrot.slane %v10137_v11, %v2513_v56  ;;  %v8764_v10 = vld [vmem:[%s9794_s15 + $0x288] ss:$16 sps:$4 sm:$0xff]  }
 0x2c7   : > { %9125 = vpow2.f32 %v7479_v12  ;;  %4693 = vmatprep.subr.bf16.mxu0 %v8725_v16  ;;  %v2481_v12 = vld [vmem:[#allocation2 + $0x10] sm:$0xff]  ;;  %v8769_v14 = vld [vmem:[%s9794_s15 + $0x2a4] ss:$16 sps:$4 sm:$0xff]   ;;  %v8806_v62 = vld [vmem:[%s9794_s15 + $0x368] ss:$16 sps:$4 sm:$0xff]  }
 0x2c8   : > { %9127 = vpow2.f32 %v7489_v13  ;;  %4907 = vmatpush1.bf16.msra.mxu1 %v8724_v15  ;;  %v2491_v13 = vld [vmem:[#allocation2 + $0x60] sm:$0xff]  ;;  %v10200_v16 = vadd.f32 %v2514_v9, %v2481_v12 }
 0x2c9   : > { %4908 = vmatprep.subr.bf16.mxu1 %v8727_v17  ;;  %v8772_v15 = vld [vmem:[%s9794_s15 + $0x2ac] ss:$16 sps:$4 sm:$0xff]   ;;  %v10202_v17 = vadd.f32 %v2514_v9, %v2491_v13  ;;  %v8821_v13 = vld [vmem:[%s9794_s15 + $0x3c0] ss:$16 sps:$4 sm:$0xff]  }
 0x2ca   : > { %4694 = vmatpush1.bf16.msra.mxu0 %v8729_v18  ;;  %v8767_v18 = vld [vmem:[%s9794_s15 + $0x2a0] ss:$16 sps:$4 sm:$0xff]   ;;  %v8826_v12 = vld [vmem:[%s9794_s15 + $0x3cc] ss:$16 sps:$4 sm:$0xff]  }
 0x2cb   : > { %4695 = vmatprep.subr.bf16.mxu0 %v8731_v20  ;;  %v8775_v20 = vld [vmem:[%s9794_s15 + $0x2c4] ss:$16 sps:$4 sm:$0xff]  }
 0x2cc   : > { %4909 = vmatpush1.bf16.msra.mxu1 %v8730_v19  ;;  %v8770_v19 = vld [vmem:[%s9794_s15 + $0x2a8] ss:$16 sps:$4 sm:$0xff]  }
 0x2cd   : > { %4910 = vmatprep.subr.bf16.mxu1 %v8733_v21  ;;  %v8778_v21 = vld [vmem:[%s9794_s15 + $0x2cc] ss:$16 sps:$4 sm:$0xff]  }
 0x2ce   : > { %4696 = vmatpush1.bf16.msra.mxu0 %v8735_v22  ;;  %v7481_v22 = vmul.f32 -1.442695, %v10200_v16 }
 0x2cf   : > { %v9122_v24 = vpop.eup %9121  ;;  %4708 = vmatprep.subr.bf16.mxu0 %v8739_v25  ;;  %v8776_v25 = vld [vmem:[%s9794_s15 + $0x2c8] ss:$16 sps:$4 sm:$0xff]  }
 0x2d0   : > { %v9124_v26 = vpop.eup %9123  ;;  %v2634_v27 = vadd.f32 1.0, %v9122_v24  ;;  %4911 = vmatpush1.bf16.msra.mxu1 %v8736_v23  ;;  %v7491_v23 = vmul.f32 -1.442695, %v10202_v17  ;;  %v8773_v24 = vld [vmem:[%s9794_s15 + $0x2c0] ss:$16 sps:$4 sm:$0xff]  }
 0x2d1   : > { %v9126_v29 = vpop.eup %9125  ;;  %v2644_v30 = vadd.f32 1.0, %v9124_v26  ;;  %4923 = vmatprep.subr.bf16.mxu1 %v8742_v28  ;;  %v8784_v28 = vld [vmem:[%s9794_s15 + $0x2ec] ss:$16 sps:$4 sm:$0xff]  }
 0x2d2   : > { %v9128_v31 = vpop.eup %9127  ;;  %9129 = vrcp.f32 %v2634_v27  ;;  %v2633_v32 = vadd.f32 1.0, %v9126_v29  ;;  %v8781_v27 = vld [vmem:[%s9794_s15 + $0x2e4] ss:$16 sps:$4 sm:$0xff]  }
 0x2d3   : > { %9131 = vrcp.f32 %v2644_v30  ;;  %v2643_v33 = vadd.f32 1.0, %v9128_v31 }
 0x2d4   : > { %9133 = vrcp.f32 %v2633_v32  ;;  %v8779_v32 = vld [vmem:[%s9794_s15 + $0x2e0] ss:$16 sps:$4 sm:$0xff]  }
 0x2d5   : > { %9135 = vrcp.f32 %v2643_v33  ;;  %v8782_v33 = vld [vmem:[%s9794_s15 + $0x2e8] ss:$16 sps:$4 sm:$0xff]  }
 0x2dc   : > { %v9130_v34 = vpop.eup %9129 }
 0x2dd   : > { %v9132_v35 = vpop.eup %9131  ;;  %v2694_v36 = vmul.f32 %v9130_v34, %v2554_v0  ;;  %v8758_v0 = vld [vmem:[%s9794_s15 + $0x268] ss:$16 sps:$4 sm:$0xff]   ;;  %v8787_v34 = vld [vmem:[%s9794_s15 + $0x304] ss:$16 sps:$4 sm:$0xff]  }
 0x2de   : > { %v9134_v37 = vpop.eup %9133  ;;  %v2704_v38 = vmul.f32 %v9132_v35, %v10148_v1  ;;  %v10185_v1 = vadd.f32 %v2518_v58, %v2482_v61  ;;  %v8790_v35 = vld [vmem:[%s9794_s15 + $0x30c] ss:$16 sps:$4 sm:$0xff]   ;;  %v8805_v58 = vld [vmem:[%s9794_s15 + $0x364] ss:$16 sps:$4 sm:$0xff]   ;;  %v8803_v61 = vld [vmem:[%s9794_s15 + $0x360] ss:$16 sps:$4 sm:$0xff]  }
 0x2df   : > { %v9136_v39 = vpop.eup %9135  ;;  %v2693_v41 = vmul.f32 %v9134_v37, %v2553_v5  ;;  %v8788_v37 = vld [vmem:[%s9794_s15 + $0x308] ss:$16 sps:$4 sm:$0xff]  }
 0x2e0   : > { %v2714_v42 = vpack.c.bf16 %v2704_v38, %v2694_v36  ;;  %v2703_v43 = vmul.f32 %v9136_v39, %v2563_v6  ;;  %v7482_v5 = vmul.f32 -1.442695, %v10185_v1  ;;  %v7492_v6 = vmul.f32 -1.442695, %v10187_v2  ;;  %v8785_v36 = vld [vmem:[%s9794_s15 + $0x300] ss:$16 sps:$4 sm:$0xff]  }
 0x2e1   : > { %v8793_v38 = vld [vmem:[%s9794_s15 + $0x324] ss:$16 sps:$4 sm:$0xff]   ;;  %v8796_v39 = vld [vmem:[%s9794_s15 + $0x32c] ss:$16 sps:$4 sm:$0xff]  }
 0x2e2   : > { %4697 = vmatprep.mubr.bf16.mxu0 %v2714_v42  ;;  %4912 = vmatprep.mubr.bf16.mxu1 %v2714_v42  ;;  %v2713_v46 = vpack.c.bf16 %v2703_v43, %v2693_v41  ;;  %9137 = vpow2.f32 %v7482_v5  ;;  %v8791_v42 = vld [vmem:[%s9794_s15 + $0x320] ss:$16 sps:$4 sm:$0xff]   ;;  %v8794_v43 = vld [vmem:[%s9794_s15 + $0x328] ss:$16 sps:$4 sm:$0xff]   ;;  %v8820_v5 = vld [vmem:[%s9794_s15 + $0x3ac] ss:$16 sps:$4 sm:$0xff]  }
 0x2e3   : > { %9139 = vpow2.f32 %v7492_v6  ;;  %v8815_v6 = vld [vmem:[%s9794_s15 + $0x3a0] ss:$16 sps:$4 sm:$0xff]  }
 0x2e4   : > { %4698 = vmatmul.mubr.bf16.vlgmr.msra.gmra.mrb[0].mxu0 %v2713_v46  ;;  %4913 = vmatmul.mubr.bf16.vlgmr.msra.gmra.mrb[0].mxu1 %v2713_v46  ;;  %9141 = vpow2.f32 %v7481_v22  ;;  %v8802_v46 = vld [vmem:[%s9794_s15 + $0x34c] ss:$16 sps:$4 sm:$0xff]  }
 0x2e5   : > { %4709 = vmatpush1.bf16.msra.mxu0 %v8737_v44  ;;  %4924 = vmatpush1.bf16.msra.mxu1 %v8740_v45  ;;  %9143 = vpow2.f32 %v7491_v23  ;;  %v8799_v45 = vld [vmem:[%s9794_s15 + $0x344] ss:$16 sps:$4 sm:$0xff]  }
 0x2e6   : > { %4710 = vmatprep.subr.bf16.mxu0 %v8745_v47  ;;  %4925 = vmatprep.subr.bf16.mxu1 %v8748_v49 }
 0x2e9   : > { %4711 = vmatpush1.bf16.msra.mxu0 %v8743_v51  ;;  %4926 = vmatpush1.bf16.msra.mxu1 %v8746_v52  ;;  %v8797_v52 = vld [vmem:[%s9794_s15 + $0x340] ss:$16 sps:$4 sm:$0xff]  }
 0x2ea   : > { %4712 = vmatprep.subr.bf16.mxu0 %v8751_v55  ;;  %4927 = vmatprep.subr.bf16.mxu1 %v8754_v57  ;;  %v8800_v55 = vld [vmem:[%s9794_s15 + $0x348] ss:$16 sps:$4 sm:$0xff]  }
 0x2ec   : > { %v9138_v26 = vpop.eup %9137 }
 0x2ed   : > { %4713 = vmatpush1.bf16.msra.mxu0 %v8749_v40  ;;  %4928 = vmatpush1.bf16.msra.mxu1 %v8752_v59  ;;  %v9140_v29 = vpop.eup %9139  ;;  %v2636_v30 = vadd.f32 1.0, %v9138_v26  ;;  %v8808_v40 = vld [vmem:[%s9794_s15 + $0x36c] ss:$16 sps:$4 sm:$0xff]  }
 0x2ee   : > { %4714 = vmatprep.subr.bf16.mxu0 %v8757_v7  ;;  %4929 = vmatprep.subr.bf16.mxu1 %v8760_v60  ;;  %v2646_v31 = vadd.f32 1.0, %v9140_v29  ;;  %v9142_v41 = vpop.eup %9141 }
 0x2ef   : > { %9145 = vrcp.f32 %v2636_v30  ;;  %v9144_v44 = vpop.eup %9143  ;;  %v2635_v59 = vadd.f32 1.0, %v9142_v41 }
 0x2f0   : > { %9147 = vrcp.f32 %v2646_v31  ;;  %v2645_v60 = vadd.f32 1.0, %v9144_v44  ;;  %v8835_v31 = vld [vmem:[%s9794_s15 + $0x404] ss:$16 sps:$4 sm:$0xff]   ;;  %v8845_v44 = vld [vmem:[%s9794_s15 + $0x440] ss:$16 sps:$4 sm:$0xff]  }
 0x2f1   : > { %4715 = vmatpush1.bf16.msra.mxu0 %v8755_v63  ;;  %4930 = vmatpush1.bf16.msra.mxu1 %v8758_v0  ;;  %v8811_v63 = vld [vmem:[%s9794_s15 + $0x384] ss:$16 sps:$4 sm:$0xff]   ;;  %v8814_v0 = vld [vmem:[%s9794_s15 + $0x38c] ss:$16 sps:$4 sm:$0xff]   ;;  %9149 = vrcp.f32 %v2635_v59  ;;  %v8860_v59 = vld [vmem:[%s9794_s15 + $0x488] ss:$16 sps:$4 sm:$0xff]  }
 0x2f2   : > { %4716 = vmatprep.subr.bf16.mxu0 %v8763_v3  ;;  %4931 = vmatprep.subr.bf16.mxu1 %v8766_v4  ;;  %9151 = vrcp.f32 %v2645_v60  ;;  %v2525_v3 = vsub.s32 5, %v10122_v48  ;;  %v8817_v4 = vld [vmem:[%s9794_s15 + $0x3a4] ss:$16 sps:$4 sm:$0xff]  }
 0x2f4   : > { %v2526_v9 = vrot.slane %v10137_v11, %v2525_v3  ;;  %v8866_v3 = vld [vmem:[%s9794_s15 + $0x4a8] ss:$16 sps:$4 sm:$0xff]  }
 0x2f5   : > { %4717 = vmatpush1.bf16.msra.mxu0 %v8761_v8  ;;  %4932 = vmatpush1.bf16.msra.mxu1 %v8764_v10  ;;  %v8818_v8 = vld [vmem:[%s9794_s15 + $0x3a8] ss:$16 sps:$4 sm:$0xff]   ;;  %v8823_v10 = vld [vmem:[%s9794_s15 + $0x3c4] ss:$16 sps:$4 sm:$0xff]  }
 0x2f6   : > { %4718 = vmatprep.subr.bf16.mxu0 %v8769_v14  ;;  %4933 = vmatprep.subr.bf16.mxu1 %v8772_v15  ;;  %v8824_v15 = vld [vmem:[%s9794_s15 + $0x3c8] ss:$16 sps:$4 sm:$0xff]  }
 0x2f9   : > { %4719 = vmatpush1.bf16.msra.mxu0 %v8767_v18  ;;  %4934 = vmatpush1.bf16.msra.mxu1 %v8770_v19  ;;  %v9146_v47 = vpop.eup %9145  ;;  %v2484_v18 = vld [vmem:[#allocation2 + $0x28] sm:$0xff]  ;;  %v2494_v19 = vld [vmem:[#allocation2 + $0x78] sm:$0xff] }
 0x2fa   : > { %4720 = vmatprep.subr.bf16.mxu0 %v8775_v20  ;;  %4935 = vmatprep.subr.bf16.mxu1 %v8778_v21  ;;  %v9148_v49 = vpop.eup %9147  ;;  %v2696_v51 = vmul.f32 %v9146_v47, %v10185_v1  ;;  %v8809_v1 = vld [vmem:[%s9794_s15 + $0x380] ss:$16 sps:$4 sm:$0xff]   ;;  %v8829_v21 = vld [vmem:[%s9794_s15 + $0x3e4] ss:$16 sps:$4 sm:$0xff]   ;;  %v10249_v22 = vadd.f32 %v2526_v9, %v2484_v18  ;;  %v10251_v23 = vadd.f32 %v2526_v9, %v2494_v19  ;;  %v8880_v18 = vld [vmem:[%s9794_s15 + $0x4ec] ss:$16 sps:$4 sm:$0xff]  }
 0x2fb   : > { %v2706_v57 = vmul.f32 %v9148_v49, %v10187_v2  ;;  %v8812_v2 = vld [vmem:[%s9794_s15 + $0x388] ss:$16 sps:$4 sm:$0xff]   ;;  %v9150_v14 = vpop.eup %9149  ;;  %v8853_v47 = vld [vmem:[%s9794_s15 + $0x464] ss:$16 sps:$4 sm:$0xff]   ;;  %v8856_v49 = vld [vmem:[%s9794_s15 + $0x46c] ss:$16 sps:$4 sm:$0xff]  }
 0x2fc   : > { %v9152_v20 = vpop.eup %9151  ;;  %v7494_v26 = vmul.f32 -1.442695, %v10251_v23  ;;  %v2695_v29 = vmul.f32 %v9150_v14, %v10200_v16  ;;  %v8833_v16 = vld [vmem:[%s9794_s15 + $0x400] ss:$16 sps:$4 sm:$0xff]   ;;  %v8877_v14 = vld [vmem:[%s9794_s15 + $0x4e4] ss:$16 sps:$4 sm:$0xff]  }
 0x2fd   : > { %4721 = vmatpush1.bf16.msra.mxu0 %v8773_v24  ;;  %4936 = vmatpush1.bf16.msra.mxu1 %v8776_v25  ;;  %v2716_v7 = vpack.c.bf16 %v2706_v57, %v2696_v51  ;;  %v8832_v24 = vld [vmem:[%s9794_s15 + $0x3ec] ss:$16 sps:$4 sm:$0xff]   ;;  %v7484_v25 = vmul.f32 -1.442695, %v10249_v22  ;;  %v2705_v30 = vmul.f32 %v9152_v20, %v10202_v17  ;;  %v8841_v17 = vld [vmem:[%s9794_s15 + $0x424] ss:$16 sps:$4 sm:$0xff]  }
 0x2fe   : > { %4722 = vmatprep.subr.bf16.mxu0 %v8781_v27  ;;  %4937 = vmatprep.subr.bf16.mxu1 %v8784_v28  ;;  %v8827_v27 = vld [vmem:[%s9794_s15 + $0x3e0] ss:$16 sps:$4 sm:$0xff]   ;;  %v8830_v28 = vld [vmem:[%s9794_s15 + $0x3e8] ss:$16 sps:$4 sm:$0xff]   ;;  %v8859_v57 = vld [vmem:[%s9794_s15 + $0x484] ss:$16 sps:$4 sm:$0xff]  }
 0x2ff   : > { %4740 = vmatprep.mubr.bf16.mxu0 %v2716_v7  ;;  %4955 = vmatprep.mubr.bf16.mxu1 %v2716_v7  ;;  %9153 = vpow2.f32 %v7484_v25  ;;  %v8851_v51 = vld [vmem:[%s9794_s15 + $0x460] ss:$16 sps:$4 sm:$0xff]   ;;  %v8865_v7 = vld [vmem:[%s9794_s15 + $0x4a4] ss:$16 sps:$4 sm:$0xff]  }
 0x300   : > { %9155 = vpow2.f32 %v7494_v26  ;;  %v8875_v20 = vld [vmem:[%s9794_s15 + $0x4e0] ss:$16 sps:$4 sm:$0xff]   ;;  %v8884_v26 = vld [vmem:[%s9794_s15 + $0x508] ss:$16 sps:$4 sm:$0xff]  }
 0x301   : > { %4723 = vmatpush1.bf16.msra.mxu0 %v8779_v32  ;;  %4938 = vmatpush1.bf16.msra.mxu1 %v8782_v33  ;;  %v8838_v32 = vld [vmem:[%s9794_s15 + $0x40c] ss:$16 sps:$4 sm:$0xff]   ;;  %v2715_v33 = vpack.c.bf16 %v2705_v30, %v2695_v29  ;;  %v8881_v25 = vld [vmem:[%s9794_s15 + $0x500] ss:$16 sps:$4 sm:$0xff]  }
 0x302   : > { %4724 = vmatprep.subr.bf16.mxu0 %v8787_v34  ;;  %4939 = vmatprep.subr.bf16.mxu1 %v8790_v35  ;;  %v8836_v34 = vld [vmem:[%s9794_s15 + $0x408] ss:$16 sps:$4 sm:$0xff]   ;;  %v8844_v35 = vld [vmem:[%s9794_s15 + $0x42c] ss:$16 sps:$4 sm:$0xff]  }
 0x303   : > { %v10310_v29 = vld [vmem:[%s9788_s20] sm:$0xff] }
 0x305   : > { %4725 = vmatpush1.bf16.msra.mxu0 %v8785_v36  ;;  %4940 = vmatpush1.bf16.msra.mxu1 %v8788_v37  ;;  %v8839_v36 = vld [vmem:[%s9794_s15 + $0x420] ss:$16 sps:$4 sm:$0xff]   ;;  %v8842_v37 = vld [vmem:[%s9794_s15 + $0x428] ss:$16 sps:$4 sm:$0xff]  }
 0x306   : > { %4726 = vmatprep.subr.bf16.mxu0 %v8793_v38  ;;  %4941 = vmatprep.subr.bf16.mxu1 %v8796_v39  ;;  %v8847_v38 = vld [vmem:[%s9794_s15 + $0x444] ss:$16 sps:$4 sm:$0xff]   ;;  %v8850_v39 = vld [vmem:[%s9794_s15 + $0x44c] ss:$16 sps:$4 sm:$0xff]  }
 0x309   : > { %4727 = vmatpush1.bf16.msra.mxu0 %v8791_v42  ;;  %4942 = vmatpush1.bf16.msra.mxu1 %v8794_v43  ;;  %v9154_v41 = vpop.eup %9153 }
 0x30a   : > { %4728 = vmatprep.subr.bf16.mxu0 %v8799_v45  ;;  %4943 = vmatprep.subr.bf16.mxu1 %v8802_v46  ;;  %v9156_v42 = vpop.eup %9155  ;;  %v2638_v43 = vadd.f32 1.0, %v9154_v41  ;;  %v8848_v45 = vld [vmem:[%s9794_s15 + $0x448] ss:$16 sps:$4 sm:$0xff]  }
 0x30b   : > { %v2648_v46 = vadd.f32 1.0, %v9156_v42  ;;  %v8896_v42 = vld [vmem:[%s9794_s15 + $0x548] ss:$16 sps:$4 sm:$0xff]  }
 0x30c   : > { %9157 = vrcp.f32 %v2638_v43 }
 0x30d   : > { %4729 = vmatpush1.bf16.msra.mxu0 %v8797_v52  ;;  %4944 = vmatpush1.bf16.msra.mxu1 %v8800_v55  ;;  %9159 = vrcp.f32 %v2648_v46  ;;  %v8854_v52 = vld [vmem:[%s9794_s15 + $0x468] ss:$16 sps:$4 sm:$0xff]   ;;  %v2521_v55 = vsub.s32 4, %v10122_v48 }
 0x30e   : > { %4730 = vmatprep.subr.bf16.mxu0 %v8805_v58  ;;  %4945 = vmatprep.subr.bf16.mxu1 %v8808_v40  ;;  %v8862_v58 = vld [vmem:[%s9794_s15 + $0x48c] ss:$16 sps:$4 sm:$0xff]   ;;  %v8857_v40 = vld [vmem:[%s9794_s15 + $0x480] ss:$16 sps:$4 sm:$0xff]  }
 0x30f   : > { %v2522_v60 = vrot.slane %v10137_v11, %v2521_v55  ;;  %v8871_v11 = vld [vmem:[%s9794_s15 + $0x4c4] ss:$16 sps:$4 sm:$0xff]   ;;  %v8910_v55 = vld [vmem:[%s9794_s15 + $0x58c] ss:$16 sps:$4 sm:$0xff]  }
 0x311   : > { %4731 = vmatpush1.bf16.msra.mxu0 %v8803_v61  ;;  %4946 = vmatpush1.bf16.msra.mxu1 %v8806_v62  ;;  %v8868_v61 = vld [vmem:[%s9794_s15 + $0x4ac] ss:$16 sps:$4 sm:$0xff]  }
 0x312   : > { %4732 = vmatprep.subr.bf16.mxu0 %v8811_v63  ;;  %4947 = vmatprep.subr.bf16.mxu1 %v8814_v0  ;;  %v2483_v62 = vld [vmem:[#allocation2 + $0x20] sm:$0xff]  ;;  %v2493_v63 = vld [vmem:[#allocation2 + $0x70] sm:$0xff] }
 0x313   : > { %v10292_v9 = vadd.f32 %v2522_v60, %v2493_v63 }
 0x315   : > { %4733 = vmatpush1.bf16.msra.mxu0 %v8809_v1  ;;  %4948 = vmatpush1.bf16.msra.mxu1 %v8812_v2  ;;  %v8863_v2 = vld [vmem:[%s9794_s15 + $0x4a0] ss:$16 sps:$4 sm:$0xff]   ;;  %v7493_v19 = vmul.f32 -1.442695, %v10292_v9 }
 0x316   : > { %4734 = vmatprep.subr.bf16.mxu0 %v8817_v4  ;;  %4949 = vmatprep.subr.bf16.mxu1 %v8820_v5  ;;  %v9158_v0 = vpop.eup %9157  ;;  %v10287_v5 = vadd.f32 %v2522_v60, %v2483_v62  ;;  %v8914_v62 = vld [vmem:[%s9794_s15 + $0x5a8] ss:$16 sps:$4 sm:$0xff]  }
 0x317   : > { %v9160_v1 = vpop.eup %9159  ;;  %v2698_v4 = vmul.f32 %v9158_v0, %v10249_v22  ;;  %v8883_v22 = vld [vmem:[%s9794_s15 + $0x504] ss:$16 sps:$4 sm:$0xff]  }
 0x318   : > { %v8919_v0 = vld [vmem:[%s9794_s15 + $0x5c4] ss:$16 sps:$4 sm:$0xff]  }
 0x319   : > { %4735 = vmatpush1.bf16.msra.mxu0 %v8815_v6  ;;  %4950 = vmatpush1.bf16.msra.mxu1 %v8818_v8  ;;  %v8874_v6 = vld [vmem:[%s9794_s15 + $0x4cc] ss:$16 sps:$4 sm:$0xff]   ;;  %v2708_v8 = vmul.f32 %v9160_v1, %v10251_v23 }
 0x31a   : > { %4736 = vmatprep.subr.bf16.mxu0 %v8823_v10  ;;  %4951 = vmatprep.subr.bf16.mxu1 %v8826_v12  ;;  %v8869_v10 = vld [vmem:[%s9794_s15 + $0x4c0] ss:$16 sps:$4 sm:$0xff]   ;;  %v8872_v12 = vld [vmem:[%s9794_s15 + $0x4c8] ss:$16 sps:$4 sm:$0xff]   ;;  %v8886_v23 = vld [vmem:[%s9794_s15 + $0x50c] ss:$16 sps:$4 sm:$0xff]  }
 0x31b   : > { %v8922_v1 = vld [vmem:[%s9794_s15 + $0x5cc] ss:$16 sps:$4 sm:$0xff]  }
 0x31d   : > { %4737 = vmatpush1.bf16.msra.mxu0 %v8821_v13  ;;  %4952 = vmatpush1.bf16.msra.mxu1 %v8824_v15  ;;  %v2718_v13 = vpack.c.bf16 %v2708_v8, %v2698_v4  ;;  %v7483_v15 = vmul.f32 -1.442695, %v10287_v5  ;;  %v8925_v8 = vld [vmem:[%s9794_s15 + $0x5e4] ss:$16 sps:$4 sm:$0xff]  }
 0x31e   : > { %4738 = vmatprep.subr.bf16.mxu0 %v8829_v21  ;;  %4953 = vmatprep.subr.bf16.mxu1 %v8832_v24  ;;  %v8878_v21 = vld [vmem:[%s9794_s15 + $0x4e8] ss:$16 sps:$4 sm:$0xff]   ;;  %v2533_v24 = vsub.s32 7, %v10122_v48 }
 0x31f   : > { %9161 = vpow2.f32 %v7483_v15  ;;  %v8926_v15 = vld [vmem:[%s9794_s15 + $0x5e8] ss:$16 sps:$4 sm:$0xff]  }
 0x320   : > { %9163 = vpow2.f32 %v7493_v19  ;;  %v2534_v30 = vrot.slane %v10310_v29, %v2533_v24  ;;  %v8934_v19 = vld [vmem:[%s9794_s15 + $0x60c] ss:$16 sps:$4 sm:$0xff]  }
 0x321   : > { %4739 = vmatpush1.bf16.msra.mxu0 %v8827_v27  ;;  %4954 = vmatpush1.bf16.msra.mxu1 %v8830_v28  ;;  %v8889_v27 = vld [vmem:[%s9794_s15 + $0x524] ss:$16 sps:$4 sm:$0xff]   ;;  %v8892_v28 = vld [vmem:[%s9794_s15 + $0x52c] ss:$16 sps:$4 sm:$0xff]  }
 0x322   : > { %4751 = vmatprep.subr.bf16.mxu0 %v8835_v31  ;;  %4966 = vmatprep.subr.bf16.mxu1 %v8838_v32  ;;  %v8887_v31 = vld [vmem:[%s9794_s15 + $0x520] ss:$16 sps:$4 sm:$0xff]   ;;  %v8890_v32 = vld [vmem:[%s9794_s15 + $0x528] ss:$16 sps:$4 sm:$0xff]   ;;  %v8940_v24 = vld [vmem:[%s9794_s15 + $0x62c] ss:$16 sps:$4 sm:$0xff]  }
 0x324   : > { %4741 = vmatmul.mubr.bf16.vlgmr.msra.gmra.mrb[0].mxu0 %v2715_v33  ;;  %4956 = vmatmul.mubr.bf16.vlgmr.msra.gmra.mrb[0].mxu1 %v2715_v33  ;;  %v8895_v33 = vld [vmem:[%s9794_s15 + $0x544] ss:$16 sps:$4 sm:$0xff]  }
 0x325   : > { %4752 = vmatpush1.bf16.msra.mxu0 %v8833_v16  ;;  %4967 = vmatpush1.bf16.msra.mxu1 %v8836_v34  ;;  %v8898_v16 = vld [vmem:[%s9794_s15 + $0x54c] ss:$16 sps:$4 sm:$0xff]   ;;  %v2486_v34 = vld [vmem:[#allocation2 + $0x38] sm:$0xff] }
 0x326   : > { %4753 = vmatprep.subr.bf16.mxu0 %v8841_v17  ;;  %4968 = vmatprep.subr.bf16.mxu1 %v8844_v35  ;;  %v2496_v17 = vld [vmem:[#allocation2 + $0x88] sm:$0xff]  ;;  %v10317_v35 = vadd.f32 %v2534_v30, %v2486_v34 }
 0x327   : > { %4783 = vmatprep.mubr.bf16.mxu0 %v2718_v13  ;;  %4998 = vmatprep.mubr.bf16.mxu1 %v2718_v13  ;;  %v8949_v34 = vld [vmem:[%s9794_s15 + $0x664] ss:$16 sps:$4 sm:$0xff]  }
 0x328   : > { %v7486_v41 = vmul.f32 -1.442695, %v10317_v35 }
 0x329   : > { %4754 = vmatpush1.bf16.msra.mxu0 %v8839_v36  ;;  %4969 = vmatpush1.bf16.msra.mxu1 %v8842_v37  ;;  %v9162_v36 = vpop.eup %9161  ;;  %v10319_v37 = vadd.f32 %v2534_v30, %v2496_v17  ;;  %v8952_v17 = vld [vmem:[%s9794_s15 + $0x66c] ss:$16 sps:$4 sm:$0xff]  }
 0x32a   : > { %4755 = vmatprep.subr.bf16.mxu0 %v8847_v38  ;;  %4970 = vmatprep.subr.bf16.mxu1 %v8850_v39  ;;  %v9164_v38 = vpop.eup %9163  ;;  %v8893_v39 = vld [vmem:[%s9794_s15 + $0x540] ss:$16 sps:$4 sm:$0xff]   ;;  %v2637_v46 = vadd.f32 1.0, %v9162_v36  ;;  %9165 = vpow2.f32 %v7486_v41  ;;  %v8950_v36 = vld [vmem:[%s9794_s15 + $0x668] ss:$16 sps:$4 sm:$0xff]  }
 0x32b   : > { %v7496_v43 = vmul.f32 -1.442695, %v10319_v37  ;;  %v8953_v41 = vld [vmem:[%s9794_s15 + $0x680] ss:$16 sps:$4 sm:$0xff]  }
 0x32d   : > { %4756 = vmatpush1.bf16.msra.mxu0 %v8845_v44  ;;  %4971 = vmatpush1.bf16.msra.mxu1 %v8848_v45  ;;  %v8901_v44 = vld [vmem:[%s9794_s15 + $0x564] ss:$16 sps:$4 sm:$0xff]   ;;  %v8904_v45 = vld [vmem:[%s9794_s15 + $0x56c] ss:$16 sps:$4 sm:$0xff]   ;;  %9167 = vpow2.f32 %v7496_v43 }
 0x32e   : > { %4757 = vmatprep.subr.bf16.mxu0 %v8853_v47  ;;  %4972 = vmatprep.subr.bf16.mxu1 %v8856_v49  ;;  %v2647_v47 = vadd.f32 1.0, %v9164_v38  ;;  %v8899_v49 = vld [vmem:[%s9794_s15 + $0x560] ss:$16 sps:$4 sm:$0xff]   ;;  %9169 = vrcp.f32 %v2637_v46  ;;  %v8955_v38 = vld [vmem:[%s9794_s15 + $0x684] ss:$16 sps:$4 sm:$0xff]  }
 0x32f   : > { %v8961_v43 = vld [vmem:[%s9794_s15 + $0x6a4] ss:$16 sps:$4 sm:$0xff]   ;;  %v2485_v46 = vld [vmem:[#allocation2 + $0x30] sm:$0xff] }
 0x330   : > { %9171 = vrcp.f32 %v2647_v47  ;;  %v10374_v47 = vld [vmem:[%s9788_s20 + $0x8] sm:$0x3] }
 0x331   : > { %4758 = vmatpush1.bf16.msra.mxu0 %v8851_v51  ;;  %4973 = vmatpush1.bf16.msra.mxu1 %v8854_v52  ;;  %v8902_v51 = vld [vmem:[%s9794_s15 + $0x568] ss:$16 sps:$4 sm:$0xff]   ;;  %v8907_v52 = vld [vmem:[%s9794_s15 + $0x584] ss:$16 sps:$4 sm:$0xff]  }
 0x332   : > { %4759 = vmatprep.subr.bf16.mxu0 %v8859_v57  ;;  %4974 = vmatprep.subr.bf16.mxu1 %v8862_v58  ;;  %v8905_v57 = vld [vmem:[%s9794_s15 + $0x580] ss:$16 sps:$4 sm:$0xff]   ;;  %v8908_v58 = vld [vmem:[%s9794_s15 + $0x588] ss:$16 sps:$4 sm:$0xff]  }
 0x335   : > { %4760 = vmatpush1.bf16.msra.mxu0 %v8857_v40  ;;  %4975 = vmatpush1.bf16.msra.mxu1 %v8860_v59  ;;  %v8913_v40 = vld [vmem:[%s9794_s15 + $0x5a4] ss:$16 sps:$4 sm:$0xff]   ;;  %v8916_v59 = vld [vmem:[%s9794_s15 + $0x5ac] ss:$16 sps:$4 sm:$0xff]  }
 0x336   : > { %4761 = vmatprep.subr.bf16.mxu0 %v8865_v7  ;;  %4976 = vmatprep.subr.bf16.mxu1 %v8868_v61  ;;  %v9166_v7 = vpop.eup %9165  ;;  %v8911_v61 = vld [vmem:[%s9794_s15 + $0x5a0] ss:$16 sps:$4 sm:$0xff]  }
 0x337   : > { %v9168_v60 = vpop.eup %9167  ;;  %v2640_v63 = vadd.f32 1.0, %v9166_v7  ;;  %v2498_v7 = vld [vmem:[#allocation2 + $0x98] sm:$0xff] }
 0x339   : > { %4762 = vmatpush1.bf16.msra.mxu0 %v8863_v2  ;;  %4977 = vmatpush1.bf16.msra.mxu1 %v8866_v3  ;;  %v2650_v2 = vadd.f32 1.0, %v9168_v60  ;;  %9173 = vrcp.f32 %v2640_v63  ;;  %v9170_v3 = vpop.eup %9169 }
 0x33a   : > { %4763 = vmatprep.subr.bf16.mxu0 %v8871_v11  ;;  %4978 = vmatprep.subr.bf16.mxu1 %v8874_v6  ;;  %v9172_v4 = vpop.eup %9171  ;;  %v8917_v11 = vld [vmem:[%s9794_s15 + $0x5c0] ss:$16 sps:$4 sm:$0xff]   ;;  %v8920_v6 = vld [vmem:[%s9794_s15 + $0x5c8] ss:$16 sps:$4 sm:$0xff]  }
 0x33b   : > { %9175 = vrcp.f32 %v2650_v2  ;;  %v2707_v13 = vmul.f32 %v9172_v4, %v10292_v9  ;;  %v8937_v9 = vld [vmem:[%s9794_s15 + $0x624] ss:$16 sps:$4 sm:$0xff]   ;;  %v8976_v2 = vld [vmem:[%s9794_s15 + $0x6ec] ss:$16 sps:$4 sm:$0xff]  }
 0x33d   : > { %4764 = vmatpush1.bf16.msra.mxu0 %v8869_v10  ;;  %4979 = vmatpush1.bf16.msra.mxu1 %v8872_v12  ;;  %v8928_v10 = vld [vmem:[%s9794_s15 + $0x5ec] ss:$16 sps:$4 sm:$0xff]   ;;  %v2697_v12 = vmul.f32 %v9170_v3, %v10287_v5  ;;  %v8932_v5 = vld [vmem:[%s9794_s15 + $0x608] ss:$16 sps:$4 sm:$0xff]  }
 0x33e   : > { %4765 = vmatprep.subr.bf16.mxu0 %v8877_v14  ;;  %4980 = vmatprep.subr.bf16.mxu1 %v8880_v18  ;;  %v8923_v14 = vld [vmem:[%s9794_s15 + $0x5e0] ss:$16 sps:$4 sm:$0xff]   ;;  %v8931_v18 = vld [vmem:[%s9794_s15 + $0x604] ss:$16 sps:$4 sm:$0xff]  }
 0x341   : > { %4766 = vmatpush1.bf16.msra.mxu0 %v8875_v20  ;;  %4981 = vmatpush1.bf16.msra.mxu1 %v8878_v21  ;;  %v2717_v20 = vpack.c.bf16 %v2707_v13, %v2697_v12  ;;  %v8982_v12 = vld [vmem:[%s9794_s15 + $0x70c] ss:$16 sps:$4 sm:$0xff]   ;;  %v8977_v13 = vld [vmem:[%s9794_s15 + $0x700] ss:$16 sps:$4 sm:$0xff]  }
 0x342   : > { %4767 = vmatprep.subr.bf16.mxu0 %v8883_v22  ;;  %4982 = vmatprep.subr.bf16.mxu1 %v8886_v23  ;;  %v8929_v22 = vld [vmem:[%s9794_s15 + $0x600] ss:$16 sps:$4 sm:$0xff]  }
 0x343   : > { %v9174_v21 = vpop.eup %9173 }
 0x345   : > { %4768 = vmatpush1.bf16.msra.mxu0 %v8881_v25  ;;  %4983 = vmatpush1.bf16.msra.mxu1 %v8884_v26  ;;  %v9176_v23 = vpop.eup %9175  ;;  %v2700_v25 = vmul.f32 %v9174_v21, %v10317_v35  ;;  %v8947_v35 = vld [vmem:[%s9794_s15 + $0x660] ss:$16 sps:$4 sm:$0xff]   ;;  %v8991_v21 = vld [vmem:[%s9794_s15 + $0x744] ss:$16 sps:$4 sm:$0xff]  }
 0x346   : > { %4769 = vmatprep.subr.bf16.mxu0 %v8889_v27  ;;  %4984 = vmatprep.subr.bf16.mxu1 %v8892_v28  ;;  %v2710_v26 = vmul.f32 %v9176_v23, %v10319_v37  ;;  %v8935_v27 = vld [vmem:[%s9794_s15 + $0x620] ss:$16 sps:$4 sm:$0xff]   ;;  %v8938_v28 = vld [vmem:[%s9794_s15 + $0x628] ss:$16 sps:$4 sm:$0xff]   ;;  %v2529_v37 = vsub.s32 6, %v10122_v48 }
 0x348   : > { %v2720_v30 = vpack.c.bf16 %v2710_v26, %v2700_v25  ;;  %v8997_v26 = vld [vmem:[%s9794_s15 + $0x764] ss:$16 sps:$4 sm:$0xff]  }
 0x349   : > { %4770 = vmatpush1.bf16.msra.mxu0 %v8887_v31  ;;  %4985 = vmatpush1.bf16.msra.mxu1 %v8890_v32  ;;  %v8943_v31 = vld [vmem:[%s9794_s15 + $0x644] ss:$16 sps:$4 sm:$0xff]   ;;  %v8946_v32 = vld [vmem:[%s9794_s15 + $0x64c] ss:$16 sps:$4 sm:$0xff]  }
 0x34a   : > { %4771 = vmatprep.subr.bf16.mxu0 %v8895_v33  ;;  %4986 = vmatprep.subr.bf16.mxu1 %v8898_v16  ;;  %v8941_v33 = vld [vmem:[%s9794_s15 + $0x640] ss:$16 sps:$4 sm:$0xff]   ;;  %v8944_v16 = vld [vmem:[%s9794_s15 + $0x648] ss:$16 sps:$4 sm:$0xff]  }
 0x34d   : > { %4772 = vmatpush1.bf16.msra.mxu0 %v8893_v39  ;;  %4987 = vmatpush1.bf16.msra.mxu1 %v8896_v42  ;;  %v8958_v39 = vld [vmem:[%s9794_s15 + $0x68c] ss:$16 sps:$4 sm:$0xff]   ;;  %v8956_v42 = vld [vmem:[%s9794_s15 + $0x688] ss:$16 sps:$4 sm:$0xff]  }
 0x34e   : > { %4773 = vmatprep.subr.bf16.mxu0 %v8901_v44  ;;  %4988 = vmatprep.subr.bf16.mxu1 %v8904_v45  ;;  %v2530_v44 = vrot.slane %v10310_v29, %v2529_v37  ;;  %v8964_v45 = vld [vmem:[%s9794_s15 + $0x6ac] ss:$16 sps:$4 sm:$0xff]   ;;  %v2488_v29 = vld [vmem:[#allocation2 + $0x48] sm:$0xff] }
 0x34f   : > { %v9004_v37 = vld [vmem:[%s9794_s15 + $0x788] ss:$16 sps:$4 sm:$0xff]  }
 0x351   : > { %4774 = vmatpush1.bf16.msra.mxu0 %v8899_v49  ;;  %4989 = vmatpush1.bf16.msra.mxu1 %v8902_v51  ;;  %v2495_v49 = vld [vmem:[#allocation2 + $0x80] sm:$0xff]  ;;  %v2542_v51 = vrot.slane %v10374_v47, %v10129_v53 }
 0x352   : > { %4775 = vmatprep.subr.bf16.mxu0 %v8907_v52  ;;  %4990 = vmatprep.subr.bf16.mxu1 %v8910_v55  ;;  %v8959_v52 = vld [vmem:[%s9794_s15 + $0x6a0] ss:$16 sps:$4 sm:$0xff]   ;;  %v8962_v55 = vld [vmem:[%s9794_s15 + $0x6a8] ss:$16 sps:$4 sm:$0xff]  }
 0x353   : > { %v10386_v60 = vadd.f32 %v2542_v51, %v2488_v29 }
 0x355   : > { %4776 = vmatpush1.bf16.msra.mxu0 %v8905_v57  ;;  %4991 = vmatpush1.bf16.msra.mxu1 %v8908_v58  ;;  %v10380_v57 = vadd.f32 %v2530_v44, %v2485_v46  ;;  %v8967_v58 = vld [vmem:[%s9794_s15 + $0x6c4] ss:$16 sps:$4 sm:$0xff]   ;;  %v7488_v4 = vmul.f32 -1.442695, %v10386_v60 }
 0x356   : > { %4777 = vmatprep.subr.bf16.mxu0 %v8913_v40  ;;  %4992 = vmatprep.subr.bf16.mxu1 %v8916_v59  ;;  %v8970_v40 = vld [vmem:[%s9794_s15 + $0x6cc] ss:$16 sps:$4 sm:$0xff]   ;;  %v10384_v59 = vadd.f32 %v2530_v44, %v2495_v49  ;;  %v9013_v49 = vld [vmem:[%s9794_s15 + $0x7c0] ss:$16 sps:$4 sm:$0xff]  }
 0x357   : > { %v7485_v63 = vmul.f32 -1.442695, %v10380_v57  ;;  %v9018_v44 = vld [vmem:[%s9794_s15 + $0x7cc] ss:$16 sps:$4 sm:$0xff]  }
 0x358   : > { %v7495_v3 = vmul.f32 -1.442695, %v10384_v59 }
 0x359   : > { %4778 = vmatpush1.bf16.msra.mxu0 %v8911_v61  ;;  %4993 = vmatpush1.bf16.msra.mxu1 %v8914_v62  ;;  %v8965_v61 = vld [vmem:[%s9794_s15 + $0x6c0] ss:$16 sps:$4 sm:$0xff]   ;;  %v8968_v62 = vld [vmem:[%s9794_s15 + $0x6c8] ss:$16 sps:$4 sm:$0xff]   ;;  %9177 = vpow2.f32 %v7485_v63  ;;  %v9027_v63 = vld [vmem:[%s9794_s15 + $0x804] ss:$16 sps:$4 sm:$0xff]  }
 0x35a   : > { %4779 = vmatprep.subr.bf16.mxu0 %v8919_v0  ;;  %4994 = vmatprep.subr.bf16.mxu1 %v8922_v1  ;;  %v10391_v0 = vadd.f32 %v2542_v51, %v2498_v7  ;;  %v8973_v1 = vld [vmem:[%s9794_s15 + $0x6e4] ss:$16 sps:$4 sm:$0xff]   ;;  %9179 = vpow2.f32 %v7495_v3  ;;  %v9016_v51 = vld [vmem:[%s9794_s15 + $0x7c8] ss:$16 sps:$4 sm:$0xff]  }
 0x35b   : > { %9181 = vpow2.f32 %v7488_v4  ;;  %v9028_v4 = vld [vmem:[%s9794_s15 + $0x808] ss:$16 sps:$4 sm:$0xff]  }
 0x35d   : > { %4780 = vmatpush1.bf16.msra.mxu0 %v8917_v11  ;;  %4995 = vmatpush1.bf16.msra.mxu1 %v8920_v6  ;;  %v8971_v11 = vld [vmem:[%s9794_s15 + $0x6e0] ss:$16 sps:$4 sm:$0xff]   ;;  %v8974_v6 = vld [vmem:[%s9794_s15 + $0x6e8] ss:$16 sps:$4 sm:$0xff]  }
 0x35e   : > { %4781 = vmatprep.subr.bf16.mxu0 %v8925_v8  ;;  %4996 = vmatprep.subr.bf16.mxu1 %v8928_v10  ;;  %v7498_v8 = vmul.f32 -1.442695, %v10391_v0  ;;  %v8979_v10 = vld [vmem:[%s9794_s15 + $0x704] ss:$16 sps:$4 sm:$0xff]  }
 0x360   : > { %9183 = vpow2.f32 %v7498_v8 }
 0x361   : > { %4782 = vmatpush1.bf16.msra.mxu0 %v8923_v14  ;;  %4997 = vmatpush1.bf16.msra.mxu1 %v8926_v15  ;;  %v8980_v14 = vld [vmem:[%s9794_s15 + $0x708] ss:$16 sps:$4 sm:$0xff]   ;;  %v8985_v15 = vld [vmem:[%s9794_s15 + $0x724] ss:$16 sps:$4 sm:$0xff]  }
 0x362   : > { %4794 = vmatprep.subr.bf16.mxu0 %v8931_v18  ;;  %5009 = vmatprep.subr.bf16.mxu1 %v8934_v19  ;;  %v8988_v18 = vld [vmem:[%s9794_s15 + $0x72c] ss:$16 sps:$4 sm:$0xff]   ;;  %v8983_v19 = vld [vmem:[%s9794_s15 + $0x720] ss:$16 sps:$4 sm:$0xff]  }
 0x364   : > { %4784 = vmatmul.mubr.bf16.vlgmr.msra.gmra.mrb[0].mxu0 %v2717_v20  ;;  %4999 = vmatmul.mubr.bf16.vlgmr.msra.gmra.mrb[0].mxu1 %v2717_v20  ;;  %v8986_v20 = vld [vmem:[%s9794_s15 + $0x728] ss:$16 sps:$4 sm:$0xff]  }
 0x365   : > { %4795 = vmatpush1.bf16.msra.mxu0 %v8929_v22  ;;  %5010 = vmatpush1.bf16.msra.mxu1 %v8932_v5  ;;  %v8994_v22 = vld [vmem:[%s9794_s15 + $0x74c] ss:$16 sps:$4 sm:$0xff]   ;;  %v9178_v5 = vpop.eup %9177 }
 0x366   : > { %4796 = vmatprep.subr.bf16.mxu0 %v8937_v9  ;;  %5011 = vmatprep.subr.bf16.mxu1 %v8940_v24  ;;  %v9180_v23 = vpop.eup %9179  ;;  %v8989_v9 = vld [vmem:[%s9794_s15 + $0x740] ss:$16 sps:$4 sm:$0xff]   ;;  %v8992_v24 = vld [vmem:[%s9794_s15 + $0x748] ss:$16 sps:$4 sm:$0xff]  }
 0x367   : > { %4826 = vmatprep.mubr.bf16.mxu0 %v2720_v30  ;;  %5041 = vmatprep.mubr.bf16.mxu1 %v2720_v30  ;;  %v9182_v25 = vpop.eup %9181 }
 0x369   : > { %4797 = vmatpush1.bf16.msra.mxu0 %v8935_v27  ;;  %5012 = vmatpush1.bf16.msra.mxu1 %v8938_v28  ;;  %v9000_v27 = vld [vmem:[%s9794_s15 + $0x76c] ss:$16 sps:$4 sm:$0xff]   ;;  %v2639_v28 = vadd.f32 1.0, %v9178_v5  ;;  %v9049_v5 = vld [vmem:[%s9794_s15 + $0x880] ss:$16 sps:$4 sm:$0xff]  }
 0x36a   : > { %4798 = vmatprep.subr.bf16.mxu0 %v8943_v31  ;;  %5013 = vmatprep.subr.bf16.mxu1 %v8946_v32  ;;  %v9184_v30 = vpop.eup %9183  ;;  %v2649_v31 = vadd.f32 1.0, %v9180_v23  ;;  %v8995_v32 = vld [vmem:[%s9794_s15 + $0x760] ss:$16 sps:$4 sm:$0xff]   ;;  %v9052_v23 = vld [vmem:[%s9794_s15 + $0x888] ss:$16 sps:$4 sm:$0xff]  }
 0x36b   : > { %9185 = vrcp.f32 %v2639_v28  ;;  %v9055_v28 = vld [vmem:[%s9794_s15 + $0x8a0] ss:$16 sps:$4 sm:$0xff]  }
 0x36c   : > { %9187 = vrcp.f32 %v2649_v31 }
 0x36d   : > { %4799 = vmatpush1.bf16.msra.mxu0 %v8941_v33  ;;  %5014 = vmatpush1.bf16.msra.mxu1 %v8944_v16  ;;  %v8998_v33 = vld [vmem:[%s9794_s15 + $0x768] ss:$16 sps:$4 sm:$0xff]   ;;  %v2642_v16 = vadd.f32 1.0, %v9182_v25  ;;  %v9060_v25 = vld [vmem:[%s9794_s15 + $0x8ac] ss:$16 sps:$4 sm:$0xff]  }
 0x36e   : > { %4800 = vmatprep.subr.bf16.mxu0 %v8949_v34  ;;  %5015 = vmatprep.subr.bf16.mxu1 %v8952_v17  ;;  %v9003_v34 = vld [vmem:[%s9794_s15 + $0x784] ss:$16 sps:$4 sm:$0xff]   ;;  %v9006_v17 = vld [vmem:[%s9794_s15 + $0x78c] ss:$16 sps:$4 sm:$0xff]  }
 0x36f   : > { %9189 = vrcp.f32 %v2642_v16  ;;  %v9061_v16 = vld [vmem:[%s9794_s15 + $0x8c0] ss:$16 sps:$4 sm:$0xff]  }
 0x371   : > { %4801 = vmatpush1.bf16.msra.mxu0 %v8947_v35  ;;  %5016 = vmatpush1.bf16.msra.mxu1 %v8950_v36  ;;  %v2652_v35 = vadd.f32 1.0, %v9184_v30  ;;  %v9001_v36 = vld [vmem:[%s9794_s15 + $0x780] ss:$16 sps:$4 sm:$0xff]   ;;  %v9058_v30 = vld [vmem:[%s9794_s15 + $0x8a8] ss:$16 sps:$4 sm:$0xff]  }
 0x372   : > { %4802 = vmatprep.subr.bf16.mxu0 %v8955_v38  ;;  %5017 = vmatprep.subr.bf16.mxu1 %v8958_v39  ;;  %v9009_v38 = vld [vmem:[%s9794_s15 + $0x7a4] ss:$16 sps:$4 sm:$0xff]   ;;  %v9012_v39 = vld [vmem:[%s9794_s15 + $0x7ac] ss:$16 sps:$4 sm:$0xff]  }
 0x373   : > { %9191 = vrcp.f32 %v2652_v35  ;;  %v9069_v35 = vld [vmem:[%s9794_s15 + $0x8e4] ss:$16 sps:$4 sm:$0xff]  }
 0x375   : > { %4803 = vmatpush1.bf16.msra.mxu0 %v8953_v41  ;;  %5018 = vmatpush1.bf16.msra.mxu1 %v8956_v42  ;;  %v9007_v41 = vld [vmem:[%s9794_s15 + $0x7a0] ss:$16 sps:$4 sm:$0xff]   ;;  %v9010_v42 = vld [vmem:[%s9794_s15 + $0x7a8] ss:$16 sps:$4 sm:$0xff]  }
 0x376   : > { %4804 = vmatprep.subr.bf16.mxu0 %v8961_v43  ;;  %5019 = vmatprep.subr.bf16.mxu1 %v8964_v45  ;;  %v9015_v43 = vld [vmem:[%s9794_s15 + $0x7c4] ss:$16 sps:$4 sm:$0xff]   ;;  %v9186_v45 = vpop.eup %9185 }
 0x377   : > { %v9188_v46 = vpop.eup %9187 }
 0x378   : > { %v2709_v7 = vmul.f32 %v9188_v46, %v10384_v59  ;;  %v9025_v59 = vld [vmem:[%s9794_s15 + $0x800] ss:$16 sps:$4 sm:$0xff]   ;;  %v9084_v46 = vld [vmem:[%s9794_s15 + $0x92c] ss:$16 sps:$4 sm:$0xff]  }
 0x379   : > { %4805 = vmatpush1.bf16.msra.mxu0 %v8959_v52  ;;  %5020 = vmatpush1.bf16.msra.mxu1 %v8962_v55  ;;  %v9021_v52 = vld [vmem:[%s9794_s15 + $0x7e4] ss:$16 sps:$4 sm:$0xff]   ;;  %v9024_v55 = vld [vmem:[%s9794_s15 + $0x7ec] ss:$16 sps:$4 sm:$0xff]   ;;  %v9190_v29 = vpop.eup %9189 }
 0x37a   : > { %4806 = vmatprep.subr.bf16.mxu0 %v8967_v58  ;;  %5021 = vmatprep.subr.bf16.mxu1 %v8970_v40  ;;  %v2699_v40 = vmul.f32 %v9186_v45, %v10380_v57  ;;  %v9081_v45 = vld [vmem:[%s9794_s15 + $0x924] ss:$16 sps:$4 sm:$0xff]  }
 0x37c   : > { %v2719_v57 = vpack.c.bf16 %v2709_v7, %v2699_v40  ;;  %v9085_v40 = vld [vmem:[%s9794_s15 + $0x940] ss:$16 sps:$4 sm:$0xff]   ;;  %v9088_v7 = vld [vmem:[%s9794_s15 + $0x948] ss:$16 sps:$4 sm:$0xff]  }
 0x37d   : > { %4807 = vmatpush1.bf16.msra.mxu0 %v8965_v61  ;;  %5022 = vmatpush1.bf16.msra.mxu1 %v8968_v62  ;;  %v9192_v58 = vpop.eup %9191  ;;  %v9019_v61 = vld [vmem:[%s9794_s15 + $0x7e0] ss:$16 sps:$4 sm:$0xff]   ;;  %v9022_v62 = vld [vmem:[%s9794_s15 + $0x7e8] ss:$16 sps:$4 sm:$0xff]  }
 0x37e   : > { %4808 = vmatprep.subr.bf16.mxu0 %v8973_v1  ;;  %5023 = vmatprep.subr.bf16.mxu1 %v8976_v2  ;;  %v9030_v1 = vld [vmem:[%s9794_s15 + $0x80c] ss:$16 sps:$4 sm:$0xff]   ;;  %v2702_v2 = vmul.f32 %v9190_v29, %v10386_v60  ;;  %v2712_v3 = vmul.f32 %v9192_v58, %v10391_v0  ;;  %v9031_v60 = vld [vmem:[%s9794_s15 + $0x820] ss:$16 sps:$4 sm:$0xff]   ;;  %v9034_v0 = vld [vmem:[%s9794_s15 + $0x828] ss:$16 sps:$4 sm:$0xff]  }
 0x380   : > { %v2722_v8 = vpack.c.bf16 %v2712_v3, %v2702_v2  ;;  %v9091_v2 = vld [vmem:[%s9794_s15 + $0x960] ss:$16 sps:$4 sm:$0xff]   ;;  %v9094_v3 = vld [vmem:[%s9794_s15 + $0x968] ss:$16 sps:$4 sm:$0xff]  }
 0x381   : > { %4809 = vmatpush1.bf16.msra.mxu0 %v8971_v11  ;;  %5024 = vmatpush1.bf16.msra.mxu1 %v8974_v6  ;;  %v9033_v11 = vld [vmem:[%s9794_s15 + $0x824] ss:$16 sps:$4 sm:$0xff]   ;;  %v9036_v6 = vld [vmem:[%s9794_s15 + $0x82c] ss:$16 sps:$4 sm:$0xff]  }
 0x382   : > { %4810 = vmatprep.subr.bf16.mxu0 %v8979_v10  ;;  %5025 = vmatprep.subr.bf16.mxu1 %v8982_v12  ;;  %v9039_v10 = vld [vmem:[%s9794_s15 + $0x844] ss:$16 sps:$4 sm:$0xff]   ;;  %v9042_v12 = vld [vmem:[%s9794_s15 + $0x84c] ss:$16 sps:$4 sm:$0xff]  }
 0x385   : > { %4811 = vmatpush1.bf16.msra.mxu0 %v8977_v13  ;;  %5026 = vmatpush1.bf16.msra.mxu1 %v8980_v14  ;;  %v9037_v13 = vld [vmem:[%s9794_s15 + $0x840] ss:$16 sps:$4 sm:$0xff]   ;;  %v9040_v14 = vld [vmem:[%s9794_s15 + $0x848] ss:$16 sps:$4 sm:$0xff]  }
 0x386   : > { %4812 = vmatprep.subr.bf16.mxu0 %v8985_v15  ;;  %5027 = vmatprep.subr.bf16.mxu1 %v8988_v18  ;;  %v9045_v15 = vld [vmem:[%s9794_s15 + $0x864] ss:$16 sps:$4 sm:$0xff]   ;;  %v9048_v18 = vld [vmem:[%s9794_s15 + $0x86c] ss:$16 sps:$4 sm:$0xff]  }
 0x389   : > { %4813 = vmatpush1.bf16.msra.mxu0 %v8983_v19  ;;  %5028 = vmatpush1.bf16.msra.mxu1 %v8986_v20  ;;  %v9043_v19 = vld [vmem:[%s9794_s15 + $0x860] ss:$16 sps:$4 sm:$0xff]   ;;  %v9046_v20 = vld [vmem:[%s9794_s15 + $0x868] ss:$16 sps:$4 sm:$0xff]  }
 0x38a   : > { %4814 = vmatprep.subr.bf16.mxu0 %v8991_v21  ;;  %5029 = vmatprep.subr.bf16.mxu1 %v8994_v22  ;;  %v9051_v21 = vld [vmem:[%s9794_s15 + $0x884] ss:$16 sps:$4 sm:$0xff]   ;;  %v9054_v22 = vld [vmem:[%s9794_s15 + $0x88c] ss:$16 sps:$4 sm:$0xff]  }
 0x38d   : > { %4815 = vmatpush1.bf16.msra.mxu0 %v8989_v9  ;;  %5030 = vmatpush1.bf16.msra.mxu1 %v8992_v24  ;;  %v2538_v9 = vrot.slane %v10374_v47, %v10132_v54  ;;  %v9057_v24 = vld [vmem:[%s9794_s15 + $0x8a4] ss:$16 sps:$4 sm:$0xff]  }
 0x38e   : > { %4816 = vmatprep.subr.bf16.mxu0 %v8997_v26  ;;  %5031 = vmatprep.subr.bf16.mxu1 %v9000_v27  ;;  %v2487_v26 = vld [vmem:[#allocation2 + $0x40] sm:$0xff]  ;;  %v2497_v27 = vld [vmem:[#allocation2 + $0x90] sm:$0xff]  ;;  %v9063_v47 = vld [vmem:[%s9794_s15 + $0x8c4] ss:$16 sps:$4 sm:$0xff]  }
 0x38f   : > { %v10462_v31 = vadd.f32 %v2538_v9, %v2487_v26  ;;  %v9118_v26 = vld [vmem:[%s9794_s15 + $0x9e8] ss:$16 sps:$4 sm:$0xff]  }
 0x391   : > { %4817 = vmatpush1.bf16.msra.mxu0 %v8995_v32  ;;  %5032 = vmatpush1.bf16.msra.mxu1 %v8998_v33  ;;  %v9066_v32 = vld [vmem:[%s9794_s15 + $0x8cc] ss:$16 sps:$4 sm:$0xff]   ;;  %v10466_v33 = vadd.f32 %v2538_v9, %v2497_v27 }
 0x392   : > { %4818 = vmatprep.subr.bf16.mxu0 %v9003_v34  ;;  %5033 = vmatprep.subr.bf16.mxu1 %v9006_v17  ;;  %v9064_v34 = vld [vmem:[%s9794_s15 + $0x8c8] ss:$16 sps:$4 sm:$0xff]   ;;  %v7487_v17 = vmul.f32 -1.442695, %v10462_v31 }
 0x394   : > { %9193 = vpow2.f32 %v7487_v17 }
 0x395   : > { %4819 = vmatpush1.bf16.msra.mxu0 %v9001_v36  ;;  %5034 = vmatpush1.bf16.msra.mxu1 %v9004_v37  ;;  %v9072_v36 = vld [vmem:[%s9794_s15 + $0x8ec] ss:$16 sps:$4 sm:$0xff]   ;;  %v7497_v37 = vmul.f32 -1.442695, %v10466_v33 }
 0x396   : > { %4820 = vmatprep.subr.bf16.mxu0 %v9009_v38  ;;  %5035 = vmatprep.subr.bf16.mxu1 %v9012_v39  ;;  %v9067_v38 = vld [vmem:[%s9794_s15 + $0x8e0] ss:$16 sps:$4 sm:$0xff]   ;;  %v9070_v39 = vld [vmem:[%s9794_s15 + $0x8e8] ss:$16 sps:$4 sm:$0xff]  }
 0x397   : > { %9195 = vpow2.f32 %v7497_v37  ;;  %v5143_v37 = vld [vmem:[%s9809_s6 + $0xa0] sm:$0xff] }
 0x399   : > { %4821 = vmatpush1.bf16.msra.mxu0 %v9007_v41  ;;  %5036 = vmatpush1.bf16.msra.mxu1 %v9010_v42  ;;  %v9075_v41 = vld [vmem:[%s9794_s15 + $0x904] ss:$16 sps:$4 sm:$0xff]   ;;  %v9078_v42 = vld [vmem:[%s9794_s15 + $0x90c] ss:$16 sps:$4 sm:$0xff]  }
 0x39a   : > { %4822 = vmatprep.subr.bf16.mxu0 %v9015_v43  ;;  %5037 = vmatprep.subr.bf16.mxu1 %v9018_v44  ;;  %v9073_v43 = vld [vmem:[%s9794_s15 + $0x900] ss:$16 sps:$4 sm:$0xff]   ;;  %v9076_v44 = vld [vmem:[%s9794_s15 + $0x908] ss:$16 sps:$4 sm:$0xff]  }
 0x39d   : > { %4823 = vmatpush1.bf16.msra.mxu0 %v9013_v49  ;;  %5038 = vmatpush1.bf16.msra.mxu1 %v9016_v51  ;;  %v9079_v49 = vld [vmem:[%s9794_s15 + $0x920] ss:$16 sps:$4 sm:$0xff]   ;;  %v9082_v51 = vld [vmem:[%s9794_s15 + $0x928] ss:$16 sps:$4 sm:$0xff]  }
 0x39e   : > { %4824 = vmatprep.subr.bf16.mxu0 %v9021_v52  ;;  %5039 = vmatprep.subr.bf16.mxu1 %v9024_v55  ;;  %v9087_v52 = vld [vmem:[%s9794_s15 + $0x944] ss:$16 sps:$4 sm:$0xff]   ;;  %v9090_v55 = vld [vmem:[%s9794_s15 + $0x94c] ss:$16 sps:$4 sm:$0xff]   ;;  %v9194_v29 = vpop.eup %9193 }
 0x3a1   : > { %4825 = vmatpush1.bf16.msra.mxu0 %v9019_v61  ;;  %5040 = vmatpush1.bf16.msra.mxu1 %v9022_v62  ;;  %v9196_v58 = vpop.eup %9195  ;;  %v9093_v61 = vld [vmem:[%s9794_s15 + $0x964] ss:$16 sps:$4 sm:$0xff]   ;;  %v9096_v62 = vld [vmem:[%s9794_s15 + $0x96c] ss:$16 sps:$4 sm:$0xff]  }
 0x3a2   : > { %4837 = vmatprep.subr.bf16.mxu0 %v9027_v63  ;;  %5052 = vmatprep.subr.bf16.mxu1 %v9030_v1  ;;  %v2641_v63 = vadd.f32 1.0, %v9194_v29  ;;  %v2651_v1 = vadd.f32 1.0, %v9196_v58 }
 0x3a4   : > { %4827 = vmatmul.mubr.bf16.vlgmr.msra.gmra.mrb[0].mxu0 %v2719_v57  ;;  %5042 = vmatmul.mubr.bf16.vlgmr.msra.gmra.mrb[0].mxu1 %v2719_v57  ;;  %v9099_v57 = vld [vmem:[%s9794_s15 + $0x984] ss:$16 sps:$4 sm:$0xff]   ;;  %9197 = vrcp.f32 %v2641_v63 }
 0x3a5   : > { %4838 = vmatpush1.bf16.msra.mxu0 %v9025_v59  ;;  %5053 = vmatpush1.bf16.msra.mxu1 %v9028_v4  ;;  %v9102_v59 = vld [vmem:[%s9794_s15 + $0x98c] ss:$16 sps:$4 sm:$0xff]   ;;  %9199 = vrcp.f32 %v2651_v1  ;;  %v9097_v4 = vld [vmem:[%s9794_s15 + $0x980] ss:$16 sps:$4 sm:$0xff]  }
 0x3a6   : > { %4839 = vmatprep.subr.bf16.mxu0 %v9033_v11  ;;  %5054 = vmatprep.subr.bf16.mxu1 %v9036_v6  ;;  %v9100_v11 = vld [vmem:[%s9794_s15 + $0x988] ss:$16 sps:$4 sm:$0xff]   ;;  %v9105_v6 = vld [vmem:[%s9794_s15 + $0x9a4] ss:$16 sps:$4 sm:$0xff]  }
 0x3a7   : > { %4869 = vmatprep.mubr.bf16.mxu0 %v2722_v8  ;;  %5084 = vmatprep.mubr.bf16.mxu1 %v2722_v8  ;;  %v9108_v8 = vld [vmem:[%s9794_s15 + $0x9ac] ss:$16 sps:$4 sm:$0xff]  }
 0x3a9   : > { %4840 = vmatpush1.bf16.msra.mxu0 %v9031_v60  ;;  %5055 = vmatpush1.bf16.msra.mxu1 %v9034_v0  ;;  %v9103_v60 = vld [vmem:[%s9794_s15 + $0x9a0] ss:$16 sps:$4 sm:$0xff]   ;;  %v9106_v0 = vld [vmem:[%s9794_s15 + $0x9a8] ss:$16 sps:$4 sm:$0xff]  }
 0x3aa   : > { %4841 = vmatprep.subr.bf16.mxu0 %v9039_v10  ;;  %5056 = vmatprep.subr.bf16.mxu1 %v9042_v12  ;;  %v9111_v10 = vld [vmem:[%s9794_s15 + $0x9c4] ss:$16 sps:$4 sm:$0xff]   ;;  %v9114_v12 = vld [vmem:[%s9794_s15 + $0x9cc] ss:$16 sps:$4 sm:$0xff]  }
 0x3ad   : > { %4842 = vmatpush1.bf16.msra.mxu0 %v9037_v13  ;;  %5057 = vmatpush1.bf16.msra.mxu1 %v9040_v14 }
 0x3ae   : > { %4843 = vmatprep.subr.bf16.mxu0 %v9045_v15  ;;  %5058 = vmatprep.subr.bf16.mxu1 %v9048_v18  ;;  %v9198_v13 = vpop.eup %9197  ;;  %v9109_v15 = vld [vmem:[%s9794_s15 + $0x9c0] ss:$16 sps:$4 sm:$0xff]   ;;  %v9112_v18 = vld [vmem:[%s9794_s15 + $0x9c8] ss:$16 sps:$4 sm:$0xff]  }
 0x3af   : > { %v9200_v14 = vpop.eup %9199  ;;  %v2701_v9 = vmul.f32 %v9198_v13, %v10462_v31  ;;  %v5172_v13 = vld [vmem:[%s9809_s6 + $0x188] sm:$0xff] }
 0x3b1   : > { %4844 = vmatpush1.bf16.msra.mxu0 %v9043_v19  ;;  %5059 = vmatpush1.bf16.msra.mxu1 %v9046_v20  ;;  %v9117_v19 = vld [vmem:[%s9794_s15 + $0x9e4] ss:$16 sps:$4 sm:$0xff]   ;;  %v9120_v20 = vld [vmem:[%s9794_s15 + $0x9ec] ss:$16 sps:$4 sm:$0xff]  }
 0x3b2   : > { %4845 = vmatprep.subr.bf16.mxu0 %v9051_v21  ;;  %5060 = vmatprep.subr.bf16.mxu1 %v9054_v22  ;;  %v5123_v21 = vld [vmem:[%s9809_s6] sm:$0xff] }
 0x3b3   : > { %v5127_v22 = vld [vmem:[%s9809_s6 + $0x20] sm:$0xff] }
 0x3b4   : > { %v7820_v27 = vcombine.high %v5123_v21, %v5127_v22  ;;  %v7819_v31 = vcombine.low %v5123_v21, %v5127_v22  ;;  %v5179_v21 = vld [vmem:[%s9809_s6 + $0x1c0] sm:$0xff] }
 0x3b5   : > { %4846 = vmatpush1.bf16.msra.mxu0 %v9049_v5  ;;  %5061 = vmatpush1.bf16.msra.mxu1 %v9052_v23  ;;  %v5124_v5 = vld [vmem:[%s9809_s6 + $0x8] sm:$0xff]  ;;  %v5183_v22 = vld [vmem:[%s9809_s6 + $0x1e0] sm:$0xff] }
 0x3b6   : > { %4847 = vmatprep.subr.bf16.mxu0 %v9057_v24  ;;  %5062 = vmatprep.subr.bf16.mxu1 %v9060_v25  ;;  %v5128_v23 = vld [vmem:[%s9809_s6 + $0x28] sm:$0xff]  ;;  %v2711_v24 = vmul.f32 %v9200_v14, %v10466_v33 }
 0x3b7   : > { %v9115_v25 = vld [vmem:[%s9794_s15 + $0x9e0] ss:$16 sps:$4 sm:$0xff]   ;;  %v7821_v33 = vcombine.low %v5124_v5, %v5128_v23 }
 0x3b8   : > { %v5176_v14 = vld [vmem:[%s9809_s6 + $0x1a8] sm:$0xff] }
 0x3b9   : > { %4848 = vmatpush1.bf16.msra.mxu0 %v9055_v28  ;;  %5063 = vmatpush1.bf16.msra.mxu1 %v9058_v30  ;;  %v7822_v28 = vcombine.high %v5124_v5, %v5128_v23  ;;  %v5131_v30 = vld [vmem:[%s9809_s6 + $0x40] sm:$0xff]  ;;  %v5180_v5 = vld [vmem:[%s9809_s6 + $0x1c8] sm:$0xff] }
 0x3ba   : > { %4849 = vmatprep.subr.bf16.mxu0 %v9063_v47  ;;  %5064 = vmatprep.subr.bf16.mxu1 %v9066_v32  ;;  %v5135_v47 = vld [vmem:[%s9809_s6 + $0x60] sm:$0xff]  ;;  %v5132_v32 = vld [vmem:[%s9809_s6 + $0x48] sm:$0xff] }
 0x3bb   : > { %v7828_v17 = vcombine.high %v5131_v30, %v5135_v47  ;;  %v5184_v23 = vld [vmem:[%s9809_s6 + $0x1e8] sm:$0xff] }
 0x3bd   : > { %4850 = vmatpush1.bf16.msra.mxu0 %v9061_v16  ;;  %5065 = vmatpush1.bf16.msra.mxu1 %v9064_v34  ;;  %v5136_v16 = vld [vmem:[%s9809_s6 + $0x68] sm:$0xff]  ;;  %v2721_v34 = vpack.c.bf16 %v2711_v24, %v2701_v9  ;;  %v7869_v24 = vcombine.low %v5172_v13, %v5176_v14 }
 0x3be   : > { %4851 = vmatprep.subr.bf16.mxu0 %v9069_v35  ;;  %5066 = vmatprep.subr.bf16.mxu1 %v9072_v36  ;;  %v7830_v35 = vcombine.high %v5132_v32, %v5136_v16  ;;  %v5139_v36 = vld [vmem:[%s9809_s6 + $0x80] sm:$0xff] }
 0x3c1   : > { %4852 = vmatpush1.bf16.msra.mxu0 %v9067_v38  ;;  %5067 = vmatpush1.bf16.msra.mxu1 %v9070_v39  ;;  %v5140_v38 = vld [vmem:[%s9809_s6 + $0x88] sm:$0xff] }
 0x3c2   : > { %4853 = vmatprep.subr.bf16.mxu0 %v9075_v41  ;;  %5068 = vmatprep.subr.bf16.mxu1 %v9078_v42  ;;  %v5144_v39 = vld [vmem:[%s9809_s6 + $0xa8] sm:$0xff]  ;;  %v7827_v41 = vcombine.low %v5131_v30, %v5135_v47  ;;  %v7829_v42 = vcombine.low %v5132_v32, %v5136_v16  ;;  %v7875_v32 = vcombine.low %v5179_v21, %v5183_v22 }
 0x3c3   : > { %v5188_v30 = vld [vmem:[%s9809_s6 + $0x208] sm:$0xff]  ;;  %v7877_v16 = vcombine.low %v5180_v5, %v5184_v23 }
 0x3c4   : > { %v5192_v47 = vld [vmem:[%s9809_s6 + $0x228] sm:$0xff] }
 0x3c5   : > { %4854 = vmatpush1.bf16.msra.mxu0 %v9073_v43  ;;  %5069 = vmatpush1.bf16.msra.mxu1 %v9076_v44  ;;  %v7836_v43 = vcombine.high %v5139_v36, %v5143_v37  ;;  %v7838_v44 = vcombine.high %v5140_v38, %v5144_v39 }
 0x3c6   : > { %4855 = vmatprep.subr.bf16.mxu0 %v9081_v45  ;;  %5070 = vmatprep.subr.bf16.mxu1 %v9084_v46  ;;  %v5147_v45 = vld [vmem:[%s9809_s6 + $0xc0] sm:$0xff] }
 0x3c7   : > { %v5151_v46 = vld [vmem:[%s9809_s6 + $0xe0] sm:$0xff] }
 0x3c8   : > { %v7844_v29 = vcombine.high %v5147_v45, %v5151_v46  ;;  %v7843_v63 = vcombine.low %v5147_v45, %v5151_v46  ;;  %v5208_v45 = vld [vmem:[%s9809_s6 + $0x2a8] sm:$0xff] }
 0x3c9   : > { %4856 = vmatpush1.bf16.msra.mxu0 %v9079_v49  ;;  %5071 = vmatpush1.bf16.msra.mxu1 %v9082_v51  ;;  %v5148_v49 = vld [vmem:[%s9809_s6 + $0xc8] sm:$0xff] }
 0x3ca   : > { %4857 = vmatprep.subr.bf16.mxu0 %v9087_v52  ;;  %5072 = vmatprep.subr.bf16.mxu1 %v9090_v55  ;;  %v5152_v51 = vld [vmem:[%s9809_s6 + $0xe8] sm:$0xff]  ;;  %v7835_v52 = vcombine.low %v5139_v36, %v5143_v37  ;;  %v7837_v55 = vcombine.low %v5140_v38, %v5144_v39  ;;  %v7885_v38 = vcombine.low %v5188_v30, %v5192_v47 }
 0x3cb   : > { %v7846_v58 = vcombine.high %v5148_v49, %v5152_v51  ;;  %v7845_v1 = vcombine.low %v5148_v49, %v5152_v51  ;;  %v5200_v36 = vld [vmem:[%s9809_s6 + $0x268] sm:$0xff] }
 0x3cd   : > { %4858 = vmatpush1.bf16.msra.mxu0 %v9085_v40  ;;  %5073 = vmatpush1.bf16.msra.mxu1 %v9088_v7  ;;  %v5155_v40 = vld [vmem:[%s9809_s6 + $0x100] sm:$0xff] }
 0x3ce   : > { %4859 = vmatprep.subr.bf16.mxu0 %v9093_v61  ;;  %5074 = vmatprep.subr.bf16.mxu1 %v9096_v62  ;;  %v5159_v7 = vld [vmem:[%s9809_s6 + $0x120] sm:$0xff]  ;;  %v5156_v61 = vld [vmem:[%s9809_s6 + $0x108] sm:$0xff] }
 0x3cf   : > { %v5160_v62 = vld [vmem:[%s9809_s6 + $0x128] sm:$0xff] }
 0x3d1   : > { %4860 = vmatpush1.bf16.msra.mxu0 %v9091_v2  ;;  %5075 = vmatpush1.bf16.msra.mxu1 %v9094_v3  ;;  %v7852_v2 = vcombine.high %v5155_v40, %v5159_v7  ;;  %v7854_v3 = vcombine.high %v5156_v61, %v5160_v62 }
 0x3d2   : > { %4861 = vmatprep.subr.bf16.mxu0 %v9099_v57  ;;  %5076 = vmatprep.subr.bf16.mxu1 %v9102_v59  ;;  %v5163_v57 = vld [vmem:[%s9809_s6 + $0x140] sm:$0xff] }
 0x3d3   : > { %v5167_v59 = vld [vmem:[%s9809_s6 + $0x160] sm:$0xff] }
 0x3d5   : > { %4862 = vmatpush1.bf16.msra.mxu0 %v9097_v4  ;;  %5077 = vmatpush1.bf16.msra.mxu1 %v9100_v11  ;;  %v5164_v4 = vld [vmem:[%s9809_s6 + $0x148] sm:$0xff] }
 0x3d6   : > { %4863 = vmatprep.subr.bf16.mxu0 %v9105_v6  ;;  %5078 = vmatprep.subr.bf16.mxu1 %v9108_v8  ;;  %v5168_v11 = vld [vmem:[%s9809_s6 + $0x168] sm:$0xff]  ;;  %v7851_v6 = vcombine.low %v5155_v40, %v5159_v7  ;;  %v7853_v8 = vcombine.low %v5156_v61, %v5160_v62 }
 0x3d7   : > { %v5216_v40 = vld [vmem:[%s9809_s6 + $0x2e8] sm:$0xff] }
 0x3d9   : > { %4864 = vmatpush1.bf16.msra.mxu0 %v9103_v60  ;;  %5079 = vmatpush1.bf16.msra.mxu1 %v9106_v0  ;;  %v7860_v60 = vcombine.high %v5163_v57, %v5167_v59  ;;  %v7862_v0 = vcombine.high %v5164_v4, %v5168_v11 }
 0x3da   : > { %4865 = vmatprep.subr.bf16.mxu0 %v9111_v10  ;;  %5080 = vmatprep.subr.bf16.mxu1 %v9114_v12  ;;  %v5171_v10 = vld [vmem:[%s9809_s6 + $0x180] sm:$0xff] }
 0x3db   : > { %v5175_v12 = vld [vmem:[%s9809_s6 + $0x1a0] sm:$0xff] }
 0x3dc   : > { %v7867_v9 = vcombine.low %v5171_v10, %v5175_v12 }
 0x3dd   : > { %4866 = vmatpush1.bf16.msra.mxu0 %v9109_v15  ;;  %5081 = vmatpush1.bf16.msra.mxu1 %v9112_v18  ;;  %v7859_v15 = vcombine.low %v5163_v57, %v5167_v59  ;;  %v7861_v18 = vcombine.low %v5164_v4, %v5168_v11  ;;  %v5224_v57 = vld [vmem:[%s9809_s6 + $0x328] sm:$0xff] }
 0x3de   : > { %4867 = vmatprep.subr.bf16.mxu0 %v9117_v19  ;;  %5082 = vmatprep.subr.bf16.mxu1 %v9120_v20  ;;  %v7868_v19 = vcombine.high %v5171_v10, %v5175_v12  ;;  %v7870_v20 = vcombine.high %v5172_v13, %v5176_v14  ;;  %v5232_v10 = vld [vmem:[%s9809_s6 + $0x368] sm:$0xff] }
 0x3e1   : > { %4868 = vmatpush1.bf16.msra.mxu0 %v9115_v25  ;;  %5083 = vmatpush1.bf16.msra.mxu1 %v9118_v26  ;;  %v7876_v25 = vcombine.high %v5179_v21, %v5183_v22  ;;  %v7878_v26 = vcombine.high %v5180_v5, %v5184_v23  ;;  %v5239_v21 = vld [vmem:[%s9809_s6 + $0x3a0] sm:$0xff]  ;;  %v5236_v22 = vld [vmem:[%s9809_s6 + $0x388] sm:$0xff] }
 0x3e2   : > { %6659 = vmatprep.subr.bf16.mxu0 %v7820_v27  ;;  %6745 = vmatprep.subr.bf16.mxu1 %v7822_v28  ;;  %v5187_v27 = vld [vmem:[%s9809_s6 + $0x200] sm:$0xff]  ;;  %v5240_v23 = vld [vmem:[%s9809_s6 + $0x3a8] sm:$0xff] }
 0x3e3   : > { %v5191_v28 = vld [vmem:[%s9809_s6 + $0x220] sm:$0xff] }
 0x3e4   : > { %4870 = vmatmul.mubr.bf16.vlgmr.msra.gmra.mrb[0].mxu0 %v2721_v34  ;;  %5085 = vmatmul.mubr.bf16.vlgmr.msra.gmra.mrb[0].mxu1 %v2721_v34  ;;  %v7884_v34 = vcombine.high %v5187_v27, %v5191_v28  ;;  %v7883_v37 = vcombine.low %v5187_v27, %v5191_v28  ;;  %v5247_v27 = vld [vmem:[%s9809_s6 + $0x3e0] sm:$0xff]  ;;  %v5244_v28 = vld [vmem:[%s9809_s6 + $0x3c8] sm:$0xff] }
 0x3e5   : > { %6660 = vmatpush1.bf16.msra.mxu0 %v7819_v31  ;;  %6746 = vmatpush1.bf16.msra.mxu1 %v7821_v33  ;;  %v7886_v31 = vcombine.high %v5188_v30, %v5192_v47  ;;  %v5195_v33 = vld [vmem:[%s9809_s6 + $0x240] sm:$0xff]  ;;  %v5248_v47 = vld [vmem:[%s9809_s6 + $0x3e8] sm:$0xff] }
 0x3e6   : > { %6661 = vmatprep.subr.bf16.mxu0 %v7828_v17  ;;  %6747 = vmatprep.subr.bf16.mxu1 %v7830_v35  ;;  %v5199_v17 = vld [vmem:[%s9809_s6 + $0x260] sm:$0xff]  ;;  %v5196_v35 = vld [vmem:[%s9809_s6 + $0x248] sm:$0xff] }
 0x3e7   : > { %v7892_v39 = vcombine.high %v5195_v33, %v5199_v17  ;;  %v7891_v46 = vcombine.low %v5195_v33, %v5199_v17  ;;  %v7893_v49 = vcombine.low %v5196_v35, %v5200_v36  ;;  %v10578_v33 = vld [vmem:[%s9809_s6 + $0x420] sm:$0xff]  ;;  %v10581_v17 = vld [vmem:[%s9809_s6 + $0x408] sm:$0xff] }
 0x3e9   : > { %6662 = vmatpush1.bf16.msra.mxu0 %v7827_v41  ;;  %6748 = vmatpush1.bf16.msra.mxu1 %v7829_v42  ;;  %v7894_v41 = vcombine.high %v5196_v35, %v5200_v36  ;;  %v5203_v42 = vld [vmem:[%s9809_s6 + $0x280] sm:$0xff]  ;;  %v10586_v36 = vld [vmem:[%s9809_s6 + $0x428] sm:$0xff] }
 0x3ea   : > { %6663 = vmatprep.subr.bf16.mxu0 %v7836_v43  ;;  %6749 = vmatprep.subr.bf16.mxu1 %v7838_v44  ;;  %v5207_v43 = vld [vmem:[%s9809_s6 + $0x2a0] sm:$0xff]  ;;  %v5204_v44 = vld [vmem:[%s9809_s6 + $0x288] sm:$0xff] }
 0x3eb   : > { %v7900_v51 = vcombine.high %v5203_v42, %v5207_v43  ;;  %v7899_v7 = vcombine.low %v5203_v42, %v5207_v43  ;;  %v7901_v61 = vcombine.low %v5204_v44, %v5208_v45 }
 0x3ed   : > { %6664 = vmatpush1.bf16.msra.mxu0 %v7835_v52  ;;  %6750 = vmatpush1.bf16.msra.mxu1 %v7837_v55  ;;  %v7902_v52 = vcombine.high %v5204_v44, %v5208_v45  ;;  %v5211_v55 = vld [vmem:[%s9809_s6 + $0x2c0] sm:$0xff] }
 0x3ee   : > { %6665 = vmatprep.subr.bf16.mxu0 %v7844_v29  ;;  %6751 = vmatprep.subr.bf16.mxu1 %v7846_v58  ;;  %v5215_v29 = vld [vmem:[%s9809_s6 + $0x2e0] sm:$0xff]  ;;  %v5212_v58 = vld [vmem:[%s9809_s6 + $0x2c8] sm:$0xff] }
 0x3ef   : > { %v7908_v62 = vcombine.high %v5211_v55, %v5215_v29  ;;  %v7907_v59 = vcombine.low %v5211_v55, %v5215_v29  ;;  %v7909_v4 = vcombine.low %v5212_v58, %v5216_v40 }
 0x3f1   : > { %6666 = vmatpush1.bf16.msra.mxu0 %v7843_v63  ;;  %6752 = vmatpush1.bf16.msra.mxu1 %v7845_v1  ;;  %v7910_v63 = vcombine.high %v5212_v58, %v5216_v40  ;;  %v5219_v1 = vld [vmem:[%s9809_s6 + $0x300] sm:$0xff] }
 0x3f2   : > { %6667 = vmatprep.subr.bf16.mxu0 %v7852_v2  ;;  %6753 = vmatprep.subr.bf16.mxu1 %v7854_v3  ;;  %v5223_v2 = vld [vmem:[%s9809_s6 + $0x320] sm:$0xff]  ;;  %v5220_v3 = vld [vmem:[%s9809_s6 + $0x308] sm:$0xff] }
 0x3f3   : > { %v7916_v11 = vcombine.high %v5219_v1, %v5223_v2  ;;  %v7915_v12 = vcombine.low %v5219_v1, %v5223_v2  ;;  %v7917_v13 = vcombine.low %v5220_v3, %v5224_v57 }
 0x3f5   : > { %6668 = vmatpush1.bf16.msra.mxu0 %v7851_v6  ;;  %6754 = vmatpush1.bf16.msra.mxu1 %v7853_v8  ;;  %v7918_v6 = vcombine.high %v5220_v3, %v5224_v57  ;;  %v5227_v8 = vld [vmem:[%s9809_s6 + $0x340] sm:$0xff] }
 0x3f6   : > { %6669 = vmatprep.subr.bf16.mxu0 %v7860_v60  ;;  %6755 = vmatprep.subr.bf16.mxu1 %v7862_v0  ;;  %v5231_v60 = vld [vmem:[%s9809_s6 + $0x360] sm:$0xff]  ;;  %v5228_v0 = vld [vmem:[%s9809_s6 + $0x348] sm:$0xff] }
 0x3f7   : > { %v7924_v14 = vcombine.high %v5227_v8, %v5231_v60 }
 0x3f9   : > { %6670 = vmatpush1.bf16.msra.mxu0 %v7859_v15  ;;  %6756 = vmatpush1.bf16.msra.mxu1 %v7861_v18  ;;  %v7926_v15 = vcombine.high %v5228_v0, %v5232_v10  ;;  %v7923_v18 = vcombine.low %v5227_v8, %v5231_v60 }
 0x3fa   : > { %6671 = vmatprep.subr.bf16.mxu0 %v7868_v19  ;;  %6757 = vmatprep.subr.bf16.mxu1 %v7870_v20  ;;  %v7925_v19 = vcombine.low %v5228_v0, %v5232_v10  ;;  %v5235_v20 = vld [vmem:[%s9809_s6 + $0x380] sm:$0xff] }
 0x3fb   : > { %v7932_v5 = vcombine.high %v5235_v20, %v5239_v21 }
 0x3fd   : > { %6672 = vmatpush1.bf16.msra.mxu0 %v7867_v9  ;;  %6758 = vmatpush1.bf16.msra.mxu1 %v7869_v24  ;;  %v7931_v9 = vcombine.low %v5235_v20, %v5239_v21  ;;  %v7933_v24 = vcombine.low %v5236_v22, %v5240_v23  ;;  %v5263_v20 = vld [vmem:[%s9809_s6 + $0x460] sm:$0xff]  ;;  %v5260_v21 = vld [vmem:[%s9809_s6 + $0x448] sm:$0xff] }
 0x3fe   : > { %6673 = vmatprep.subr.bf16.mxu0 %v7876_v25  ;;  %6759 = vmatprep.subr.bf16.mxu1 %v7878_v26  ;;  %v7934_v25 = vcombine.high %v5236_v22, %v5240_v23  ;;  %v5243_v26 = vld [vmem:[%s9809_s6 + $0x3c0] sm:$0xff]  ;;  %v5264_v22 = vld [vmem:[%s9809_s6 + $0x468] sm:$0xff] }
 0x3ff   : > { %v7940_v30 = vcombine.high %v5243_v26, %v5247_v27 }
 0x401   : > { %6674 = vmatpush1.bf16.msra.mxu0 %v7875_v32  ;;  %6760 = vmatpush1.bf16.msra.mxu1 %v7877_v16  ;;  %v7939_v32 = vcombine.low %v5243_v26, %v5247_v27  ;;  %v7941_v16 = vcombine.low %v5244_v28, %v5248_v47  ;;  %v5271_v26 = vld [vmem:[%s9809_s6 + $0x4a0] sm:$0xff]  ;;  %v5268_v27 = vld [vmem:[%s9809_s6 + $0x488] sm:$0xff] }
 0x402   : > { %6675 = vmatprep.subr.bf16.mxu0 %v7884_v34  ;;  %6761 = vmatprep.subr.bf16.mxu1 %v7886_v31  ;;  %v7942_v34 = vcombine.high %v5244_v28, %v5248_v47  ;;  %v10575_v31 = vld [vmem:[%s9809_s6 + $0x400] sm:$0xff]  ;;  %v5272_v28 = vld [vmem:[%s9809_s6 + $0x4a8] sm:$0xff]  ;;  %v7957_v47 = vcombine.low %v5260_v21, %v5264_v22 }
 0x403   : > { %v7948_v35 = vcombine.high %v10575_v31, %v10578_v33 }
 0x405   : > { %6676 = vmatpush1.bf16.msra.mxu0 %v7883_v37  ;;  %6762 = vmatpush1.bf16.msra.mxu1 %v7885_v38  ;;  %v7947_v37 = vcombine.low %v10575_v31, %v10578_v33  ;;  %v7949_v38 = vcombine.low %v10581_v17, %v10586_v36  ;;  %v5279_v31 = vld [vmem:[%s9809_s6 + $0x4e0] sm:$0xff]  ;;  %v5276_v33 = vld [vmem:[%s9809_s6 + $0x4c8] sm:$0xff] }
 0x406   : > { %6677 = vmatprep.subr.bf16.mxu0 %v7892_v39  ;;  %6763 = vmatprep.subr.bf16.mxu1 %v7894_v41  ;;  %v7950_v39 = vcombine.high %v10581_v17, %v10586_v36  ;;  %v3043_v41 = vld [vmem:[%s9796_s10] sm:$0xf]  ;;  %v7965_v36 = vcombine.low %v5268_v27, %v5272_v28 }
 0x407   : > { %v3048_v42 = vrot.slane %v3043_v41, %v10132_v54  ;;  %v3056_v43 = vrot.slane %v3043_v41, %v2513_v56  ;;  %v3052_v44 = vrot.slane %v3043_v41, %v10129_v53  ;;  %v3060_v45 = vrot.slane %v3043_v41, %v2517_v50  ;;  %v5287_v41 = vld [vmem:[%s9809_s6 + $0x520] sm:$0xff] }
 0x409   : > { %6678 = vmatpush1.bf16.msra.mxu0 %v7891_v46  ;;  %6764 = vmatpush1.bf16.msra.mxu1 %v7893_v49 }
 0x40a   : > { %6679 = vmatprep.subr.bf16.mxu0 %v7900_v51  ;;  %6765 = vmatprep.subr.bf16.mxu1 %v7902_v52 }
 0x40d   : > { %6680 = vmatpush1.bf16.msra.mxu0 %v7899_v7  ;;  %6766 = vmatpush1.bf16.msra.mxu1 %v7901_v61 }
 0x40e   : > { %6681 = vmatprep.subr.bf16.mxu0 %v7908_v62  ;;  %6767 = vmatprep.subr.bf16.mxu1 %v7910_v63 }
 0x411   : > { %6682 = vmatpush1.bf16.msra.mxu0 %v7907_v59  ;;  %6768 = vmatpush1.bf16.msra.mxu1 %v7909_v4 }
 0x412   : > { %6683 = vmatprep.subr.bf16.mxu0 %v7916_v11  ;;  %6769 = vmatprep.subr.bf16.mxu1 %v7918_v6 }
 0x415   : > { %6684 = vmatpush1.bf16.msra.mxu0 %v7915_v12  ;;  %6770 = vmatpush1.bf16.msra.mxu1 %v7917_v13  ;;  %v5259_v13 = vld [vmem:[%s9809_s6 + $0x440] sm:$0xff] }
 0x416   : > { %6685 = vmatprep.subr.bf16.mxu0 %v7924_v14  ;;  %6771 = vmatprep.subr.bf16.mxu1 %v7926_v15 }
 0x419   : > { %6686 = vmatpush1.bf16.msra.mxu0 %v7923_v18  ;;  %6772 = vmatpush1.bf16.msra.mxu1 %v7925_v19 }
 0x41a   : > { %6687 = vmatprep.subr.bf16.mxu0 %v7932_v5  ;;  %6773 = vmatprep.subr.bf16.mxu1 %v7934_v25  ;;  %v7958_v25 = vcombine.high %v5260_v21, %v5264_v22  ;;  %v5323_v21 = vld [vmem:[%s9809_s6 + $0x640] sm:$0xff] }
 0x41b   : > { %v5327_v22 = vld [vmem:[%s9809_s6 + $0x660] sm:$0xff] }
 0x41d   : > { %6688 = vmatpush1.bf16.msra.mxu0 %v7931_v9  ;;  %6774 = vmatpush1.bf16.msra.mxu1 %v7933_v24  ;;  %v5267_v9 = vld [vmem:[%s9809_s6 + $0x480] sm:$0xff]  ;;  %v7956_v24 = vcombine.high %v5259_v13, %v5263_v20 }
 0x41e   : > { %6689 = vmatprep.subr.bf16.mxu0 %v7940_v30  ;;  %6775 = vmatprep.subr.bf16.mxu1 %v7942_v34  ;;  %v7955_v30 = vcombine.low %v5259_v13, %v5263_v20  ;;  %v5275_v34 = vld [vmem:[%s9809_s6 + $0x4c0] sm:$0xff]  ;;  %v7963_v17 = vcombine.low %v5267_v9, %v5271_v26 }
 0x421   : > { %6690 = vmatpush1.bf16.msra.mxu0 %v7939_v32  ;;  %6776 = vmatpush1.bf16.msra.mxu1 %v7941_v16  ;;  %v7964_v32 = vcombine.high %v5267_v9, %v5271_v26  ;;  %v7966_v16 = vcombine.high %v5268_v27, %v5272_v28  ;;  %v5324_v9 = vld [vmem:[%s9809_s6 + $0x648] sm:$0xff]  ;;  %v8020_v27 = vcombine.high %v5323_v21, %v5327_v22 }
 0x422   : > { %6702 = vmatprep.subr.bf16.mxu0 %v7948_v35  ;;  %6788 = vmatprep.subr.bf16.mxu1 %v7950_v39  ;;  %v5280_v35 = vld [vmem:[%s9809_s6 + $0x4e8] sm:$0xff]  ;;  %v5283_v39 = vld [vmem:[%s9809_s6 + $0x500] sm:$0xff] }
 0x4b7   : > { %v4871_v46 = vpop.f32.mrb[0].mxu0  ;;  %v5086_v49 = vpop.f32.mrb[0].mxu1 }
 0x4b8   : > { %v8100_v51 = vadd.f32 %v4871_v46, %v3048_v42  ;;  %v8104_v52 = vadd.f32 %v5086_v49, %v3056_v43  ;;  %v4873_v55 = vpop.f32.mrb[1].mxu0  ;;  %v5088_v29 = vpop.f32.mrb[1].mxu1  ;;  %v7980_v46 = vcombine.high %v5283_v39, %v5287_v41 }
 0x4b9   : > { %v8101_v58 = vadd.f32 %v4873_v55, %v3052_v44  ;;  %v8105_v40 = vadd.f32 %v5088_v29, %v3060_v45  ;;  %v4875_v7 = vpop.f32.mrb[2].mxu0  ;;  %v5090_v61 = vpop.f32.mrb[2].mxu1  ;;  %v5292_v55 = vld [vmem:[%s9809_s6 + $0x548] sm:$0xff] }
 0x4ba   : > { %vm5095_vm0 = vcmp.gt.f32.partialorder %v8100_v51, 0.0  ;;  %v5103_v54 = vmul.f32 0.01, %v8100_v51  ;;  %vm5097_vm1 = vcmp.gt.f32.partialorder %v8104_v52, 0.0  ;;  %v5105_v62 = vmul.f32 0.01, %v8104_v52 }
 0x4bb   : > { %vm5096_vm2 = vcmp.gt.f32.partialorder %v8101_v58, 0.0  ;;  %v5104_v56 = vmul.f32 0.01, %v8101_v58  ;;  %vm5098_vm3 = vcmp.gt.f32.partialorder %v8105_v40, 0.0  ;;  %v5106_v53 = vmul.f32 0.01, %v8105_v40 }
 0x4bc   : > { %v8102_v48 = vadd.f32 %v4875_v7, %v3048_v42  ;;  %v8106_v50 = vadd.f32 %v5090_v61, %v3056_v43  ;;  %v4877_v63 = vpop.f32.mrb[3].mxu0  ;;  %v5092_v1 = vpop.f32.mrb[3].mxu1  ;;  %v5111_v2 = vsel %vm5095_vm0, %v8100_v51, %v5103_v54  ;;  %v5113_v3 = vsel %vm5097_vm1, %v8104_v52, %v5105_v62  ;;  %v5284_v42 = vld [vmem:[%s9809_s6 + $0x508] sm:$0xff]  ;;  %v5291_v51 = vld [vmem:[%s9809_s6 + $0x540] sm:$0xff] }
 0x4bd   : > { %v8103_v57 = vadd.f32 %v4877_v63, %v3052_v44  ;;  %v8107_v59 = vadd.f32 %v5092_v1, %v3060_v45  ;;  %v5112_v60 = vsel %vm5096_vm2, %v8101_v58, %v5104_v56  ;;  %v5114_v0 = vsel %vm5098_vm3, %v8105_v40, %v5106_v53  ;;  %v5288_v43 = vld [vmem:[%s9809_s6 + $0x528] sm:$0xff]  ;;  %v5295_v52 = vld [vmem:[%s9809_s6 + $0x560] sm:$0xff] }
 0x4be   : > { %vm5099_vm4 = vcmp.gt.f32.partialorder %v8102_v48, 0.0  ;;  %v5107_v4 = vmul.f32 0.01, %v8102_v48  ;;  %vm5101_vm5 = vcmp.gt.f32.partialorder %v8106_v50, 0.0  ;;  %v5109_v11 = vmul.f32 0.01, %v8106_v50 }
 0x4bf   : > { %vm5100_vm6 = vcmp.gt.f32.partialorder %v8103_v57, 0.0  ;;  %v5108_v6 = vmul.f32 0.01, %v8103_v57  ;;  %vm5102_vm7 = vcmp.gt.f32.partialorder %v8107_v59, 0.0  ;;  %v5110_v8 = vmul.f32 0.01, %v8107_v59 }
 0x4c0   : > { %v5115_v10 = vsel %vm5099_vm4, %v8102_v48, %v5107_v4  ;;  %v5117_v12 = vsel %vm5101_vm5, %v8106_v50, %v5109_v11  ;;  %v7971_v44 = vcombine.low %v5275_v34, %v5279_v31  ;;  %v7973_v45 = vcombine.low %v5276_v33, %v5280_v35  ;;  %v5296_v29 = vld [vmem:[%s9809_s6 + $0x568] sm:$0xff]  ;;  %v5299_v54 = vld [vmem:[%s9809_s6 + $0x580] sm:$0xff] }
 0x4c1   : > { %v10604_v14 = vpack.c.bf16 %v5115_v10, %v5111_v2  ;;  %v10606_v15 = vpack.c.bf16 %v5117_v12, %v5113_v3  ;;  %v5116_v18 = vsel %vm5100_vm6, %v8103_v57, %v5108_v6  ;;  %v5118_v19 = vsel %vm5102_vm7, %v8107_v59, %v5110_v8  ;;  %v5303_v62 = vld [vmem:[%s9809_s6 + $0x5a0] sm:$0xff]  ;;  %v5300_v56 = vld [vmem:[%s9809_s6 + $0x588] sm:$0xff] }
 0x4c2   : > { %v10611_v5 = vpack.c.bf16 %v5116_v18, %v5112_v60  ;;  %v10613_v23 = vpack.c.bf16 %v5118_v19, %v5114_v0  ;;  %v7982_v49 = vcombine.high %v5284_v42, %v5288_v43  ;;  %v7979_v58 = vcombine.low %v5283_v39, %v5287_v41  ;;  %v5304_v53 = vld [vmem:[%s9809_s6 + $0x5a8] sm:$0xff]  ;;  %v5307_v2 = vld [vmem:[%s9809_s6 + $0x5c0] sm:$0xff] }
 0x4c3   : > { %v7981_v40 = vcombine.low %v5284_v42, %v5288_v43  ;;  %v7988_v7 = vcombine.high %v5291_v51, %v5295_v52  ;;  %v7990_v61 = vcombine.high %v5292_v55, %v5296_v29  ;;  %v7987_v48 = vcombine.low %v5291_v51, %v5295_v52  ;;  %v5311_v3 = vld [vmem:[%s9809_s6 + $0x5e0] sm:$0xff]  ;;  %v5308_v57 = vld [vmem:[%s9809_s6 + $0x5c8] sm:$0xff] }
 0x4c4   : > { %6691 = vmatprep.mubr.bf16.mxu0 %v10611_v5  ;;  %6777 = vmatprep.mubr.bf16.mxu1 %v10611_v5  ;;  %v7989_v50 = vcombine.low %v5292_v55, %v5296_v29  ;;  %v7996_v63 = vcombine.high %v5299_v54, %v5303_v62  ;;  %v7998_v1 = vcombine.high %v5300_v56, %v5304_v53  ;;  %v5312_v59 = vld [vmem:[%s9809_s6 + $0x5e8] sm:$0xff]  ;;  %v5315_v60 = vld [vmem:[%s9809_s6 + $0x600] sm:$0xff] }
 0x4c5   : > { %6692 = vmatmul.mubr.bf16.vlgmr.msra.gmra.mrb[4].mxu0 %v10604_v14  ;;  %6778 = vmatmul.mubr.bf16.vlgmr.msra.gmra.mrb[4].mxu1 %v10604_v14  ;;  %v7995_v4 = vcombine.low %v5299_v54, %v5303_v62  ;;  %v7997_v11 = vcombine.low %v5300_v56, %v5304_v53  ;;  %v8004_v6 = vcombine.high %v5307_v2, %v5311_v3  ;;  %v5319_v0 = vld [vmem:[%s9809_s6 + $0x620] sm:$0xff]  ;;  %v5316_v10 = vld [vmem:[%s9809_s6 + $0x608] sm:$0xff] }
 0x4c6   : > { %6703 = vmatpush1.bf16.msra.mxu0 %v7947_v37  ;;  %6789 = vmatpush1.bf16.msra.mxu1 %v7949_v38  ;;  %v7972_v37 = vcombine.high %v5275_v34, %v5279_v31  ;;  %v7974_v38 = vcombine.high %v5276_v33, %v5280_v35  ;;  %v8006_v8 = vcombine.high %v5308_v57, %v5312_v59  ;;  %v5320_v12 = vld [vmem:[%s9809_s6 + $0x628] sm:$0xff] }
 0x4c7   : > { %6734 = vmatprep.mubr.bf16.mxu0 %v10613_v23  ;;  %6820 = vmatprep.mubr.bf16.mxu1 %v10613_v23  ;;  %v8003_v13 = vcombine.low %v5307_v2, %v5311_v3  ;;  %v8005_v18 = vcombine.low %v5308_v57, %v5312_v59  ;;  %v8012_v19 = vcombine.high %v5315_v60, %v5319_v0 }
 0x4c8   : > { %6704 = vmatprep.subr.bf16.mxu0 %v7956_v24  ;;  %6790 = vmatprep.subr.bf16.mxu1 %v7958_v25  ;;  %v8014_v20 = vcombine.high %v5316_v10, %v5320_v12  ;;  %v5328_v24 = vld [vmem:[%s9809_s6 + $0x668] sm:$0xff]  ;;  %v8011_v25 = vcombine.low %v5315_v60, %v5319_v0  ;;  %v8013_v26 = vcombine.low %v5316_v10, %v5320_v12 }
 0x4c9   : > { %v8022_v28 = vcombine.high %v5324_v9, %v5328_v24  ;;  %v8019_v34 = vcombine.low %v5323_v21, %v5327_v22  ;;  %v8021_v31 = vcombine.low %v5324_v9, %v5328_v24 }
 0x4ca   : > { %6705 = vmatpush1.bf16.msra.mxu0 %v7955_v30  ;;  %6791 = vmatpush1.bf16.msra.mxu1 %v7957_v47  ;;  %v5331_v30 = vld [vmem:[%s9809_s6 + $0x680] sm:$0xff] }
 0x4cb   : > { %6706 = vmatprep.subr.bf16.mxu0 %v7964_v32  ;;  %6792 = vmatprep.subr.bf16.mxu1 %v7966_v16  ;;  %v5335_v47 = vld [vmem:[%s9809_s6 + $0x6a0] sm:$0xff]  ;;  %v5332_v32 = vld [vmem:[%s9809_s6 + $0x688] sm:$0xff] }
 0x4cc   : > { %v5336_v16 = vld [vmem:[%s9809_s6 + $0x6a8] sm:$0xff]  ;;  %v8028_v33 = vcombine.high %v5331_v30, %v5335_v47  ;;  %v8027_v39 = vcombine.low %v5331_v30, %v5335_v47 }
 0x4cd   : > { %v8030_v35 = vcombine.high %v5332_v32, %v5336_v16  ;;  %v8029_v41 = vcombine.low %v5332_v32, %v5336_v16 }
 0x4ce   : > { %6707 = vmatpush1.bf16.msra.mxu0 %v7963_v17  ;;  %6793 = vmatpush1.bf16.msra.mxu1 %v7965_v36  ;;  %v5339_v17 = vld [vmem:[%s9809_s6 + $0x6c0] sm:$0xff] }
 0x4cf   : > { %6708 = vmatprep.subr.bf16.mxu0 %v7972_v37  ;;  %6794 = vmatprep.subr.bf16.mxu1 %v7974_v38  ;;  %v5343_v36 = vld [vmem:[%s9809_s6 + $0x6e0] sm:$0xff]  ;;  %v5340_v37 = vld [vmem:[%s9809_s6 + $0x6c8] sm:$0xff] }
 0x4d0   : > { %v5344_v38 = vld [vmem:[%s9809_s6 + $0x6e8] sm:$0xff]  ;;  %v8036_v42 = vcombine.high %v5339_v17, %v5343_v36  ;;  %v8035_v51 = vcombine.low %v5339_v17, %v5343_v36 }
 0x4d1   : > { %v8038_v43 = vcombine.high %v5340_v37, %v5344_v38  ;;  %v8037_v52 = vcombine.low %v5340_v37, %v5344_v38 }
 0x4d2   : > { %6709 = vmatpush1.bf16.msra.mxu0 %v7971_v44  ;;  %6795 = vmatpush1.bf16.msra.mxu1 %v7973_v45  ;;  %v5347_v44 = vld [vmem:[%s9809_s6 + $0x700] sm:$0xff] }
 0x4d3   : > { %6710 = vmatprep.subr.bf16.mxu0 %v7980_v46  ;;  %6796 = vmatprep.subr.bf16.mxu1 %v7982_v49  ;;  %v5351_v45 = vld [vmem:[%s9809_s6 + $0x720] sm:$0xff]  ;;  %v5348_v46 = vld [vmem:[%s9809_s6 + $0x708] sm:$0xff] }
 0x4d4   : > { %v5352_v49 = vld [vmem:[%s9809_s6 + $0x728] sm:$0xff]  ;;  %v8044_v55 = vcombine.high %v5347_v44, %v5351_v45  ;;  %v8043_v54 = vcombine.low %v5347_v44, %v5351_v45 }
 0x4d5   : > { %v8046_v29 = vcombine.high %v5348_v46, %v5352_v49  ;;  %v8045_v62 = vcombine.low %v5348_v46, %v5352_v49  ;;  %v5157_v49 = vld [vmem:[%s9809_s6 + $0x110] sm:$0xff] }
 0x4d6   : > { %6711 = vmatpush1.bf16.msra.mxu0 %v7979_v58  ;;  %6797 = vmatpush1.bf16.msra.mxu1 %v7981_v40  ;;  %v5355_v58 = vld [vmem:[%s9809_s6 + $0x740] sm:$0xff] }
 0x4d7   : > { %6712 = vmatprep.subr.bf16.mxu0 %v7988_v7  ;;  %6798 = vmatprep.subr.bf16.mxu1 %v7990_v61  ;;  %v5359_v40 = vld [vmem:[%s9809_s6 + $0x760] sm:$0xff]  ;;  %v5356_v7 = vld [vmem:[%s9809_s6 + $0x748] sm:$0xff] }
 0x4d8   : > { %v5360_v61 = vld [vmem:[%s9809_s6 + $0x768] sm:$0xff]  ;;  %v8052_v56 = vcombine.high %v5355_v58, %v5359_v40  ;;  %v8051_v2 = vcombine.low %v5355_v58, %v5359_v40 }
 0x4d9   : > { %v8054_v53 = vcombine.high %v5356_v7, %v5360_v61  ;;  %v8053_v3 = vcombine.low %v5356_v7, %v5360_v61  ;;  %v5165_v61 = vld [vmem:[%s9809_s6 + $0x150] sm:$0xff] }
 0x4da   : > { %6713 = vmatpush1.bf16.msra.mxu0 %v7987_v48  ;;  %6799 = vmatpush1.bf16.msra.mxu1 %v7989_v50  ;;  %v5363_v48 = vld [vmem:[%s9809_s6 + $0x780] sm:$0xff] }
 0x4db   : > { %6714 = vmatprep.subr.bf16.mxu0 %v7996_v63  ;;  %6800 = vmatprep.subr.bf16.mxu1 %v7998_v1  ;;  %v5367_v50 = vld [vmem:[%s9809_s6 + $0x7a0] sm:$0xff]  ;;  %v5364_v63 = vld [vmem:[%s9809_s6 + $0x788] sm:$0xff] }
 0x4dc   : > { %v5368_v1 = vld [vmem:[%s9809_s6 + $0x7a8] sm:$0xff]  ;;  %v8060_v57 = vcombine.high %v5363_v48, %v5367_v50  ;;  %v8059_v60 = vcombine.low %v5363_v48, %v5367_v50 }
 0x4dd   : > { %v8062_v59 = vcombine.high %v5364_v63, %v5368_v1  ;;  %v8061_v0 = vcombine.low %v5364_v63, %v5368_v1  ;;  %v5173_v1 = vld [vmem:[%s9809_s6 + $0x190] sm:$0xff] }
 0x4de   : > { %6715 = vmatpush1.bf16.msra.mxu0 %v7995_v4  ;;  %6801 = vmatpush1.bf16.msra.mxu1 %v7997_v11  ;;  %v5371_v4 = vld [vmem:[%s9809_s6 + $0x7c0] sm:$0xff] }
 0x4df   : > { %6716 = vmatprep.subr.bf16.mxu0 %v8004_v6  ;;  %6802 = vmatprep.subr.bf16.mxu1 %v8006_v8  ;;  %v5375_v11 = vld [vmem:[%s9809_s6 + $0x7e0] sm:$0xff]  ;;  %v5372_v6 = vld [vmem:[%s9809_s6 + $0x7c8] sm:$0xff] }
 0x4e0   : > { %v5376_v8 = vld [vmem:[%s9809_s6 + $0x7e8] sm:$0xff]  ;;  %v8068_v10 = vcombine.high %v5371_v4, %v5375_v11  ;;  %v8067_v21 = vcombine.low %v5371_v4, %v5375_v11 }
 0x4e1   : > { %v8070_v12 = vcombine.high %v5372_v6, %v5376_v8  ;;  %v8069_v22 = vcombine.low %v5372_v6, %v5376_v8  ;;  %v5181_v8 = vld [vmem:[%s9809_s6 + $0x1d0] sm:$0xff] }
 0x4e2   : > { %6717 = vmatpush1.bf16.msra.mxu0 %v8003_v13  ;;  %6803 = vmatpush1.bf16.msra.mxu1 %v8005_v18  ;;  %v5125_v13 = vld [vmem:[%s9809_s6 + $0x10] sm:$0xff] }
 0x4e3   : > { %6718 = vmatprep.subr.bf16.mxu0 %v8012_v19  ;;  %6804 = vmatprep.subr.bf16.mxu1 %v8014_v20  ;;  %v5129_v18 = vld [vmem:[%s9809_s6 + $0x30] sm:$0xff]  ;;  %v5126_v19 = vld [vmem:[%s9809_s6 + $0x18] sm:$0xff] }
 0x4e4   : > { %v5130_v20 = vld [vmem:[%s9809_s6 + $0x38] sm:$0xff]  ;;  %v7824_v9 = vcombine.high %v5125_v13, %v5129_v18  ;;  %v7823_v30 = vcombine.low %v5125_v13, %v5129_v18 }
 0x4e5   : > { %v7826_v24 = vcombine.high %v5126_v19, %v5130_v20  ;;  %v7825_v47 = vcombine.low %v5126_v19, %v5130_v20  ;;  %v5189_v20 = vld [vmem:[%s9809_s6 + $0x210] sm:$0xff] }
 0x4e6   : > { %6719 = vmatpush1.bf16.msra.mxu0 %v8011_v25  ;;  %6805 = vmatpush1.bf16.msra.mxu1 %v8013_v26  ;;  %v5133_v25 = vld [vmem:[%s9809_s6 + $0x50] sm:$0xff] }
 0x4e7   : > { %6720 = vmatprep.subr.bf16.mxu0 %v8020_v27  ;;  %6806 = vmatprep.subr.bf16.mxu1 %v8022_v28  ;;  %v5137_v26 = vld [vmem:[%s9809_s6 + $0x70] sm:$0xff]  ;;  %v5134_v27 = vld [vmem:[%s9809_s6 + $0x58] sm:$0xff] }
 0x4e8   : > { %v5138_v28 = vld [vmem:[%s9809_s6 + $0x78] sm:$0xff]  ;;  %v7832_v32 = vcombine.high %v5133_v25, %v5137_v26  ;;  %v7831_v17 = vcombine.low %v5133_v25, %v5137_v26 }
 0x4e9   : > { %v7834_v16 = vcombine.high %v5134_v27, %v5138_v28  ;;  %v7833_v36 = vcombine.low %v5134_v27, %v5138_v28  ;;  %v5197_v28 = vld [vmem:[%s9809_s6 + $0x250] sm:$0xff] }
 0x4ea   : > { %6721 = vmatpush1.bf16.msra.mxu0 %v8019_v34  ;;  %6807 = vmatpush1.bf16.msra.mxu1 %v8021_v31  ;;  %v5141_v34 = vld [vmem:[%s9809_s6 + $0x90] sm:$0xff] }
 0x4eb   : > { %6722 = vmatprep.subr.bf16.mxu0 %v8028_v33  ;;  %6808 = vmatprep.subr.bf16.mxu1 %v8030_v35  ;;  %v5145_v31 = vld [vmem:[%s9809_s6 + $0xb0] sm:$0xff]  ;;  %v5142_v33 = vld [vmem:[%s9809_s6 + $0x98] sm:$0xff] }
 0x4ec   : > { %v5146_v35 = vld [vmem:[%s9809_s6 + $0xb8] sm:$0xff]  ;;  %v7840_v37 = vcombine.high %v5141_v34, %v5145_v31  ;;  %v7839_v44 = vcombine.low %v5141_v34, %v5145_v31 }
 0x4ed   : > { %v7842_v38 = vcombine.high %v5142_v33, %v5146_v35  ;;  %v7841_v45 = vcombine.low %v5142_v33, %v5146_v35  ;;  %v5205_v35 = vld [vmem:[%s9809_s6 + $0x290] sm:$0xff] }
 0x4ee   : > { %6723 = vmatpush1.bf16.msra.mxu0 %v8027_v39  ;;  %6809 = vmatpush1.bf16.msra.mxu1 %v8029_v41  ;;  %v5149_v39 = vld [vmem:[%s9809_s6 + $0xd0] sm:$0xff] }
 0x4ef   : > { %6724 = vmatprep.subr.bf16.mxu0 %v8036_v42  ;;  %6810 = vmatprep.subr.bf16.mxu1 %v8038_v43  ;;  %v5153_v41 = vld [vmem:[%s9809_s6 + $0xf0] sm:$0xff]  ;;  %v5150_v42 = vld [vmem:[%s9809_s6 + $0xd8] sm:$0xff] }
 0x4f0   : > { %v5154_v43 = vld [vmem:[%s9809_s6 + $0xf8] sm:$0xff] }
 0x4f1   : > { %v7850_v46 = vcombine.high %v5150_v42, %v5154_v43  ;;  %v7849_v58 = vcombine.low %v5150_v42, %v5154_v43  ;;  %v5213_v43 = vld [vmem:[%s9809_s6 + $0x2d0] sm:$0xff] }
 0x4f2   : > { %6725 = vmatpush1.bf16.msra.mxu0 %v8035_v51  ;;  %6811 = vmatpush1.bf16.msra.mxu1 %v8037_v52  ;;  %v5161_v51 = vld [vmem:[%s9809_s6 + $0x130] sm:$0xff]  ;;  %v5158_v52 = vld [vmem:[%s9809_s6 + $0x118] sm:$0xff] }
 0x4f3   : > { %6726 = vmatprep.subr.bf16.mxu0 %v8044_v55  ;;  %6812 = vmatprep.subr.bf16.mxu1 %v8046_v29  ;;  %v5162_v55 = vld [vmem:[%s9809_s6 + $0x138] sm:$0xff]  ;;  %v7847_v29 = vcombine.low %v5149_v39, %v5153_v41  ;;  %v7856_v40 = vcombine.high %v5157_v49, %v5161_v51 }
 0x4f4   : > { %v7858_v7 = vcombine.high %v5158_v52, %v5162_v55  ;;  %v7857_v48 = vcombine.low %v5158_v52, %v5162_v55  ;;  %v5221_v55 = vld [vmem:[%s9809_s6 + $0x310] sm:$0xff] }
 0x4f6   : > { %6727 = vmatpush1.bf16.msra.mxu0 %v8043_v54  ;;  %6813 = vmatpush1.bf16.msra.mxu1 %v8045_v62  ;;  %v5169_v54 = vld [vmem:[%s9809_s6 + $0x170] sm:$0xff]  ;;  %v5166_v62 = vld [vmem:[%s9809_s6 + $0x158] sm:$0xff] }
 0x4f7   : > { %6728 = vmatprep.subr.bf16.mxu0 %v8052_v56  ;;  %6814 = vmatprep.subr.bf16.mxu1 %v8054_v53  ;;  %v5170_v56 = vld [vmem:[%s9809_s6 + $0x178] sm:$0xff]  ;;  %v7855_v53 = vcombine.low %v5157_v49, %v5161_v51  ;;  %v7864_v50 = vcombine.high %v5165_v61, %v5169_v54 }
 0x4f8   : > { %v7866_v63 = vcombine.high %v5166_v62, %v5170_v56  ;;  %v7865_v4 = vcombine.low %v5166_v62, %v5170_v56  ;;  %v5229_v56 = vld [vmem:[%s9809_s6 + $0x350] sm:$0xff] }
 0x4fa   : > { %6729 = vmatpush1.bf16.msra.mxu0 %v8051_v2  ;;  %6815 = vmatpush1.bf16.msra.mxu1 %v8053_v3  ;;  %v5177_v2 = vld [vmem:[%s9809_s6 + $0x1b0] sm:$0xff]  ;;  %v5174_v3 = vld [vmem:[%s9809_s6 + $0x198] sm:$0xff] }
 0x4fb   : > { %6730 = vmatprep.subr.bf16.mxu0 %v8060_v57  ;;  %6816 = vmatprep.subr.bf16.mxu1 %v8062_v59  ;;  %v5178_v57 = vld [vmem:[%s9809_s6 + $0x1b8] sm:$0xff]  ;;  %v7863_v59 = vcombine.low %v5165_v61, %v5169_v54  ;;  %v7872_v11 = vcombine.high %v5173_v1, %v5177_v2 }
 0x4fc   : > { %v7874_v6 = vcombine.high %v5174_v3, %v5178_v57  ;;  %v7873_v13 = vcombine.low %v5174_v3, %v5178_v57  ;;  %v5237_v57 = vld [vmem:[%s9809_s6 + $0x390] sm:$0xff] }
 0x4fe   : > { %6731 = vmatpush1.bf16.msra.mxu0 %v8059_v60  ;;  %6817 = vmatpush1.bf16.msra.mxu1 %v8061_v0  ;;  %v5185_v60 = vld [vmem:[%s9809_s6 + $0x1f0] sm:$0xff]  ;;  %v5182_v0 = vld [vmem:[%s9809_s6 + $0x1d8] sm:$0xff] }
 0x4ff   : > { %6732 = vmatprep.subr.bf16.mxu0 %v8068_v10  ;;  %6818 = vmatprep.subr.bf16.mxu1 %v8070_v12  ;;  %v5186_v10 = vld [vmem:[%s9809_s6 + $0x1f8] sm:$0xff]  ;;  %v7871_v12 = vcombine.low %v5173_v1, %v5177_v2  ;;  %v7880_v18 = vcombine.high %v5181_v8, %v5185_v60 }
 0x500   : > { %v7882_v19 = vcombine.high %v5182_v0, %v5186_v10  ;;  %v7881_v25 = vcombine.low %v5182_v0, %v5186_v10  ;;  %v5245_v10 = vld [vmem:[%s9809_s6 + $0x3d0] sm:$0xff] }
 0x502   : > { %6733 = vmatpush1.bf16.msra.mxu0 %v8067_v21  ;;  %6819 = vmatpush1.bf16.msra.mxu1 %v8069_v22  ;;  %v5193_v21 = vld [vmem:[%s9809_s6 + $0x230] sm:$0xff]  ;;  %v5190_v22 = vld [vmem:[%s9809_s6 + $0x218] sm:$0xff] }
 0x503   : > { %6831 = vmatprep.subr.bf16.mxu0 %v7824_v9  ;;  %6917 = vmatprep.subr.bf16.mxu1 %v7826_v24  ;;  %v5194_v9 = vld [vmem:[%s9809_s6 + $0x238] sm:$0xff]  ;;  %v7879_v24 = vcombine.low %v5181_v8, %v5185_v60  ;;  %v7888_v26 = vcombine.high %v5189_v20, %v5193_v21 }
 0x504   : > { %v7890_v27 = vcombine.high %v5190_v22, %v5194_v9  ;;  %v7889_v34 = vcombine.low %v5190_v22, %v5194_v9  ;;  %v5253_v9 = vld [vmem:[%s9809_s6 + $0x410] sm:$0xff] }
 0x505   : > { %6735 = vmatmul.mubr.bf16.vlgmr.msra.gmra.mrb[4].mxu0 %v10606_v15  ;;  %6821 = vmatmul.mubr.bf16.vlgmr.msra.gmra.mrb[4].mxu1 %v10606_v15 }
 0x506   : > { %6832 = vmatpush1.bf16.msra.mxu0 %v7823_v30  ;;  %6863 = vmatprep.mubr.bf16.mxu0 %v10611_v5  ;;  %v5201_v30 = vld [vmem:[%s9809_s6 + $0x270] sm:$0xff] }
 0x507   : > { %6918 = vmatpush1.bf16.msra.mxu1 %v7825_v47  ;;  %6949 = vmatprep.mubr.bf16.mxu1 %v10611_v5  ;;  %v7848_v5 = vcombine.high %v5149_v39, %v5153_v41  ;;  %v5198_v47 = vld [vmem:[%s9809_s6 + $0x258] sm:$0xff]  ;;  %v7896_v31 = vcombine.high %v5197_v28, %v5201_v30 }
 0x508   : > { %6833 = vmatprep.subr.bf16.mxu0 %v7832_v32  ;;  %6919 = vmatprep.subr.bf16.mxu1 %v7834_v16  ;;  %v5202_v32 = vld [vmem:[%s9809_s6 + $0x278] sm:$0xff]  ;;  %v7887_v16 = vcombine.low %v5189_v20, %v5193_v21 }
 0x509   : > { %v7898_v33 = vcombine.high %v5198_v47, %v5202_v32  ;;  %v7897_v39 = vcombine.low %v5198_v47, %v5202_v32  ;;  %v5261_v32 = vld [vmem:[%s9809_s6 + $0x450] sm:$0xff] }
 0x50a   : > { %6834 = vmatpush1.bf16.msra.mxu0 %v7831_v17  ;;  %v5209_v17 = vld [vmem:[%s9809_s6 + $0x2b0] sm:$0xff] }
 0x50b   : > { %6920 = vmatpush1.bf16.msra.mxu1 %v7833_v36  ;;  %6835 = vmatprep.subr.bf16.mxu0 %v7840_v37  ;;  %v5206_v36 = vld [vmem:[%s9809_s6 + $0x298] sm:$0xff]  ;;  %v7904_v41 = vcombine.high %v5205_v35, %v5209_v17 }
 0x50c   : > { %6921 = vmatprep.subr.bf16.mxu1 %v7842_v38  ;;  %v5210_v37 = vld [vmem:[%s9809_s6 + $0x2b8] sm:$0xff]  ;;  %v7895_v38 = vcombine.low %v5197_v28, %v5201_v30 }
 0x50d   : > { %v7906_v42 = vcombine.high %v5206_v36, %v5210_v37  ;;  %v7905_v49 = vcombine.low %v5206_v36, %v5210_v37  ;;  %v5269_v36 = vld [vmem:[%s9809_s6 + $0x490] sm:$0xff] }
 0x50e   : > { %6836 = vmatpush1.bf16.msra.mxu0 %v7839_v44  ;;  %v5217_v44 = vld [vmem:[%s9809_s6 + $0x2f0] sm:$0xff] }
 0x50f   : > { %6922 = vmatpush1.bf16.msra.mxu1 %v7841_v45  ;;  %6837 = vmatprep.subr.bf16.mxu0 %v7848_v5  ;;  %v5214_v45 = vld [vmem:[%s9809_s6 + $0x2d8] sm:$0xff]  ;;  %v7912_v51 = vcombine.high %v5213_v43, %v5217_v44  ;;  %v5273_v37 = vld [vmem:[%s9809_s6 + $0x4b0] sm:$0xff] }
 0x510   : > { %6923 = vmatprep.subr.bf16.mxu1 %v7850_v46  ;;  %v5218_v5 = vld [vmem:[%s9809_s6 + $0x2f8] sm:$0xff]  ;;  %v7903_v46 = vcombine.low %v5205_v35, %v5209_v17 }
 0x511   : > { %v7914_v52 = vcombine.high %v5214_v45, %v5218_v5  ;;  %v7913_v61 = vcombine.low %v5214_v45, %v5218_v5  ;;  %v5277_v5 = vld [vmem:[%s9809_s6 + $0x4d0] sm:$0xff] }
 0x512   : > { %6838 = vmatpush1.bf16.msra.mxu0 %v7847_v29  ;;  %v5225_v29 = vld [vmem:[%s9809_s6 + $0x330] sm:$0xff] }
 0x513   : > { %6924 = vmatpush1.bf16.msra.mxu1 %v7849_v58  ;;  %6839 = vmatprep.subr.bf16.mxu0 %v7856_v40  ;;  %v5222_v58 = vld [vmem:[%s9809_s6 + $0x318] sm:$0xff]  ;;  %v7920_v54 = vcombine.high %v5221_v55, %v5225_v29 }
 0x514   : > { %6925 = vmatprep.subr.bf16.mxu1 %v7858_v7  ;;  %v5226_v40 = vld [vmem:[%s9809_s6 + $0x338] sm:$0xff]  ;;  %v7911_v7 = vcombine.low %v5213_v43, %v5217_v44  ;;  %v7968_v44 = vcombine.high %v5269_v36, %v5273_v37 }
 0x515   : > { %v7922_v62 = vcombine.high %v5222_v58, %v5226_v40  ;;  %v7921_v1 = vcombine.low %v5222_v58, %v5226_v40  ;;  %v5289_v58 = vld [vmem:[%s9809_s6 + $0x530] sm:$0xff]  ;;  %v5286_v40 = vld [vmem:[%s9809_s6 + $0x518] sm:$0xff] }
 0x516   : > { %6840 = vmatpush1.bf16.msra.mxu0 %v7855_v53  ;;  %v5233_v53 = vld [vmem:[%s9809_s6 + $0x370] sm:$0xff] }
 0x517   : > { %6926 = vmatpush1.bf16.msra.mxu1 %v7857_v48  ;;  %6841 = vmatprep.subr.bf16.mxu0 %v7864_v50  ;;  %v5230_v48 = vld [vmem:[%s9809_s6 + $0x358] sm:$0xff]  ;;  %v7928_v2 = vcombine.high %v5229_v56, %v5233_v53 }
 0x518   : > { %6927 = vmatprep.subr.bf16.mxu1 %v7866_v63  ;;  %v5234_v50 = vld [vmem:[%s9809_s6 + $0x378] sm:$0xff]  ;;  %v7919_v63 = vcombine.low %v5221_v55, %v5225_v29  ;;  %v5285_v29 = vld [vmem:[%s9809_s6 + $0x510] sm:$0xff] }
 0x519   : > { %v7930_v3 = vcombine.high %v5230_v48, %v5234_v50  ;;  %v7929_v8 = vcombine.low %v5230_v48, %v5234_v50  ;;  %v5297_v48 = vld [vmem:[%s9809_s6 + $0x570] sm:$0xff]  ;;  %v5294_v50 = vld [vmem:[%s9809_s6 + $0x558] sm:$0xff] }
 0x51a   : > { %6842 = vmatpush1.bf16.msra.mxu0 %v7863_v59  ;;  %v5241_v59 = vld [vmem:[%s9809_s6 + $0x3b0] sm:$0xff] }
 0x51b   : > { %6928 = vmatpush1.bf16.msra.mxu1 %v7865_v4  ;;  %6843 = vmatprep.subr.bf16.mxu0 %v7872_v11  ;;  %v5238_v4 = vld [vmem:[%s9809_s6 + $0x398] sm:$0xff]  ;;  %v7936_v60 = vcombine.high %v5237_v57, %v5241_v59 }
 0x51c   : > { %6929 = vmatprep.subr.bf16.mxu1 %v7874_v6  ;;  %v5242_v11 = vld [vmem:[%s9809_s6 + $0x3b8] sm:$0xff]  ;;  %v7927_v6 = vcombine.low %v5229_v56, %v5233_v53  ;;  %v5293_v53 = vld [vmem:[%s9809_s6 + $0x550] sm:$0xff] }
 0x51d   : > { %v7938_v0 = vcombine.high %v5238_v4, %v5242_v11  ;;  %v7937_v20 = vcombine.low %v5238_v4, %v5242_v11  ;;  %v5305_v4 = vld [vmem:[%s9809_s6 + $0x5b0] sm:$0xff]  ;;  %v5302_v11 = vld [vmem:[%s9809_s6 + $0x598] sm:$0xff] }
 0x51e   : > { %6844 = vmatpush1.bf16.msra.mxu0 %v7871_v12  ;;  %v5249_v12 = vld [vmem:[%s9809_s6 + $0x3f0] sm:$0xff] }
 0x51f   : > { %6930 = vmatpush1.bf16.msra.mxu1 %v7873_v13  ;;  %6845 = vmatprep.subr.bf16.mxu0 %v7880_v18  ;;  %v5246_v13 = vld [vmem:[%s9809_s6 + $0x3d8] sm:$0xff]  ;;  %v7944_v21 = vcombine.high %v5245_v10, %v5249_v12 }
 0x520   : > { %6931 = vmatprep.subr.bf16.mxu1 %v7882_v19  ;;  %v5250_v18 = vld [vmem:[%s9809_s6 + $0x3f8] sm:$0xff]  ;;  %v7935_v19 = vcombine.low %v5237_v57, %v5241_v59  ;;  %v5301_v59 = vld [vmem:[%s9809_s6 + $0x590] sm:$0xff] }
 0x521   : > { %v7946_v22 = vcombine.high %v5246_v13, %v5250_v18  ;;  %v7945_v28 = vcombine.low %v5246_v13, %v5250_v18  ;;  %v5313_v13 = vld [vmem:[%s9809_s6 + $0x5f0] sm:$0xff]  ;;  %v5310_v18 = vld [vmem:[%s9809_s6 + $0x5d8] sm:$0xff] }
 0x522   : > { %6846 = vmatpush1.bf16.msra.mxu0 %v7879_v24  ;;  %v5257_v24 = vld [vmem:[%s9809_s6 + $0x430] sm:$0xff] }
 0x523   : > { %6932 = vmatpush1.bf16.msra.mxu1 %v7881_v25  ;;  %6847 = vmatprep.subr.bf16.mxu0 %v7888_v26  ;;  %v5254_v25 = vld [vmem:[%s9809_s6 + $0x418] sm:$0xff]  ;;  %v7952_v30 = vcombine.high %v5253_v9, %v5257_v24 }
 0x524   : > { %6933 = vmatprep.subr.bf16.mxu1 %v7890_v27  ;;  %v5258_v26 = vld [vmem:[%s9809_s6 + $0x438] sm:$0xff]  ;;  %v7943_v27 = vcombine.low %v5245_v10, %v5249_v12  ;;  %v5309_v12 = vld [vmem:[%s9809_s6 + $0x5d0] sm:$0xff] }
 0x525   : > { %v7954_v47 = vcombine.high %v5254_v25, %v5258_v26  ;;  %v7953_v35 = vcombine.low %v5254_v25, %v5258_v26  ;;  %v5321_v25 = vld [vmem:[%s9809_s6 + $0x630] sm:$0xff]  ;;  %v5318_v26 = vld [vmem:[%s9809_s6 + $0x618] sm:$0xff] }
 0x526   : > { %6848 = vmatpush1.bf16.msra.mxu0 %v7887_v16  ;;  %v5265_v16 = vld [vmem:[%s9809_s6 + $0x470] sm:$0xff] }
 0x527   : > { %6934 = vmatpush1.bf16.msra.mxu1 %v7889_v34  ;;  %6849 = vmatprep.subr.bf16.mxu0 %v7896_v31  ;;  %v7951_v34 = vcombine.low %v5253_v9, %v5257_v24  ;;  %v5262_v31 = vld [vmem:[%s9809_s6 + $0x458] sm:$0xff]  ;;  %v7960_v17 = vcombine.high %v5261_v32, %v5265_v16  ;;  %v5317_v24 = vld [vmem:[%s9809_s6 + $0x610] sm:$0xff] }
 0x528   : > { %6935 = vmatprep.subr.bf16.mxu1 %v7898_v33  ;;  %v5266_v33 = vld [vmem:[%s9809_s6 + $0x478] sm:$0xff] }
 0x529   : > { %v7961_v43 = vcombine.low %v5262_v31, %v5266_v33 }
 0x52a   : > { %6850 = vmatpush1.bf16.msra.mxu0 %v7895_v38  ;;  %v7962_v38 = vcombine.high %v5262_v31, %v5266_v33  ;;  %v5326_v31 = vld [vmem:[%s9809_s6 + $0x658] sm:$0xff] }
 0x52b   : > { %6936 = vmatpush1.bf16.msra.mxu1 %v7897_v39  ;;  %6851 = vmatprep.subr.bf16.mxu0 %v7904_v41  ;;  %v5270_v39 = vld [vmem:[%s9809_s6 + $0x498] sm:$0xff] }
 0x52c   : > { %6937 = vmatprep.subr.bf16.mxu1 %v7906_v42  ;;  %v5274_v41 = vld [vmem:[%s9809_s6 + $0x4b8] sm:$0xff]  ;;  %v7959_v42 = vcombine.low %v5261_v32, %v5265_v16  ;;  %v5325_v16 = vld [vmem:[%s9809_s6 + $0x650] sm:$0xff] }
 0x52d   : > { %v7970_v45 = vcombine.high %v5270_v39, %v5274_v41  ;;  %v5330_v33 = vld [vmem:[%s9809_s6 + $0x678] sm:$0xff] }
 0x52e   : > { %6852 = vmatpush1.bf16.msra.mxu0 %v7903_v46  ;;  %v5281_v46 = vld [vmem:[%s9809_s6 + $0x4f0] sm:$0xff] }
 0x52f   : > { %6938 = vmatpush1.bf16.msra.mxu1 %v7905_v49  ;;  %6853 = vmatprep.subr.bf16.mxu0 %v7912_v51  ;;  %v5278_v49 = vld [vmem:[%s9809_s6 + $0x4d8] sm:$0xff]  ;;  %v7967_v51 = vcombine.low %v5269_v36, %v5273_v37  ;;  %v7976_v55 = vcombine.high %v5277_v5, %v5281_v46  ;;  %v8026_v37 = vcombine.high %v5326_v31, %v5330_v33 }
 0x530   : > { %6939 = vmatprep.subr.bf16.mxu1 %v7914_v52  ;;  %v7969_v52 = vcombine.low %v5270_v39, %v5274_v41  ;;  %v5337_v39 = vld [vmem:[%s9809_s6 + $0x6b0] sm:$0xff]  ;;  %v5334_v41 = vld [vmem:[%s9809_s6 + $0x698] sm:$0xff] }
 0x532   : > { %6854 = vmatpush1.bf16.msra.mxu0 %v7911_v7  ;;  %v5290_v7 = vld [vmem:[%s9809_s6 + $0x538] sm:$0xff] }
 0x533   : > { %6940 = vmatpush1.bf16.msra.mxu1 %v7913_v61  ;;  %6855 = vmatprep.subr.bf16.mxu0 %v7920_v54  ;;  %v7975_v61 = vcombine.low %v5277_v5, %v5281_v46  ;;  %v7986_v56 = vcombine.high %v5286_v40, %v5290_v7  ;;  %v5341_v46 = vld [vmem:[%s9809_s6 + $0x6d0] sm:$0xff] }
 0x534   : > { %6941 = vmatprep.subr.bf16.mxu1 %v7922_v62  ;;  %v7984_v62 = vcombine.high %v5285_v29, %v5289_v58 }
 0x536   : > { %6856 = vmatpush1.bf16.msra.mxu0 %v7919_v63  ;;  %v5298_v63 = vld [vmem:[%s9809_s6 + $0x578] sm:$0xff] }
 0x537   : > { %6942 = vmatpush1.bf16.msra.mxu1 %v7921_v1  ;;  %6857 = vmatprep.subr.bf16.mxu0 %v7928_v2  ;;  %v7983_v1 = vcombine.low %v5285_v29, %v5289_v58  ;;  %v7985_v2 = vcombine.low %v5286_v40, %v5290_v7  ;;  %v7994_v57 = vcombine.high %v5294_v50, %v5298_v63  ;;  %v5349_v58 = vld [vmem:[%s9809_s6 + $0x710] sm:$0xff]  ;;  %v5350_v7 = vld [vmem:[%s9809_s6 + $0x718] sm:$0xff] }
 0x538   : > { %6943 = vmatprep.subr.bf16.mxu1 %v7930_v3  ;;  %v7992_v3 = vcombine.high %v5293_v53, %v5297_v48  ;;  %v5353_v40 = vld [vmem:[%s9809_s6 + $0x730] sm:$0xff] }
 0x53a   : > { %6858 = vmatpush1.bf16.msra.mxu0 %v7927_v6  ;;  %v5306_v6 = vld [vmem:[%s9809_s6 + $0x5b8] sm:$0xff] }
 0x53b   : > { %6944 = vmatpush1.bf16.msra.mxu1 %v7929_v8  ;;  %6859 = vmatprep.subr.bf16.mxu0 %v7936_v60  ;;  %v7991_v8 = vcombine.low %v5293_v53, %v5297_v48  ;;  %v7993_v60 = vcombine.low %v5294_v50, %v5298_v63  ;;  %v8002_v10 = vcombine.high %v5302_v11, %v5306_v6  ;;  %v5357_v48 = vld [vmem:[%s9809_s6 + $0x750] sm:$0xff]  ;;  %v5358_v63 = vld [vmem:[%s9809_s6 + $0x758] sm:$0xff] }
 0x53c   : > { %6945 = vmatprep.subr.bf16.mxu1 %v7938_v0  ;;  %v8000_v0 = vcombine.high %v5301_v59, %v5305_v4  ;;  %v5361_v50 = vld [vmem:[%s9809_s6 + $0x770] sm:$0xff] }
 0x53e   : > { %6860 = vmatpush1.bf16.msra.mxu0 %v7935_v19  ;;  %v5314_v19 = vld [vmem:[%s9809_s6 + $0x5f8] sm:$0xff] }
 0x53f   : > { %6946 = vmatpush1.bf16.msra.mxu1 %v7937_v20  ;;  %6861 = vmatprep.subr.bf16.mxu0 %v7944_v21  ;;  %v7999_v20 = vcombine.low %v5301_v59, %v5305_v4  ;;  %v8001_v21 = vcombine.low %v5302_v11, %v5306_v6  ;;  %v8010_v9 = vcombine.high %v5310_v18, %v5314_v19  ;;  %v5365_v4 = vld [vmem:[%s9809_s6 + $0x790] sm:$0xff]  ;;  %v5366_v6 = vld [vmem:[%s9809_s6 + $0x798] sm:$0xff] }
 0x540   : > { %6947 = vmatprep.subr.bf16.mxu1 %v7946_v22  ;;  %v8008_v22 = vcombine.high %v5309_v12, %v5313_v13  ;;  %v5369_v11 = vld [vmem:[%s9809_s6 + $0x7b0] sm:$0xff] }
 0x542   : > { %6862 = vmatpush1.bf16.msra.mxu0 %v7943_v27  ;;  %v5322_v27 = vld [vmem:[%s9809_s6 + $0x638] sm:$0xff] }
 0x543   : > { %6948 = vmatpush1.bf16.msra.mxu1 %v7945_v28  ;;  %6874 = vmatprep.subr.bf16.mxu0 %v7952_v30  ;;  %v8007_v28 = vcombine.low %v5309_v12, %v5313_v13  ;;  %v8009_v30 = vcombine.low %v5310_v18, %v5314_v19  ;;  %v8018_v32 = vcombine.high %v5318_v26, %v5322_v27  ;;  %v5373_v13 = vld [vmem:[%s9809_s6 + $0x7d0] sm:$0xff]  ;;  %v5374_v19 = vld [vmem:[%s9809_s6 + $0x7d8] sm:$0xff] }
 0x544   : > { %6960 = vmatprep.subr.bf16.mxu1 %v7954_v47  ;;  %v8016_v47 = vcombine.high %v5317_v24, %v5321_v25  ;;  %v5377_v18 = vld [vmem:[%s9809_s6 + $0x7f0] sm:$0xff] }
 0x545   : > { %6864 = vmatmul.mubr.bf16.vlgmr.msra.gmra.mrb[8].mxu0 %v10604_v14 }
 0x546   : > { %6950 = vmatmul.mubr.bf16.vlgmr.msra.gmra.mrb[8].mxu1 %v10604_v14  ;;  %6875 = vmatpush1.bf16.msra.mxu0 %v7951_v34  ;;  %v5282_v14 = vld [vmem:[%s9809_s6 + $0x4f8] sm:$0xff]  ;;  %v5329_v34 = vld [vmem:[%s9809_s6 + $0x670] sm:$0xff] }
 0x547   : > { %6906 = vmatprep.mubr.bf16.mxu0 %v10613_v23  ;;  %6961 = vmatpush1.bf16.msra.mxu1 %v7953_v35  ;;  %v7977_v54 = vcombine.low %v5278_v49, %v5282_v14  ;;  %v8015_v35 = vcombine.low %v5317_v24, %v5321_v25  ;;  %v8024_v36 = vcombine.high %v5325_v16, %v5329_v34 }
 0x548   : > { %6992 = vmatprep.mubr.bf16.mxu1 %v10613_v23  ;;  %6876 = vmatprep.subr.bf16.mxu0 %v7960_v17  ;;  %v7978_v23 = vcombine.high %v5278_v49, %v5282_v14  ;;  %v8017_v17 = vcombine.low %v5318_v26, %v5322_v27  ;;  %v5345_v49 = vld [vmem:[%s9809_s6 + $0x6f0] sm:$0xff]  ;;  %v5342_v14 = vld [vmem:[%s9809_s6 + $0x6d8] sm:$0xff]  ;;  %v8071_v25 = vcombine.low %v5373_v13, %v5377_v18 }
 0x549   : > { %6962 = vmatprep.subr.bf16.mxu1 %v7962_v38  ;;  %v5333_v38 = vld [vmem:[%s9809_s6 + $0x690] sm:$0xff] }
 0x54a   : > { %6877 = vmatpush1.bf16.msra.mxu0 %v7959_v42  ;;  %v5338_v42 = vld [vmem:[%s9809_s6 + $0x6b8] sm:$0xff] }
 0x54b   : > { %6963 = vmatpush1.bf16.msra.mxu1 %v7961_v43  ;;  %6878 = vmatprep.subr.bf16.mxu0 %v7968_v44  ;;  %v8023_v43 = vcombine.low %v5325_v16, %v5329_v34  ;;  %v8025_v44 = vcombine.low %v5326_v31, %v5330_v33  ;;  %v8034_v5 = vcombine.high %v5334_v41, %v5338_v42 }
 0x54c   : > { %6964 = vmatprep.subr.bf16.mxu1 %v7970_v45  ;;  %v8032_v45 = vcombine.high %v5333_v38, %v5337_v39 }
 0x54e   : > { %6879 = vmatpush1.bf16.msra.mxu0 %v7967_v51  ;;  %v5346_v51 = vld [vmem:[%s9809_s6 + $0x6f8] sm:$0xff] }
 0x54f   : > { %6965 = vmatpush1.bf16.msra.mxu1 %v7969_v52  ;;  %6880 = vmatprep.subr.bf16.mxu0 %v7976_v55  ;;  %v8031_v52 = vcombine.low %v5333_v38, %v5337_v39  ;;  %v8033_v55 = vcombine.low %v5334_v41, %v5338_v42  ;;  %v8042_v29 = vcombine.high %v5342_v14, %v5346_v51 }
 0x550   : > { %6966 = vmatprep.subr.bf16.mxu1 %v7978_v23  ;;  %v8040_v23 = vcombine.high %v5341_v46, %v5345_v49 }
 0x552   : > { %6881 = vmatpush1.bf16.msra.mxu0 %v7975_v61  ;;  %v5354_v61 = vld [vmem:[%s9809_s6 + $0x738] sm:$0xff] }
 0x553   : > { %6967 = vmatpush1.bf16.msra.mxu1 %v7977_v54  ;;  %6882 = vmatprep.subr.bf16.mxu0 %v7984_v62  ;;  %v8039_v54 = vcombine.low %v5341_v46, %v5345_v49  ;;  %v8041_v62 = vcombine.low %v5342_v14, %v5346_v51  ;;  %v8050_v53 = vcombine.high %v5350_v7, %v5354_v61 }
 0x554   : > { %6968 = vmatprep.subr.bf16.mxu1 %v7986_v56  ;;  %v8048_v56 = vcombine.high %v5349_v58, %v5353_v40 }
 0x556   : > { %6883 = vmatpush1.bf16.msra.mxu0 %v7983_v1  ;;  %v5362_v1 = vld [vmem:[%s9809_s6 + $0x778] sm:$0xff] }
 0x557   : > { %6969 = vmatpush1.bf16.msra.mxu1 %v7985_v2  ;;  %6884 = vmatprep.subr.bf16.mxu0 %v7992_v3  ;;  %v8047_v2 = vcombine.low %v5349_v58, %v5353_v40  ;;  %v8049_v3 = vcombine.low %v5350_v7, %v5354_v61  ;;  %v8058_v59 = vcombine.high %v5358_v63, %v5362_v1 }
 0x558   : > { %6970 = vmatprep.subr.bf16.mxu1 %v7994_v57  ;;  %v8056_v57 = vcombine.high %v5357_v48, %v5361_v50 }
 0x55a   : > { %6885 = vmatpush1.bf16.msra.mxu0 %v7991_v8  ;;  %v5370_v8 = vld [vmem:[%s9809_s6 + $0x7b8] sm:$0xff] }
 0x55b   : > { %6971 = vmatpush1.bf16.msra.mxu1 %v7993_v60  ;;  %6886 = vmatprep.subr.bf16.mxu0 %v8000_v0  ;;  %v8055_v60 = vcombine.low %v5357_v48, %v5361_v50  ;;  %v8057_v0 = vcombine.low %v5358_v63, %v5362_v1  ;;  %v8066_v12 = vcombine.high %v5366_v6, %v5370_v8 }
 0x55c   : > { %6972 = vmatprep.subr.bf16.mxu1 %v8002_v10  ;;  %v8064_v10 = vcombine.high %v5365_v4, %v5369_v11 }
 0x55e   : > { %6887 = vmatpush1.bf16.msra.mxu0 %v7999_v20  ;;  %v5378_v20 = vld [vmem:[%s9809_s6 + $0x7f8] sm:$0xff] }
 0x55f   : > { %6973 = vmatpush1.bf16.msra.mxu1 %v8001_v21  ;;  %6888 = vmatprep.subr.bf16.mxu0 %v8008_v22  ;;  %v8063_v21 = vcombine.low %v5365_v4, %v5369_v11  ;;  %v8065_v22 = vcombine.low %v5366_v6, %v5370_v8  ;;  %v8074_v24 = vcombine.high %v5374_v19, %v5378_v20 }
 0x560   : > { %6974 = vmatprep.subr.bf16.mxu1 %v8010_v9  ;;  %v8072_v9 = vcombine.high %v5373_v13, %v5377_v18  ;;  %v8073_v26 = vcombine.low %v5374_v19, %v5378_v20 }
 0x562   : > { %6889 = vmatpush1.bf16.msra.mxu0 %v8007_v28 }
 0x563   : > { %6975 = vmatpush1.bf16.msra.mxu1 %v8009_v30  ;;  %6890 = vmatprep.subr.bf16.mxu0 %v8016_v47 }
 0x564   : > { %6976 = vmatprep.subr.bf16.mxu1 %v8018_v32 }
 0x566   : > { %6891 = vmatpush1.bf16.msra.mxu0 %v8015_v35 }
 0x567   : > { %6977 = vmatpush1.bf16.msra.mxu1 %v8017_v17  ;;  %6892 = vmatprep.subr.bf16.mxu0 %v8024_v36 }
 0x568   : > { %6978 = vmatprep.subr.bf16.mxu1 %v8026_v37 }
 0x56a   : > { %6893 = vmatpush1.bf16.msra.mxu0 %v8023_v43 }
 0x56b   : > { %6979 = vmatpush1.bf16.msra.mxu1 %v8025_v44  ;;  %6894 = vmatprep.subr.bf16.mxu0 %v8032_v45 }
 0x56c   : > { %6980 = vmatprep.subr.bf16.mxu1 %v8034_v5 }
 0x56e   : > { %6895 = vmatpush1.bf16.msra.mxu0 %v8031_v52 }
 0x56f   : > { %6981 = vmatpush1.bf16.msra.mxu1 %v8033_v55  ;;  %6896 = vmatprep.subr.bf16.mxu0 %v8040_v23 }
 0x570   : > { %6982 = vmatprep.subr.bf16.mxu1 %v8042_v29 }
 0x572   : > { %6897 = vmatpush1.bf16.msra.mxu0 %v8039_v54 }
 0x573   : > { %6983 = vmatpush1.bf16.msra.mxu1 %v8041_v62  ;;  %6898 = vmatprep.subr.bf16.mxu0 %v8048_v56 }
 0x574   : > { %6984 = vmatprep.subr.bf16.mxu1 %v8050_v53 }
 0x576   : > { %6899 = vmatpush1.bf16.msra.mxu0 %v8047_v2 }
 0x577   : > { %6985 = vmatpush1.bf16.msra.mxu1 %v8049_v3  ;;  %6900 = vmatprep.subr.bf16.mxu0 %v8056_v57 }
 0x578   : > { %6986 = vmatprep.subr.bf16.mxu1 %v8058_v59 }
 0x57a   : > { %6901 = vmatpush1.bf16.msra.mxu0 %v8055_v60 }
 0x57b   : > { %6987 = vmatpush1.bf16.msra.mxu1 %v8057_v0  ;;  %6902 = vmatprep.subr.bf16.mxu0 %v8064_v10 }
 0x57c   : > { %6988 = vmatprep.subr.bf16.mxu1 %v8066_v12 }
 0x57e   : > { %6903 = vmatpush1.bf16.msra.mxu0 %v8063_v21 }
 0x57f   : > { %6989 = vmatpush1.bf16.msra.mxu1 %v8065_v22  ;;  %6904 = vmatprep.subr.bf16.mxu0 %v8072_v9 }
 0x580   : > { %6990 = vmatprep.subr.bf16.mxu1 %v8074_v24 }
 0x582   : > { %6905 = vmatpush1.bf16.msra.mxu0 %v8071_v25 }
 0x583   : > { %6991 = vmatpush1.bf16.msra.mxu1 %v8073_v26 }
 0x585   : > { %6907 = vmatmul.mubr.bf16.vlgmr.msra.gmra.mrb[8].mxu0 %v10606_v15 }
 0x586   : > { %6993 = vmatmul.mubr.bf16.vlgmr.msra.gmra.mrb[8].mxu1 %v10606_v15 }
 0x5d8   : > { %v6736_v27 = vpop.f32.mrb[4].mxu0  ;;  %v6822_v28 = vpop.f32.mrb[4].mxu1 }
 0x5d9   : > { %7003 = vst [vmem:[%s9807_s2] sm:$0xff] %v6736_v27  ;;  %7005 = vst [vmem:[%s9807_s2 + $0x10] sm:$0xff] %v6822_v28  ;;  %v6738_v30 = vpop.f32.mrb[5].mxu0  ;;  %v6824_v47 = vpop.f32.mrb[5].mxu1 }
 0x5da   : > { %7004 = vst [vmem:[%s9807_s2 + $0x8] sm:$0xff] %v6738_v30  ;;  %7006 = vst [vmem:[%s9807_s2 + $0x18] sm:$0xff] %v6824_v47  ;;  %v6740_v32 = vpop.f32.mrb[6].mxu0  ;;  %v6826_v16 = vpop.f32.mrb[6].mxu1 }
 0x5db   : > { %7011 = vst [vmem:[%s9807_s2 + $0x40] sm:$0xff] %v6740_v32  ;;  %7013 = vst [vmem:[%s9807_s2 + $0x50] sm:$0xff] %v6826_v16  ;;  %v6742_v34 = vpop.f32.mrb[7].mxu0  ;;  %v6828_v15 = vpop.f32.mrb[7].mxu1 }
 0x5dc   : > { %7012 = vst [vmem:[%s9807_s2 + $0x48] sm:$0xff] %v6742_v34  ;;  %7014 = vst [vmem:[%s9807_s2 + $0x58] sm:$0xff] %v6828_v15 }
 0x658   : > { %v6908_v31 = vpop.f32.mrb[8].mxu0 }
 0x659   : > { %7007 = vst [vmem:[%s9807_s2 + $0x20] sm:$0xff] %v6908_v31  ;;  %v6994_v33 = vpop.f32.mrb[8].mxu1  ;;  %v6910_v35 = vpop.f32.mrb[9].mxu0 }
 0x65a   : > { %7009 = vst [vmem:[%s9807_s2 + $0x30] sm:$0xff] %v6994_v33  ;;  %7008 = vst [vmem:[%s9807_s2 + $0x28] sm:$0xff] %v6910_v35  ;;  %v6996_v17 = vpop.f32.mrb[9].mxu1  ;;  %v6912_v36 = vpop.f32.mrb[10].mxu0 }
 0x65b   : > { %7010 = vst [vmem:[%s9807_s2 + $0x38] sm:$0xff] %v6996_v17  ;;  %7015 = vst [vmem:[%s9807_s2 + $0x60] sm:$0xff] %v6912_v36  ;;  %v6998_v37 = vpop.f32.mrb[10].mxu1  ;;  %v6914_v38 = vpop.f32.mrb[11].mxu0 }
 0x65c   : > { %7017 = vst [vmem:[%s9807_s2 + $0x70] sm:$0xff] %v6998_v37  ;;  %7016 = vst [vmem:[%s9807_s2 + $0x68] sm:$0xff] %v6914_v38  ;;  %v7000_v39 = vpop.f32.mrb[11].mxu1 }
 0x65d   : > { %7018 = vst [vmem:[%s9807_s2 + $0x78] sm:$0xff] %v7000_v39 }
 0x65e PF: > { %s25_s7 = sadd.s32 1, %s9440_s7   ;;  %s10915_s8 = sld [smem:[#allocation15_spill]] }
 0x65f   : > { %p22_p9 = scmp.ge.s32.totalorder %s25_s7, 6   ;;  %s10916_s23 = sld [smem:[#allocation20_spill]] }
 0x660   : > { %s10917_s0 = sld [smem:[#allocation21_spill]]  ;;  %s10918_s27 = sld [smem:[#allocation17_spill]] }
 0x661   : > { %s10919_s29 = sld [smem:[#allocation18_spill]]  ;;  %s10920_s19 = sld [smem:[#allocation19_spill]] }
 0x662   : > { %s10921_s21 = smov %s9404_s22  ;;  %s10923_s24 = smov %s9416_s25 }
 0x663   : > { %s10924_s25 = smov %s9420_s26  ;;  %s10926_s28 = smov %s9436_s30 }
 0x664   : > { %s10922_s22 = smov %s10915_s8  ;;  %24 = sbr.rel (!%p22_p9) target bundleno = 16 (0x10), region = 180 }
 0x666   : > { %s10925_s26 = smov %s10917_s0 }
 0x667   : > { %s10927_s30 = smov %s10920_s19 }
 0x66b   :  { %7040 = vsyncpa [#allocation5], 1 }
 0x66c   :  { %7042 = vsyncpa [#allocation5 + $0x1], 1 }
 0x66d   :  { %7043 = vsyncpa [#allocation7], 1 }
 0x66e   :  { %7045 = vsyncpa [#allocation7 + $0x1], 1 }
 0x66f   :  { %7046 = vsyncpa [#allocation10], 1 }
 0x670   :  { %7048 = vsyncpa [#allocation10 + $0x1], 1 }

</bundles_post_ra>
